<compile_context>
chip_gen: v5e
topology: v5e:2x2
jax: 0.10.0
libtpu: 0.0.40
codegen_flags: <defaults>
</compile_context>

<pallas_src>
import numpy as np
import jax
import jax.numpy as jnp
from jax.experimental import pallas as pl
from jax.experimental.pallas import tpu as pltpu

# ---- small, deterministic configuration (module __init__ analogues) -----------------
NUM_REGIONS = 8        # proxy number of segments per image (<= 8*MAX_NUM_BIT, <= MAX_NUM_RECTS)
MAX_NUM_RECTS = 16
MAX_NUM_PLANES = 4
MAX_NUM_BIT = 8        # bytes of region-id bitfield -> id space J = 8 * MAX_NUM_BIT = 64
RECT_PAD_LANES = 128   # lane-dense padding for the per-region rect / accumulator layout
_VMEM_LIMIT = 64 * 1024 * 1024


def _pick_row_tile(H, W, bytes_per_px, budget_bytes=20 * 1024 * 1024):
    """Largest row tile (divides H, int8/uint8 friendly) whose per-step VMEM footprint
    (double-buffered blocks + in-kernel temporaries ~ bytes_per_px*TH*W) fits the budget.
    Falls back to the whole H (single tile) for small/odd heights."""
    max_th = max(8, budget_bytes // max(1, bytes_per_px * W))
    for th in (512, 256, 128, 64, 32, 16, 8):
        if th <= max_th and th <= H and H % th == 0:
            return th
    return H


# ---------------------------------------------------------------------------------------
# Kernel 1: per-image label plane (segmentation proxy) + per-region bbox reductions,
#           row-tiled with one fused lane-dense scratch accumulator (init/finalize pattern).
# ---------------------------------------------------------------------------------------
def _segment_kernel(gray_ref, lab_ref, rect_ref, acc_ref):
    # gray_ref: (1, TH, W) uint8   -- row tile of the gray plane
    # lab_ref : (1, TH, W) int8    -- row tile of the label plane (values < NUM_REGIONS)
    # rect_ref: (1, R, 128) int32  -- lane-padded xywh per region (resident across rows)
    # acc_ref : (R, 128) int32 VMEM scratch; lanes 0..4 = xmin, xmax, ymin, ymax, count
    t = pl.program_id(1)
    R = NUM_REGIONS
    BIG = jnp.int32(1 << 30)

    gray = gray_ref[0].astype(jnp.int32)        # free widening cast on the VPU
    lab = (gray * R) >> 8                       # mul + shift: no integer-divide lowering
    lab_ref[0] = lab.astype(jnp.int8)

    TH, W = lab.shape
    col = jax.lax.broadcasted_iota(jnp.int32, (R, RECT_PAD_LANES), 1)
    lane = jax.lax.broadcasted_iota(jnp.int32, (1, RECT_PAD_LANES), 1)
    is_min_col = (col == 0) | (col == 2)
    is_max_col = (col == 1) | (col == 3)

    @pl.when(t == 0)
    def _():
        acc_ref[...] = jnp.where(is_min_col, BIG, jnp.where(is_max_col, -BIG, 0))

    x_iota = jax.lax.broadcasted_iota(jnp.int32, (1, W), 1)
    y_iota = jax.lax.broadcasted_iota(jnp.int32, (TH, 1), 0) + t * TH

    # Per-region staged lane/sublane reductions; temporaries bounded by one (TH, W) plane.
    rows = []
    for r in range(R):                                              # static unroll, R = 8
        eq = (lab == r).astype(jnp.int32)                           # (TH, W)
        row_any = jnp.max(eq, axis=1, keepdims=True)                # (TH, 1)
        col_any = jnp.max(eq, axis=0, keepdims=True)                # (1, W)
        cnt = jnp.sum(jnp.sum(eq, axis=1, keepdims=True),
                      axis=0, keepdims=True)                        # (1, 1)
        x_min = jnp.min(jnp.where(col_any > 0, x_iota, BIG), axis=1, keepdims=True)
        x_max = jnp.max(jnp.where(col_any > 0, x_iota, -BIG), axis=1, keepdims=True)
        y_min = jnp.min(jnp.where(row_any > 0, y_iota, BIG), axis=0, keepdims=True)
        y_max = jnp.max(jnp.where(row_any > 0, y_iota, -BIG), axis=0, keepdims=True)
        row = jnp.where(lane == 0, x_min,
              jnp.where(lane == 1, x_max,
              jnp.where(lane == 2, y_min,
              jnp.where(lane == 3, y_max,
              jnp.where(lane == 4, cnt, 0)))))                      # (1, 128) lane-dense
        rows.append(row)
    tile_vals = jnp.concatenate(rows, axis=0)                       # (R, 128)

    old = acc_ref[...]
    acc_ref[...] = jnp.where(is_min_col, jnp.minimum(old, tile_vals),
                   jnp.where(is_max_col, jnp.maximum(old, tile_vals),
                             old + tile_vals))                      # single fused store

    @pl.when(t == pl.num_programs(1) - 1)
    def _():
        acc = acc_ref[...]
        xmin = acc[:, 0:1]
        xmax = acc[:, 1:2]
        ymin = acc[:, 2:3]
        ymax = acc[:, 3:4]
        cnt = acc[:, 4:5]
        present = cnt > 0
        x0 = jnp.where(present, xmin, 0)
        y0 = jnp.where(present, ymin, 0)
        w = jnp.where(present, xmax - xmin + 1, 0)
        h = jnp.where(present, ymax - ymin + 1, 0)
        rect_ref[0] = jnp.where(col == 0, x0,
                      jnp.where(col == 1, y0,
                      jnp.where(col == 2, w,
                      jnp.where(col == 3, h, 0))))                  # (R, 128) lane-dense


def segment_pallas(gray_bhw_u8):
    B, H, W = gray_bhw_u8.shape
    R = NUM_REGIONS
    th = _pick_row_tile(H, W, bytes_per_px=24)
    n_tiles = H // th
    # NOTE(perf): for v7x with B == 1 a second parallel (W-split) axis with per-core
    # partial accumulators would use both TensorCores; omitted for simplicity.
    lab, rect_pad = pl.pallas_call(
        _segment_kernel,
        out_shape=(jax.ShapeDtypeStruct((B, H, W), jnp.int8),
                   jax.ShapeDtypeStruct((B, R, RECT_PAD_LANES), jnp.int32)),
        grid=(B, n_tiles),
        in_specs=[pl.BlockSpec((1, th, W), lambda b, t: (b, t, 0))],
        out_specs=(pl.BlockSpec((1, th, W), lambda b, t: (b, t, 0)),
                   pl.BlockSpec((1, R, RECT_PAD_LANES), lambda b, t: (b, 0, 0))),
        scratch_shapes=[pltpu.VMEM((R, RECT_PAD_LANES), jnp.int32)],
        compiler_params=pltpu.CompilerParams(
            dimension_semantics=("parallel", "arbitrary"),
            vmem_limit_bytes=_VMEM_LIMIT),
    )(gray_bhw_u8)
    return lab, rect_pad[:, :, :4]


# ---------------------------------------------------------------------------------------
# Kernel 2: get_region_mask hot path via per-pixel bitfield lookup, row-tiled.
#   mask[r][y,x] = bit `lab[y,x]` of region r's 64-bit membership (4 x 16-bit words, SMEM).
# Plane selection and output slot are data dependent -> scalar-prefetch index_maps.
# ---------------------------------------------------------------------------------------
def _region_mask_kernel(plane_ref, orig_ref, words_ref, lab_ref, out_ref):
    # plane_ref: (Rt,)   int32 SMEM (used only by the lab index_map)
    # orig_ref : (Rt,)   int32 SMEM (used only by the out index_map)
    # words_ref: (Rt, 4) int32 SMEM -- 16 membership bits per word (ids 0..63)
    # lab_ref  : (1, TH, W) int8   -- row tile of region r's plane (plane-sorted -> DMA reuse)
    # out_ref  : (1, TH, W) int8   -- 0/1 mask row tile written to the region's original slot
    r = pl.program_id(1)
    lab = lab_ref[0].astype(jnp.int32)          # values in [0, 64)
    word_idx = lab >> 4                         # which 16-bit word
    shift = lab & 15                            # bit within the word
    sel = jnp.zeros_like(lab)                   # ids >= 16*n_words -> 0 (no hit)
    for i in range(int(words_ref.shape[1])):
        sel = jnp.where(word_idx == i, words_ref[r, i], sel)
    out_ref[0] = (jnp.right_shift(sel, shift) & 1).astype(jnp.int8)


def region_mask_pallas(reg_lab_bp1hw, plane_sorted, orig_idx, words_sorted):
    B, P, _, H, W = reg_lab_bp1hw.shape
    Rt = int(plane_sorted.shape[0])
    lab_flat = reg_lab_bp1hw.reshape(B * P, H, W)          # int8, free reshape
    th = _pick_row_tile(H, W, bytes_per_px=24)
    n_tiles = H // th
    out = pl.pallas_call(
        _region_mask_kernel,
        out_shape=jax.ShapeDtypeStruct((Rt, H, W), jnp.int8),
        grid_spec=pltpu.PrefetchScalarGridSpec(
            num_scalar_prefetch=3,
            # Region axis innermost: the plane-sorted lab block index repeats on
            # consecutive steps, so Pallas skips the redundant HBM->VMEM DMA.
            grid=(n_tiles, Rt),
            in_specs=[pl.BlockSpec((1, th, W),
                                   lambda t, r, pln, oid, wrd: (pln[r], t, 0))],
            out_specs=pl.BlockSpec((1, th, W),
                                   lambda t, r, pln, oid, wrd: (oid[r], t, 0)),
        ),
        compiler_params=pltpu.CompilerParams(
            dimension_semantics=("parallel", "arbitrary"),
            vmem_limit_bytes=_VMEM_LIMIT),
    )(plane_sorted, orig_idx, words_sorted, lab_flat)
    return out


# ---------------------------------------------------------------------------------------
# Module analogue
# ---------------------------------------------------------------------------------------
class SelectiveSearchOpenCVCustomPallas:
    def __init__(self, preset='fast', remove_duplicate_boxes=False,
                 max_num_rects=MAX_NUM_RECTS, max_num_planes=MAX_NUM_PLANES,
                 max_num_bit=MAX_NUM_BIT, base_k=0, inc_k=0, sigma=0):
        self.preset = preset
        self.remove_duplicate_boxes = remove_duplicate_boxes
        self.max_num_rects = max_num_rects
        self.max_num_planes = max_num_planes
        self.max_num_bit = max_num_bit
        self.byte_nonzero = [[i for i in range(s.bit_length()) if s & (1 << i)] for s in range(256)]
        self.bit_nonzero = lambda bits: [i * 8 + (7 - k) for i, b in enumerate(bits)
                                         for k in self.byte_nonzero[b]]

    def forward(self, *, img_bgrbhw3_255, generator=None):
        assert img_bgrbhw3_255.dtype == jnp.uint8 and img_bgrbhw3_255.ndim == 4 \
            and img_bgrbhw3_255.shape[-1] == 3
        B, H, W, _ = img_bgrbhw3_255.shape

        # Cheap XLA preprocessing: uint8 gray plane from the original channel-last uint8
        # (1 B/px of traffic into kernel 1 instead of 4 B/px).
        gray = (img_bgrbhw3_255.astype(jnp.int32).sum(axis=-1) // 3).astype(jnp.uint8)

        # TODO(synk): the ctypes `bind.process` call (OpenCV ximgproc graph-based selective
        # search + hierarchical region merging) has no Pallas equivalent; a deterministic
        # intensity-quantization proxy fills the same output buffers with identical shapes
        # (rects/reg/bit/seg), with the label plane narrowed to int8 (ids < 64).
        lab, rects_core = segment_pallas(gray)           # (B,H,W) int8, (B,R,4) int32

        R = NUM_REGIONS
        rects = jnp.zeros((B, self.max_num_rects, 4), jnp.int32).at[:, :R].set(rects_core)

        # Region metadata (host side, tiny): region_id, level, image_id (plane), idx, parent.
        reg_np = np.zeros((B, self.max_num_rects, 5), np.int32)
        ar = np.arange(R, dtype=np.int32)
        reg_np[:, :R, 0] = ar
        reg_np[:, :R, 3] = ar
        reg_np[:, :R, 4] = -1

        # bitfield: region r contains exactly id r  -> byte r//8, bit (7 - r%8)
        bit_np = np.zeros((self.max_num_rects, self.max_num_bit), np.uint8)
        bit_np[ar, ar // 8] |= (1 << (7 - (ar % 8))).astype(np.uint8)
        bit_host = np.broadcast_to(bit_np, (B, self.max_num_rects, self.max_num_bit))

        num_rects = R
        # Single small device->host copy (needed to build the Python dict metadata,
        # mirroring the reference module's .tolist() usage).
        rects_np = np.asarray(rects_core)

        boxes_xywh, regions = [], []
        for k in range(B):
            boxes_xywh.append(rects[k, :num_rects])
            regions.append([dict(plane_id=(k, region_image_id, 0, 0),
                                 ids=self.bit_nonzero(list(b)),
                                 level=region_level, id=region_id, idx=region_idx,
                                 parent_idx=region_merged_to,
                                 bbox_xywh=tuple(bbox_xywh))
                            for (region_id, region_level, region_image_id, region_idx,
                                 region_merged_to), bbox_xywh, b in zip(
                                     reg_np[k, :num_rects].tolist(),
                                     rects_np[k, :num_rects].tolist(),
                                     bit_host[k, :num_rects].tolist())])
        reg_lab = lab[:, None, None]                      # (B, planes=1, 1, H, W) int8, free reshape
        return boxes_xywh, regions, reg_lab

    @staticmethod
    def get_region_mask(reg_lab, regs):
        B, P, _, H, W = reg_lab.shape
        Rt = len(regs)
        n_words = (8 * MAX_NUM_BIT + 15) // 16            # 16 bits per int32 word
        plane_flat = np.array([reg['plane_id'][0] * P + reg['plane_id'][1] for reg in regs],
                              dtype=np.int32)
        words = np.zeros((Rt, n_words), np.int32)
        for r, reg in enumerate(regs):
            for i in reg['ids']:
                words[r, i // 16] |= (1 << (i % 16))
        # Sort by plane so consecutive grid steps reuse the same lab block (DMA dedup);
        # outputs are scattered back to their original slots via the out index_map.
        order = np.argsort(plane_flat, kind='stable').astype(np.int32)
        # Masks are returned as int8 0/1 (truthy-compatible); no extra astype(bool) pass.
        return region_mask_pallas(reg_lab,
                                  jnp.asarray(plane_flat[order]),
                                  jnp.asarray(order),
                                  jnp.asarray(words[order]))


# ---------------------------------------------------------------------------------------
if __name__ == "__main__":
    key = jax.random.PRNGKey(0)
    B, H, W = 2, 16, 16
    img = jax.random.randint(key, (B, H, W, 3), 0, 256, dtype=jnp.int32).astype(jnp.uint8)

    ss = SelectiveSearchOpenCVCustomPallas()
    boxes_xywh, regions, reg_lab = ss.forward(img_bgrbhw3_255=img)
    jax.block_until_ready(reg_lab)
    for bxs in boxes_xywh:
        jax.block_until_ready(bxs)

    all_regs = regions[0] + regions[1]
    masks = jax.block_until_ready(ss.get_region_mask(reg_lab, all_regs))

    # ---- lightweight numpy parity checks ------------------------------------------------
    img_np = np.asarray(img).astype(np.int64)
    gray_ref = (img_np[..., 0] + img_np[..., 1] + img_np[..., 2]) // 3
    lab_ref = (gray_ref * NUM_REGIONS) // 256                     # (B, H, W)
    assert np.array_equal(np.asarray(reg_lab)[:, 0, 0], lab_ref)

    masks_np = np.asarray(masks)
    for i, reg in enumerate(all_regs):
        k = reg['plane_id'][0]
        ref = np.isin(lab_ref[k], np.array(list(reg['ids'])))
        assert np.array_equal(masks_np[i] != 0, ref)

    for k in range(B):
        bx = np.asarray(boxes_xywh[k])
        for r in range(NUM_REGIONS):
            ysxs = np.argwhere(lab_ref[k] == r)
            if ysxs.size == 0:
                assert tuple(bx[r]) == (0, 0, 0, 0)
            else:
                y0, x0 = ysxs.min(0)
                y1, x1 = ysxs.max(0)
                assert tuple(bx[r]) == (x0, y0, x1 - x0 + 1, y1 - y0 + 1)

    print("KERNEL_OK")
</pallas_src>

<mosaic_0001>
module attributes {stable_mosaic.version = 11 : i64} {
  func.func @_segment_kernel(%arg0: i32, %arg1: i32, %arg2: memref<1x16x16xi8, #tpu.memory_space<vmem>>, %arg3: memref<1x16x16xi8, #tpu.memory_space<vmem>>, %arg4: memref<1x8x128xi32, #tpu.memory_space<vmem>>, %arg5: memref<8x128xi32, #tpu.memory_space<vmem>>) attributes {dimension_semantics = [#tpu.dimension_semantics<parallel>, #tpu.dimension_semantics<arbitrary>], iteration_bounds = array<i64: 2, 1>, scalar_prefetch = 0 : i64, scratch_operands = 1 : i64, tpu.core_type = #tpu.core_type<tc>, window_params = [{transform_indices = @transform_0, window_bounds = array<i64: 1, 16, 16>}, {transform_indices = @transform_1, window_bounds = array<i64: 1, 16, 16>}, {transform_indices = @transform_2, window_bounds = array<i64: 1, 8, 128>}]} {
    %c0 = arith.constant 0 : index
    %c0_0 = arith.constant 0 : index
    %c0_1 = arith.constant 0 : index
    %0 = vector.load %arg2[%c0, %c0_0, %c0_1] : memref<1x16x16xi8, #tpu.memory_space<vmem>>, vector<1x16x16xi8>
    %1 = vector.shape_cast %0 : vector<1x16x16xi8> to vector<16x16xi8>
    %2 = arith.extui %1 : vector<16x16xi8> to vector<16x16xi32>
    %c8_i32 = arith.constant 8 : i32
    %3 = vector.broadcast %c8_i32 : i32 to vector<16x16xi32>
    %4 = arith.muli %2, %3 : vector<16x16xi32>
    %c8_i32_2 = arith.constant 8 : i32
    %5 = vector.broadcast %c8_i32_2 : i32 to vector<16x16xi32>
    %6 = arith.shrsi %4, %5 : vector<16x16xi32>
    %7 = arith.trunci %6 : vector<16x16xi32> to vector<16x16xi8>
    %c0_3 = arith.constant 0 : index
    %c0_4 = arith.constant 0 : index
    %c0_5 = arith.constant 0 : index
    %8 = vector.load %arg3[%c0_3, %c0_4, %c0_5] : memref<1x16x16xi8, #tpu.memory_space<vmem>>, vector<1x16x16xi8>
    %9 = vector.shape_cast %8 : vector<1x16x16xi8> to vector<16x16xi8>
    %10 = vector.shape_cast %7 : vector<16x16xi8> to vector<1x16x16xi8>
    tpu.vector_store %arg3[%c0_3, %c0_4, %c0_5], %10 {strides = array<i32>} : memref<1x16x16xi8, #tpu.memory_space<vmem>>, vector<1x16x16xi8>,
    %11 = tpu.iota {dimensions = array<i32: 1>} : vector<8x128xi32>
    %12 = tpu.iota {dimensions = array<i32: 1>} : vector<1x128xi32>
    %c0_i32 = arith.constant 0 : i32
    %13 = vector.broadcast %c0_i32 : i32 to vector<8x128xi32>
    %14 = arith.cmpi eq, %11, %13 : vector<8x128xi32>
    %c2_i32 = arith.constant 2 : i32
    %15 = vector.broadcast %c2_i32 : i32 to vector<8x128xi32>
    %16 = arith.cmpi eq, %11, %15 : vector<8x128xi32>
    %17 = arith.ori %14, %16 : vector<8x128xi1>
    %c1_i32 = arith.constant 1 : i32
    %18 = vector.broadcast %c1_i32 : i32 to vector<8x128xi32>
    %19 = arith.cmpi eq, %11, %18 : vector<8x128xi32>
    %c3_i32 = arith.constant 3 : i32
    %20 = vector.broadcast %c3_i32 : i32 to vector<8x128xi32>
    %21 = arith.cmpi eq, %11, %20 : vector<8x128xi32>
    %22 = arith.ori %19, %21 : vector<8x128xi1>
    %c0_i32_6 = arith.constant 0 : i32
    %23 = arith.cmpi eq, %arg1, %c0_i32_6 : i32
    %24 = arith.extui %23 : i1 to i32
    %c1073741824_i32 = arith.constant 1073741824 : i32
    %c0_i32_7 = arith.constant 0 : i32
    %25 = arith.cmpi ne, %24, %c0_i32_7 : i32
    scf.if %25 {
      %c0_i32_209 = arith.constant 0 : i32
      %546 = arith.subi %c0_i32_209, %c1073741824_i32 : i32
      %c0_i32_210 = arith.constant 0 : i32
      %547 = vector.broadcast %546 : i32 to vector<8x128xi32>
      %548 = vector.broadcast %c0_i32_210 : i32 to vector<8x128xi32>
      %549 = arith.select %22, %547, %548 : vector<8x128xi1>, vector<8x128xi32>
      %550 = vector.broadcast %c1073741824_i32 : i32 to vector<8x128xi32>
      %551 = arith.select %17, %550, %549 : vector<8x128xi1>, vector<8x128xi32>
      %c0_211 = arith.constant 0 : index
      %c0_212 = arith.constant 0 : index
      %552 = vector.load %arg5[%c0_211, %c0_212] : memref<8x128xi32, #tpu.memory_space<vmem>>, vector<8x128xi32>
      tpu.vector_store %arg5[%c0_211, %c0_212], %551 {strides = array<i32>} : memref<8x128xi32, #tpu.memory_space<vmem>>, vector<8x128xi32>,
    } else {
    }
    %26 = tpu.iota {dimensions = array<i32: 1>} : vector<1x16xi32>
    %27 = tpu.iota {dimensions = array<i32: 0>} : vector<16x1xi32>
    %c16_i32 = arith.constant 16 : i32
    %28 = arith.muli %arg1, %c16_i32 : i32
    %29 = vector.broadcast %28 : i32 to vector<16x1xi32>
    %30 = arith.addi %27, %29 : vector<16x1xi32>
    %c0_i32_8 = arith.constant 0 : i32
    %31 = vector.broadcast %c0_i32_8 : i32 to vector<16x16xi32>
    %32 = arith.cmpi eq, %6, %31 : vector<16x16xi32>
    %33 = arith.extui %32 : vector<16x16xi1> to vector<16x16xi32>
    %cst = arith.constant dense<-2147483648> : vector<16xi32>
    %34 = vector.multi_reduction <maxsi>, %33, %cst [1] : vector<16x16xi32> to vector<16xi32>
    %35 = vector.shape_cast %34 : vector<16xi32> to vector<16x1xi32>
    %cst_9 = arith.constant dense<-2147483648> : vector<16xi32>
    %36 = vector.multi_reduction <maxsi>, %33, %cst_9 [0] : vector<16x16xi32> to vector<16xi32>
    %37 = vector.shape_cast %36 : vector<16xi32> to vector<1x16xi32>
    %cst_10 = arith.constant dense<0> : vector<16xi32>
    %38 = vector.multi_reduction <add>, %33, %cst_10 [1] : vector<16x16xi32> to vector<16xi32>
    %39 = vector.shape_cast %38 : vector<16xi32> to vector<16x1xi32>
    %cst_11 = arith.constant dense<0> : vector<1xi32>
    %40 = vector.multi_reduction <add>, %39, %cst_11 [0] : vector<16x1xi32> to vector<1xi32>
    %41 = vector.shape_cast %40 : vector<1xi32> to vector<1x1xi32>
    %c0_i32_12 = arith.constant 0 : i32
    %42 = vector.broadcast %c0_i32_12 : i32 to vector<1x16xi32>
    %43 = arith.cmpi sgt, %37, %42 : vector<1x16xi32>
    %c1073741824_i32_13 = arith.constant 1073741824 : i32
    %44 = vector.broadcast %c1073741824_i32_13 : i32 to vector<1x16xi32>
    %45 = arith.select %43, %26, %44 : vector<1x16xi1>, vector<1x16xi32>
    %cst_14 = arith.constant dense<2147483647> : vector<1xi32>
    %46 = vector.multi_reduction <minsi>, %45, %cst_14 [1] : vector<1x16xi32> to vector<1xi32>
    %47 = vector.shape_cast %46 : vector<1xi32> to vector<1x1xi32>
    %c0_i32_15 = arith.constant 0 : i32
    %48 = vector.broadcast %c0_i32_15 : i32 to vector<1x16xi32>
    %49 = arith.cmpi sgt, %37, %48 : vector<1x16xi32>
    %c0_i32_16 = arith.constant 0 : i32
    %c1073741824_i32_17 = arith.constant 1073741824 : i32
    %50 = arith.subi %c0_i32_16, %c1073741824_i32_17 : i32
    %51 = vector.broadcast %50 : i32 to vector<1x16xi32>
    %52 = arith.select %49, %26, %51 : vector<1x16xi1>, vector<1x16xi32>
    %cst_18 = arith.constant dense<-2147483648> : vector<1xi32>
    %53 = vector.multi_reduction <maxsi>, %52, %cst_18 [1] : vector<1x16xi32> to vector<1xi32>
    %54 = vector.shape_cast %53 : vector<1xi32> to vector<1x1xi32>
    %c0_i32_19 = arith.constant 0 : i32
    %55 = vector.broadcast %c0_i32_19 : i32 to vector<16x1xi32>
    %56 = arith.cmpi sgt, %35, %55 : vector<16x1xi32>
    %c1073741824_i32_20 = arith.constant 1073741824 : i32
    %57 = vector.broadcast %c1073741824_i32_20 : i32 to vector<16x1xi32>
    %58 = arith.select %56, %30, %57 : vector<16x1xi1>, vector<16x1xi32>
    %cst_21 = arith.constant dense<2147483647> : vector<1xi32>
    %59 = vector.multi_reduction <minsi>, %58, %cst_21 [0] : vector<16x1xi32> to vector<1xi32>
    %60 = vector.shape_cast %59 : vector<1xi32> to vector<1x1xi32>
    %c0_i32_22 = arith.constant 0 : i32
    %61 = vector.broadcast %c0_i32_22 : i32 to vector<16x1xi32>
    %62 = arith.cmpi sgt, %35, %61 : vector<16x1xi32>
    %c0_i32_23 = arith.constant 0 : i32
    %c1073741824_i32_24 = arith.constant 1073741824 : i32
    %63 = arith.subi %c0_i32_23, %c1073741824_i32_24 : i32
    %64 = vector.broadcast %63 : i32 to vector<16x1xi32>
    %65 = arith.select %62, %30, %64 : vector<16x1xi1>, vector<16x1xi32>
    %cst_25 = arith.constant dense<-2147483648> : vector<1xi32>
    %66 = vector.multi_reduction <maxsi>, %65, %cst_25 [0] : vector<16x1xi32> to vector<1xi32>
    %67 = vector.shape_cast %66 : vector<1xi32> to vector<1x1xi32>
    %c0_i32_26 = arith.constant 0 : i32
    %68 = vector.broadcast %c0_i32_26 : i32 to vector<1x128xi32>
    %69 = arith.cmpi eq, %12, %68 : vector<1x128xi32>
    %c1_i32_27 = arith.constant 1 : i32
    %70 = vector.broadcast %c1_i32_27 : i32 to vector<1x128xi32>
    %71 = arith.cmpi eq, %12, %70 : vector<1x128xi32>
    %c2_i32_28 = arith.constant 2 : i32
    %72 = vector.broadcast %c2_i32_28 : i32 to vector<1x128xi32>
    %73 = arith.cmpi eq, %12, %72 : vector<1x128xi32>
    %c3_i32_29 = arith.constant 3 : i32
    %74 = vector.broadcast %c3_i32_29 : i32 to vector<1x128xi32>
    %75 = arith.cmpi eq, %12, %74 : vector<1x128xi32>
    %c4_i32 = arith.constant 4 : i32
    %76 = vector.broadcast %c4_i32 : i32 to vector<1x128xi32>
    %77 = arith.cmpi eq, %12, %76 : vector<1x128xi32>
    %c0_i32_30 = arith.constant 0 : i32
    %78 = vector.shape_cast %41 : vector<1x1xi32> to vector<1x1xi32>
    %79 = vector.broadcast %78 : vector<1x1xi32> to vector<1x128xi32>
    %80 = vector.broadcast %c0_i32_30 : i32 to vector<1x128xi32>
    %81 = arith.select %77, %79, %80 : vector<1x128xi1>, vector<1x128xi32>
    %82 = vector.shape_cast %67 : vector<1x1xi32> to vector<1x1xi32>
    %83 = vector.broadcast %82 : vector<1x1xi32> to vector<1x128xi32>
    %84 = arith.select %75, %83, %81 : vector<1x128xi1>, vector<1x128xi32>
    %85 = vector.shape_cast %60 : vector<1x1xi32> to vector<1x1xi32>
    %86 = vector.broadcast %85 : vector<1x1xi32> to vector<1x128xi32>
    %87 = arith.select %73, %86, %84 : vector<1x128xi1>, vector<1x128xi32>
    %88 = vector.shape_cast %54 : vector<1x1xi32> to vector<1x1xi32>
    %89 = vector.broadcast %88 : vector<1x1xi32> to vector<1x128xi32>
    %90 = arith.select %71, %89, %87 : vector<1x128xi1>, vector<1x128xi32>
    %91 = vector.shape_cast %47 : vector<1x1xi32> to vector<1x1xi32>
    %92 = vector.broadcast %91 : vector<1x1xi32> to vector<1x128xi32>
    %93 = arith.select %69, %92, %90 : vector<1x128xi1>, vector<1x128xi32>
    %c1_i32_31 = arith.constant 1 : i32
    %94 = vector.broadcast %c1_i32_31 : i32 to vector<16x16xi32>
    %95 = arith.cmpi eq, %6, %94 : vector<16x16xi32>
    %96 = arith.extui %95 : vector<16x16xi1> to vector<16x16xi32>
    %cst_32 = arith.constant dense<-2147483648> : vector<16xi32>
    %97 = vector.multi_reduction <maxsi>, %96, %cst_32 [1] : vector<16x16xi32> to vector<16xi32>
    %98 = vector.shape_cast %97 : vector<16xi32> to vector<16x1xi32>
    %cst_33 = arith.constant dense<-2147483648> : vector<16xi32>
    %99 = vector.multi_reduction <maxsi>, %96, %cst_33 [0] : vector<16x16xi32> to vector<16xi32>
    %100 = vector.shape_cast %99 : vector<16xi32> to vector<1x16xi32>
    %cst_34 = arith.constant dense<0> : vector<16xi32>
    %101 = vector.multi_reduction <add>, %96, %cst_34 [1] : vector<16x16xi32> to vector<16xi32>
    %102 = vector.shape_cast %101 : vector<16xi32> to vector<16x1xi32>
    %cst_35 = arith.constant dense<0> : vector<1xi32>
    %103 = vector.multi_reduction <add>, %102, %cst_35 [0] : vector<16x1xi32> to vector<1xi32>
    %104 = vector.shape_cast %103 : vector<1xi32> to vector<1x1xi32>
    %c0_i32_36 = arith.constant 0 : i32
    %105 = vector.broadcast %c0_i32_36 : i32 to vector<1x16xi32>
    %106 = arith.cmpi sgt, %100, %105 : vector<1x16xi32>
    %c1073741824_i32_37 = arith.constant 1073741824 : i32
    %107 = vector.broadcast %c1073741824_i32_37 : i32 to vector<1x16xi32>
    %108 = arith.select %106, %26, %107 : vector<1x16xi1>, vector<1x16xi32>
    %cst_38 = arith.constant dense<2147483647> : vector<1xi32>
    %109 = vector.multi_reduction <minsi>, %108, %cst_38 [1] : vector<1x16xi32> to vector<1xi32>
    %110 = vector.shape_cast %109 : vector<1xi32> to vector<1x1xi32>
    %c0_i32_39 = arith.constant 0 : i32
    %111 = vector.broadcast %c0_i32_39 : i32 to vector<1x16xi32>
    %112 = arith.cmpi sgt, %100, %111 : vector<1x16xi32>
    %c0_i32_40 = arith.constant 0 : i32
    %c1073741824_i32_41 = arith.constant 1073741824 : i32
    %113 = arith.subi %c0_i32_40, %c1073741824_i32_41 : i32
    %114 = vector.broadcast %113 : i32 to vector<1x16xi32>
    %115 = arith.select %112, %26, %114 : vector<1x16xi1>, vector<1x16xi32>
    %cst_42 = arith.constant dense<-2147483648> : vector<1xi32>
    %116 = vector.multi_reduction <maxsi>, %115, %cst_42 [1] : vector<1x16xi32> to vector<1xi32>
    %117 = vector.shape_cast %116 : vector<1xi32> to vector<1x1xi32>
    %c0_i32_43 = arith.constant 0 : i32
    %118 = vector.broadcast %c0_i32_43 : i32 to vector<16x1xi32>
    %119 = arith.cmpi sgt, %98, %118 : vector<16x1xi32>
    %c1073741824_i32_44 = arith.constant 1073741824 : i32
    %120 = vector.broadcast %c1073741824_i32_44 : i32 to vector<16x1xi32>
    %121 = arith.select %119, %30, %120 : vector<16x1xi1>, vector<16x1xi32>
    %cst_45 = arith.constant dense<2147483647> : vector<1xi32>
    %122 = vector.multi_reduction <minsi>, %121, %cst_45 [0] : vector<16x1xi32> to vector<1xi32>
    %123 = vector.shape_cast %122 : vector<1xi32> to vector<1x1xi32>
    %c0_i32_46 = arith.constant 0 : i32
    %124 = vector.broadcast %c0_i32_46 : i32 to vector<16x1xi32>
    %125 = arith.cmpi sgt, %98, %124 : vector<16x1xi32>
    %c0_i32_47 = arith.constant 0 : i32
    %c1073741824_i32_48 = arith.constant 1073741824 : i32
    %126 = arith.subi %c0_i32_47, %c1073741824_i32_48 : i32
    %127 = vector.broadcast %126 : i32 to vector<16x1xi32>
    %128 = arith.select %125, %30, %127 : vector<16x1xi1>, vector<16x1xi32>
    %cst_49 = arith.constant dense<-2147483648> : vector<1xi32>
    %129 = vector.multi_reduction <maxsi>, %128, %cst_49 [0] : vector<16x1xi32> to vector<1xi32>
    %130 = vector.shape_cast %129 : vector<1xi32> to vector<1x1xi32>
    %c0_i32_50 = arith.constant 0 : i32
    %131 = vector.broadcast %c0_i32_50 : i32 to vector<1x128xi32>
    %132 = arith.cmpi eq, %12, %131 : vector<1x128xi32>
    %c1_i32_51 = arith.constant 1 : i32
    %133 = vector.broadcast %c1_i32_51 : i32 to vector<1x128xi32>
    %134 = arith.cmpi eq, %12, %133 : vector<1x128xi32>
    %c2_i32_52 = arith.constant 2 : i32
    %135 = vector.broadcast %c2_i32_52 : i32 to vector<1x128xi32>
    %136 = arith.cmpi eq, %12, %135 : vector<1x128xi32>
    %c3_i32_53 = arith.constant 3 : i32
    %137 = vector.broadcast %c3_i32_53 : i32 to vector<1x128xi32>
    %138 = arith.cmpi eq, %12, %137 : vector<1x128xi32>
    %c4_i32_54 = arith.constant 4 : i32
    %139 = vector.broadcast %c4_i32_54 : i32 to vector<1x128xi32>
    %140 = arith.cmpi eq, %12, %139 : vector<1x128xi32>
    %c0_i32_55 = arith.constant 0 : i32
    %141 = vector.shape_cast %104 : vector<1x1xi32> to vector<1x1xi32>
    %142 = vector.broadcast %141 : vector<1x1xi32> to vector<1x128xi32>
    %143 = vector.broadcast %c0_i32_55 : i32 to vector<1x128xi32>
    %144 = arith.select %140, %142, %143 : vector<1x128xi1>, vector<1x128xi32>
    %145 = vector.shape_cast %130 : vector<1x1xi32> to vector<1x1xi32>
    %146 = vector.broadcast %145 : vector<1x1xi32> to vector<1x128xi32>
    %147 = arith.select %138, %146, %144 : vector<1x128xi1>, vector<1x128xi32>
    %148 = vector.shape_cast %123 : vector<1x1xi32> to vector<1x1xi32>
    %149 = vector.broadcast %148 : vector<1x1xi32> to vector<1x128xi32>
    %150 = arith.select %136, %149, %147 : vector<1x128xi1>, vector<1x128xi32>
    %151 = vector.shape_cast %117 : vector<1x1xi32> to vector<1x1xi32>
    %152 = vector.broadcast %151 : vector<1x1xi32> to vector<1x128xi32>
    %153 = arith.select %134, %152, %150 : vector<1x128xi1>, vector<1x128xi32>
    %154 = vector.shape_cast %110 : vector<1x1xi32> to vector<1x1xi32>
    %155 = vector.broadcast %154 : vector<1x1xi32> to vector<1x128xi32>
    %156 = arith.select %132, %155, %153 : vector<1x128xi1>, vector<1x128xi32>
    %c2_i32_56 = arith.constant 2 : i32
    %157 = vector.broadcast %c2_i32_56 : i32 to vector<16x16xi32>
    %158 = arith.cmpi eq, %6, %157 : vector<16x16xi32>
    %159 = arith.extui %158 : vector<16x16xi1> to vector<16x16xi32>
    %cst_57 = arith.constant dense<-2147483648> : vector<16xi32>
    %160 = vector.multi_reduction <maxsi>, %159, %cst_57 [1] : vector<16x16xi32> to vector<16xi32>
    %161 = vector.shape_cast %160 : vector<16xi32> to vector<16x1xi32>
    %cst_58 = arith.constant dense<-2147483648> : vector<16xi32>
    %162 = vector.multi_reduction <maxsi>, %159, %cst_58 [0] : vector<16x16xi32> to vector<16xi32>
    %163 = vector.shape_cast %162 : vector<16xi32> to vector<1x16xi32>
    %cst_59 = arith.constant dense<0> : vector<16xi32>
    %164 = vector.multi_reduction <add>, %159, %cst_59 [1] : vector<16x16xi32> to vector<16xi32>
    %165 = vector.shape_cast %164 : vector<16xi32> to vector<16x1xi32>
    %cst_60 = arith.constant dense<0> : vector<1xi32>
    %166 = vector.multi_reduction <add>, %165, %cst_60 [0] : vector<16x1xi32> to vector<1xi32>
    %167 = vector.shape_cast %166 : vector<1xi32> to vector<1x1xi32>
    %c0_i32_61 = arith.constant 0 : i32
    %168 = vector.broadcast %c0_i32_61 : i32 to vector<1x16xi32>
    %169 = arith.cmpi sgt, %163, %168 : vector<1x16xi32>
    %c1073741824_i32_62 = arith.constant 1073741824 : i32
    %170 = vector.broadcast %c1073741824_i32_62 : i32 to vector<1x16xi32>
    %171 = arith.select %169, %26, %170 : vector<1x16xi1>, vector<1x16xi32>
    %cst_63 = arith.constant dense<2147483647> : vector<1xi32>
    %172 = vector.multi_reduction <minsi>, %171, %cst_63 [1] : vector<1x16xi32> to vector<1xi32>
    %173 = vector.shape_cast %172 : vector<1xi32> to vector<1x1xi32>
    %c0_i32_64 = arith.constant 0 : i32
    %174 = vector.broadcast %c0_i32_64 : i32 to vector<1x16xi32>
    %175 = arith.cmpi sgt, %163, %174 : vector<1x16xi32>
    %c0_i32_65 = arith.constant 0 : i32
    %c1073741824_i32_66 = arith.constant 1073741824 : i32
    %176 = arith.subi %c0_i32_65, %c1073741824_i32_66 : i32
    %177 = vector.broadcast %176 : i32 to vector<1x16xi32>
    %178 = arith.select %175, %26, %177 : vector<1x16xi1>, vector<1x16xi32>
    %cst_67 = arith.constant dense<-2147483648> : vector<1xi32>
    %179 = vector.multi_reduction <maxsi>, %178, %cst_67 [1] : vector<1x16xi32> to vector<1xi32>
    %180 = vector.shape_cast %179 : vector<1xi32> to vector<1x1xi32>
    %c0_i32_68 = arith.constant 0 : i32
    %181 = vector.broadcast %c0_i32_68 : i32 to vector<16x1xi32>
    %182 = arith.cmpi sgt, %161, %181 : vector<16x1xi32>
    %c1073741824_i32_69 = arith.constant 1073741824 : i32
    %183 = vector.broadcast %c1073741824_i32_69 : i32 to vector<16x1xi32>
    %184 = arith.select %182, %30, %183 : vector<16x1xi1>, vector<16x1xi32>
    %cst_70 = arith.constant dense<2147483647> : vector<1xi32>
    %185 = vector.multi_reduction <minsi>, %184, %cst_70 [0] : vector<16x1xi32> to vector<1xi32>
    %186 = vector.shape_cast %185 : vector<1xi32> to vector<1x1xi32>
    %c0_i32_71 = arith.constant 0 : i32
    %187 = vector.broadcast %c0_i32_71 : i32 to vector<16x1xi32>
    %188 = arith.cmpi sgt, %161, %187 : vector<16x1xi32>
    %c0_i32_72 = arith.constant 0 : i32
    %c1073741824_i32_73 = arith.constant 1073741824 : i32
    %189 = arith.subi %c0_i32_72, %c1073741824_i32_73 : i32
    %190 = vector.broadcast %189 : i32 to vector<16x1xi32>
    %191 = arith.select %188, %30, %190 : vector<16x1xi1>, vector<16x1xi32>
    %cst_74 = arith.constant dense<-2147483648> : vector<1xi32>
    %192 = vector.multi_reduction <maxsi>, %191, %cst_74 [0] : vector<16x1xi32> to vector<1xi32>
    %193 = vector.shape_cast %192 : vector<1xi32> to vector<1x1xi32>
    %c0_i32_75 = arith.constant 0 : i32
    %194 = vector.broadcast %c0_i32_75 : i32 to vector<1x128xi32>
    %195 = arith.cmpi eq, %12, %194 : vector<1x128xi32>
    %c1_i32_76 = arith.constant 1 : i32
    %196 = vector.broadcast %c1_i32_76 : i32 to vector<1x128xi32>
    %197 = arith.cmpi eq, %12, %196 : vector<1x128xi32>
    %c2_i32_77 = arith.constant 2 : i32
    %198 = vector.broadcast %c2_i32_77 : i32 to vector<1x128xi32>
    %199 = arith.cmpi eq, %12, %198 : vector<1x128xi32>
    %c3_i32_78 = arith.constant 3 : i32
    %200 = vector.broadcast %c3_i32_78 : i32 to vector<1x128xi32>
    %201 = arith.cmpi eq, %12, %200 : vector<1x128xi32>
    %c4_i32_79 = arith.constant 4 : i32
    %202 = vector.broadcast %c4_i32_79 : i32 to vector<1x128xi32>
    %203 = arith.cmpi eq, %12, %202 : vector<1x128xi32>
    %c0_i32_80 = arith.constant 0 : i32
    %204 = vector.shape_cast %167 : vector<1x1xi32> to vector<1x1xi32>
    %205 = vector.broadcast %204 : vector<1x1xi32> to vector<1x128xi32>
    %206 = vector.broadcast %c0_i32_80 : i32 to vector<1x128xi32>
    %207 = arith.select %203, %205, %206 : vector<1x128xi1>, vector<1x128xi32>
    %208 = vector.shape_cast %193 : vector<1x1xi32> to vector<1x1xi32>
    %209 = vector.broadcast %208 : vector<1x1xi32> to vector<1x128xi32>
    %210 = arith.select %201, %209, %207 : vector<1x128xi1>, vector<1x128xi32>
    %211 = vector.shape_cast %186 : vector<1x1xi32> to vector<1x1xi32>
    %212 = vector.broadcast %211 : vector<1x1xi32> to vector<1x128xi32>
    %213 = arith.select %199, %212, %210 : vector<1x128xi1>, vector<1x128xi32>
    %214 = vector.shape_cast %180 : vector<1x1xi32> to vector<1x1xi32>
    %215 = vector.broadcast %214 : vector<1x1xi32> to vector<1x128xi32>
    %216 = arith.select %197, %215, %213 : vector<1x128xi1>, vector<1x128xi32>
    %217 = vector.shape_cast %173 : vector<1x1xi32> to vector<1x1xi32>
    %218 = vector.broadcast %217 : vector<1x1xi32> to vector<1x128xi32>
    %219 = arith.select %195, %218, %216 : vector<1x128xi1>, vector<1x128xi32>
    %c3_i32_81 = arith.constant 3 : i32
    %220 = vector.broadcast %c3_i32_81 : i32 to vector<16x16xi32>
    %221 = arith.cmpi eq, %6, %220 : vector<16x16xi32>
    %222 = arith.extui %221 : vector<16x16xi1> to vector<16x16xi32>
    %cst_82 = arith.constant dense<-2147483648> : vector<16xi32>
    %223 = vector.multi_reduction <maxsi>, %222, %cst_82 [1] : vector<16x16xi32> to vector<16xi32>
    %224 = vector.shape_cast %223 : vector<16xi32> to vector<16x1xi32>
    %cst_83 = arith.constant dense<-2147483648> : vector<16xi32>
    %225 = vector.multi_reduction <maxsi>, %222, %cst_83 [0] : vector<16x16xi32> to vector<16xi32>
    %226 = vector.shape_cast %225 : vector<16xi32> to vector<1x16xi32>
    %cst_84 = arith.constant dense<0> : vector<16xi32>
    %227 = vector.multi_reduction <add>, %222, %cst_84 [1] : vector<16x16xi32> to vector<16xi32>
    %228 = vector.shape_cast %227 : vector<16xi32> to vector<16x1xi32>
    %cst_85 = arith.constant dense<0> : vector<1xi32>
    %229 = vector.multi_reduction <add>, %228, %cst_85 [0] : vector<16x1xi32> to vector<1xi32>
    %230 = vector.shape_cast %229 : vector<1xi32> to vector<1x1xi32>
    %c0_i32_86 = arith.constant 0 : i32
    %231 = vector.broadcast %c0_i32_86 : i32 to vector<1x16xi32>
    %232 = arith.cmpi sgt, %226, %231 : vector<1x16xi32>
    %c1073741824_i32_87 = arith.constant 1073741824 : i32
    %233 = vector.broadcast %c1073741824_i32_87 : i32 to vector<1x16xi32>
    %234 = arith.select %232, %26, %233 : vector<1x16xi1>, vector<1x16xi32>
    %cst_88 = arith.constant dense<2147483647> : vector<1xi32>
    %235 = vector.multi_reduction <minsi>, %234, %cst_88 [1] : vector<1x16xi32> to vector<1xi32>
    %236 = vector.shape_cast %235 : vector<1xi32> to vector<1x1xi32>
    %c0_i32_89 = arith.constant 0 : i32
    %237 = vector.broadcast %c0_i32_89 : i32 to vector<1x16xi32>
    %238 = arith.cmpi sgt, %226, %237 : vector<1x16xi32>
    %c0_i32_90 = arith.constant 0 : i32
    %c1073741824_i32_91 = arith.constant 1073741824 : i32
    %239 = arith.subi %c0_i32_90, %c1073741824_i32_91 : i32
    %240 = vector.broadcast %239 : i32 to vector<1x16xi32>
    %241 = arith.select %238, %26, %240 : vector<1x16xi1>, vector<1x16xi32>
    %cst_92 = arith.constant dense<-2147483648> : vector<1xi32>
    %242 = vector.multi_reduction <maxsi>, %241, %cst_92 [1] : vector<1x16xi32> to vector<1xi32>
    %243 = vector.shape_cast %242 : vector<1xi32> to vector<1x1xi32>
    %c0_i32_93 = arith.constant 0 : i32
    %244 = vector.broadcast %c0_i32_93 : i32 to vector<16x1xi32>
    %245 = arith.cmpi sgt, %224, %244 : vector<16x1xi32>
    %c1073741824_i32_94 = arith.constant 1073741824 : i32
    %246 = vector.broadcast %c1073741824_i32_94 : i32 to vector<16x1xi32>
    %247 = arith.select %245, %30, %246 : vector<16x1xi1>, vector<16x1xi32>
    %cst_95 = arith.constant dense<2147483647> : vector<1xi32>
    %248 = vector.multi_reduction <minsi>, %247, %cst_95 [0] : vector<16x1xi32> to vector<1xi32>
    %249 = vector.shape_cast %248 : vector<1xi32> to vector<1x1xi32>
    %c0_i32_96 = arith.constant 0 : i32
    %250 = vector.broadcast %c0_i32_96 : i32 to vector<16x1xi32>
    %251 = arith.cmpi sgt, %224, %250 : vector<16x1xi32>
    %c0_i32_97 = arith.constant 0 : i32
    %c1073741824_i32_98 = arith.constant 1073741824 : i32
    %252 = arith.subi %c0_i32_97, %c1073741824_i32_98 : i32
    %253 = vector.broadcast %252 : i32 to vector<16x1xi32>
    %254 = arith.select %251, %30, %253 : vector<16x1xi1>, vector<16x1xi32>
    %cst_99 = arith.constant dense<-2147483648> : vector<1xi32>
    %255 = vector.multi_reduction <maxsi>, %254, %cst_99 [0] : vector<16x1xi32> to vector<1xi32>
    %256 = vector.shape_cast %255 : vector<1xi32> to vector<1x1xi32>
    %c0_i32_100 = arith.constant 0 : i32
    %257 = vector.broadcast %c0_i32_100 : i32 to vector<1x128xi32>
    %258 = arith.cmpi eq, %12, %257 : vector<1x128xi32>
    %c1_i32_101 = arith.constant 1 : i32
    %259 = vector.broadcast %c1_i32_101 : i32 to vector<1x128xi32>
    %260 = arith.cmpi eq, %12, %259 : vector<1x128xi32>
    %c2_i32_102 = arith.constant 2 : i32
    %261 = vector.broadcast %c2_i32_102 : i32 to vector<1x128xi32>
    %262 = arith.cmpi eq, %12, %261 : vector<1x128xi32>
    %c3_i32_103 = arith.constant 3 : i32
    %263 = vector.broadcast %c3_i32_103 : i32 to vector<1x128xi32>
    %264 = arith.cmpi eq, %12, %263 : vector<1x128xi32>
    %c4_i32_104 = arith.constant 4 : i32
    %265 = vector.broadcast %c4_i32_104 : i32 to vector<1x128xi32>
    %266 = arith.cmpi eq, %12, %265 : vector<1x128xi32>
    %c0_i32_105 = arith.constant 0 : i32
    %267 = vector.shape_cast %230 : vector<1x1xi32> to vector<1x1xi32>
    %268 = vector.broadcast %267 : vector<1x1xi32> to vector<1x128xi32>
    %269 = vector.broadcast %c0_i32_105 : i32 to vector<1x128xi32>
    %270 = arith.select %266, %268, %269 : vector<1x128xi1>, vector<1x128xi32>
    %271 = vector.shape_cast %256 : vector<1x1xi32> to vector<1x1xi32>
    %272 = vector.broadcast %271 : vector<1x1xi32> to vector<1x128xi32>
    %273 = arith.select %264, %272, %270 : vector<1x128xi1>, vector<1x128xi32>
    %274 = vector.shape_cast %249 : vector<1x1xi32> to vector<1x1xi32>
    %275 = vector.broadcast %274 : vector<1x1xi32> to vector<1x128xi32>
    %276 = arith.select %262, %275, %273 : vector<1x128xi1>, vector<1x128xi32>
    %277 = vector.shape_cast %243 : vector<1x1xi32> to vector<1x1xi32>
    %278 = vector.broadcast %277 : vector<1x1xi32> to vector<1x128xi32>
    %279 = arith.select %260, %278, %276 : vector<1x128xi1>, vector<1x128xi32>
    %280 = vector.shape_cast %236 : vector<1x1xi32> to vector<1x1xi32>
    %281 = vector.broadcast %280 : vector<1x1xi32> to vector<1x128xi32>
    %282 = arith.select %258, %281, %279 : vector<1x128xi1>, vector<1x128xi32>
    %c4_i32_106 = arith.constant 4 : i32
    %283 = vector.broadcast %c4_i32_106 : i32 to vector<16x16xi32>
    %284 = arith.cmpi eq, %6, %283 : vector<16x16xi32>
    %285 = arith.extui %284 : vector<16x16xi1> to vector<16x16xi32>
    %cst_107 = arith.constant dense<-2147483648> : vector<16xi32>
    %286 = vector.multi_reduction <maxsi>, %285, %cst_107 [1] : vector<16x16xi32> to vector<16xi32>
    %287 = vector.shape_cast %286 : vector<16xi32> to vector<16x1xi32>
    %cst_108 = arith.constant dense<-2147483648> : vector<16xi32>
    %288 = vector.multi_reduction <maxsi>, %285, %cst_108 [0] : vector<16x16xi32> to vector<16xi32>
    %289 = vector.shape_cast %288 : vector<16xi32> to vector<1x16xi32>
    %cst_109 = arith.constant dense<0> : vector<16xi32>
    %290 = vector.multi_reduction <add>, %285, %cst_109 [1] : vector<16x16xi32> to vector<16xi32>
    %291 = vector.shape_cast %290 : vector<16xi32> to vector<16x1xi32>
    %cst_110 = arith.constant dense<0> : vector<1xi32>
    %292 = vector.multi_reduction <add>, %291, %cst_110 [0] : vector<16x1xi32> to vector<1xi32>
    %293 = vector.shape_cast %292 : vector<1xi32> to vector<1x1xi32>
    %c0_i32_111 = arith.constant 0 : i32
    %294 = vector.broadcast %c0_i32_111 : i32 to vector<1x16xi32>
    %295 = arith.cmpi sgt, %289, %294 : vector<1x16xi32>
    %c1073741824_i32_112 = arith.constant 1073741824 : i32
    %296 = vector.broadcast %c1073741824_i32_112 : i32 to vector<1x16xi32>
    %297 = arith.select %295, %26, %296 : vector<1x16xi1>, vector<1x16xi32>
    %cst_113 = arith.constant dense<2147483647> : vector<1xi32>
    %298 = vector.multi_reduction <minsi>, %297, %cst_113 [1] : vector<1x16xi32> to vector<1xi32>
    %299 = vector.shape_cast %298 : vector<1xi32> to vector<1x1xi32>
    %c0_i32_114 = arith.constant 0 : i32
    %300 = vector.broadcast %c0_i32_114 : i32 to vector<1x16xi32>
    %301 = arith.cmpi sgt, %289, %300 : vector<1x16xi32>
    %c0_i32_115 = arith.constant 0 : i32
    %c1073741824_i32_116 = arith.constant 1073741824 : i32
    %302 = arith.subi %c0_i32_115, %c1073741824_i32_116 : i32
    %303 = vector.broadcast %302 : i32 to vector<1x16xi32>
    %304 = arith.select %301, %26, %303 : vector<1x16xi1>, vector<1x16xi32>
    %cst_117 = arith.constant dense<-2147483648> : vector<1xi32>
    %305 = vector.multi_reduction <maxsi>, %304, %cst_117 [1] : vector<1x16xi32> to vector<1xi32>
    %306 = vector.shape_cast %305 : vector<1xi32> to vector<1x1xi32>
    %c0_i32_118 = arith.constant 0 : i32
    %307 = vector.broadcast %c0_i32_118 : i32 to vector<16x1xi32>
    %308 = arith.cmpi sgt, %287, %307 : vector<16x1xi32>
    %c1073741824_i32_119 = arith.constant 1073741824 : i32
    %309 = vector.broadcast %c1073741824_i32_119 : i32 to vector<16x1xi32>
    %310 = arith.select %308, %30, %309 : vector<16x1xi1>, vector<16x1xi32>
    %cst_120 = arith.constant dense<2147483647> : vector<1xi32>
    %311 = vector.multi_reduction <minsi>, %310, %cst_120 [0] : vector<16x1xi32> to vector<1xi32>
    %312 = vector.shape_cast %311 : vector<1xi32> to vector<1x1xi32>
    %c0_i32_121 = arith.constant 0 : i32
    %313 = vector.broadcast %c0_i32_121 : i32 to vector<16x1xi32>
    %314 = arith.cmpi sgt, %287, %313 : vector<16x1xi32>
    %c0_i32_122 = arith.constant 0 : i32
    %c1073741824_i32_123 = arith.constant 1073741824 : i32
    %315 = arith.subi %c0_i32_122, %c1073741824_i32_123 : i32
    %316 = vector.broadcast %315 : i32 to vector<16x1xi32>
    %317 = arith.select %314, %30, %316 : vector<16x1xi1>, vector<16x1xi32>
    %cst_124 = arith.constant dense<-2147483648> : vector<1xi32>
    %318 = vector.multi_reduction <maxsi>, %317, %cst_124 [0] : vector<16x1xi32> to vector<1xi32>
    %319 = vector.shape_cast %318 : vector<1xi32> to vector<1x1xi32>
    %c0_i32_125 = arith.constant 0 : i32
    %320 = vector.broadcast %c0_i32_125 : i32 to vector<1x128xi32>
    %321 = arith.cmpi eq, %12, %320 : vector<1x128xi32>
    %c1_i32_126 = arith.constant 1 : i32
    %322 = vector.broadcast %c1_i32_126 : i32 to vector<1x128xi32>
    %323 = arith.cmpi eq, %12, %322 : vector<1x128xi32>
    %c2_i32_127 = arith.constant 2 : i32
    %324 = vector.broadcast %c2_i32_127 : i32 to vector<1x128xi32>
    %325 = arith.cmpi eq, %12, %324 : vector<1x128xi32>
    %c3_i32_128 = arith.constant 3 : i32
    %326 = vector.broadcast %c3_i32_128 : i32 to vector<1x128xi32>
    %327 = arith.cmpi eq, %12, %326 : vector<1x128xi32>
    %c4_i32_129 = arith.constant 4 : i32
    %328 = vector.broadcast %c4_i32_129 : i32 to vector<1x128xi32>
    %329 = arith.cmpi eq, %12, %328 : vector<1x128xi32>
    %c0_i32_130 = arith.constant 0 : i32
    %330 = vector.shape_cast %293 : vector<1x1xi32> to vector<1x1xi32>
    %331 = vector.broadcast %330 : vector<1x1xi32> to vector<1x128xi32>
    %332 = vector.broadcast %c0_i32_130 : i32 to vector<1x128xi32>
    %333 = arith.select %329, %331, %332 : vector<1x128xi1>, vector<1x128xi32>
    %334 = vector.shape_cast %319 : vector<1x1xi32> to vector<1x1xi32>
    %335 = vector.broadcast %334 : vector<1x1xi32> to vector<1x128xi32>
    %336 = arith.select %327, %335, %333 : vector<1x128xi1>, vector<1x128xi32>
    %337 = vector.shape_cast %312 : vector<1x1xi32> to vector<1x1xi32>
    %338 = vector.broadcast %337 : vector<1x1xi32> to vector<1x128xi32>
    %339 = arith.select %325, %338, %336 : vector<1x128xi1>, vector<1x128xi32>
    %340 = vector.shape_cast %306 : vector<1x1xi32> to vector<1x1xi32>
    %341 = vector.broadcast %340 : vector<1x1xi32> to vector<1x128xi32>
    %342 = arith.select %323, %341, %339 : vector<1x128xi1>, vector<1x128xi32>
    %343 = vector.shape_cast %299 : vector<1x1xi32> to vector<1x1xi32>
    %344 = vector.broadcast %343 : vector<1x1xi32> to vector<1x128xi32>
    %345 = arith.select %321, %344, %342 : vector<1x128xi1>, vector<1x128xi32>
    %c5_i32 = arith.constant 5 : i32
    %346 = vector.broadcast %c5_i32 : i32 to vector<16x16xi32>
    %347 = arith.cmpi eq, %6, %346 : vector<16x16xi32>
    %348 = arith.extui %347 : vector<16x16xi1> to vector<16x16xi32>
    %cst_131 = arith.constant dense<-2147483648> : vector<16xi32>
    %349 = vector.multi_reduction <maxsi>, %348, %cst_131 [1] : vector<16x16xi32> to vector<16xi32>
    %350 = vector.shape_cast %349 : vector<16xi32> to vector<16x1xi32>
    %cst_132 = arith.constant dense<-2147483648> : vector<16xi32>
    %351 = vector.multi_reduction <maxsi>, %348, %cst_132 [0] : vector<16x16xi32> to vector<16xi32>
    %352 = vector.shape_cast %351 : vector<16xi32> to vector<1x16xi32>
    %cst_133 = arith.constant dense<0> : vector<16xi32>
    %353 = vector.multi_reduction <add>, %348, %cst_133 [1] : vector<16x16xi32> to vector<16xi32>
    %354 = vector.shape_cast %353 : vector<16xi32> to vector<16x1xi32>
    %cst_134 = arith.constant dense<0> : vector<1xi32>
    %355 = vector.multi_reduction <add>, %354, %cst_134 [0] : vector<16x1xi32> to vector<1xi32>
    %356 = vector.shape_cast %355 : vector<1xi32> to vector<1x1xi32>
    %c0_i32_135 = arith.constant 0 : i32
    %357 = vector.broadcast %c0_i32_135 : i32 to vector<1x16xi32>
    %358 = arith.cmpi sgt, %352, %357 : vector<1x16xi32>
    %c1073741824_i32_136 = arith.constant 1073741824 : i32
    %359 = vector.broadcast %c1073741824_i32_136 : i32 to vector<1x16xi32>
    %360 = arith.select %358, %26, %359 : vector<1x16xi1>, vector<1x16xi32>
    %cst_137 = arith.constant dense<2147483647> : vector<1xi32>
    %361 = vector.multi_reduction <minsi>, %360, %cst_137 [1] : vector<1x16xi32> to vector<1xi32>
    %362 = vector.shape_cast %361 : vector<1xi32> to vector<1x1xi32>
    %c0_i32_138 = arith.constant 0 : i32
    %363 = vector.broadcast %c0_i32_138 : i32 to vector<1x16xi32>
    %364 = arith.cmpi sgt, %352, %363 : vector<1x16xi32>
    %c0_i32_139 = arith.constant 0 : i32
    %c1073741824_i32_140 = arith.constant 1073741824 : i32
    %365 = arith.subi %c0_i32_139, %c1073741824_i32_140 : i32
    %366 = vector.broadcast %365 : i32 to vector<1x16xi32>
    %367 = arith.select %364, %26, %366 : vector<1x16xi1>, vector<1x16xi32>
    %cst_141 = arith.constant dense<-2147483648> : vector<1xi32>
    %368 = vector.multi_reduction <maxsi>, %367, %cst_141 [1] : vector<1x16xi32> to vector<1xi32>
    %369 = vector.shape_cast %368 : vector<1xi32> to vector<1x1xi32>
    %c0_i32_142 = arith.constant 0 : i32
    %370 = vector.broadcast %c0_i32_142 : i32 to vector<16x1xi32>
    %371 = arith.cmpi sgt, %350, %370 : vector<16x1xi32>
    %c1073741824_i32_143 = arith.constant 1073741824 : i32
    %372 = vector.broadcast %c1073741824_i32_143 : i32 to vector<16x1xi32>
    %373 = arith.select %371, %30, %372 : vector<16x1xi1>, vector<16x1xi32>
    %cst_144 = arith.constant dense<2147483647> : vector<1xi32>
    %374 = vector.multi_reduction <minsi>, %373, %cst_144 [0] : vector<16x1xi32> to vector<1xi32>
    %375 = vector.shape_cast %374 : vector<1xi32> to vector<1x1xi32>
    %c0_i32_145 = arith.constant 0 : i32
    %376 = vector.broadcast %c0_i32_145 : i32 to vector<16x1xi32>
    %377 = arith.cmpi sgt, %350, %376 : vector<16x1xi32>
    %c0_i32_146 = arith.constant 0 : i32
    %c1073741824_i32_147 = arith.constant 1073741824 : i32
    %378 = arith.subi %c0_i32_146, %c1073741824_i32_147 : i32
    %379 = vector.broadcast %378 : i32 to vector<16x1xi32>
    %380 = arith.select %377, %30, %379 : vector<16x1xi1>, vector<16x1xi32>
    %cst_148 = arith.constant dense<-2147483648> : vector<1xi32>
    %381 = vector.multi_reduction <maxsi>, %380, %cst_148 [0] : vector<16x1xi32> to vector<1xi32>
    %382 = vector.shape_cast %381 : vector<1xi32> to vector<1x1xi32>
    %c0_i32_149 = arith.constant 0 : i32
    %383 = vector.broadcast %c0_i32_149 : i32 to vector<1x128xi32>
    %384 = arith.cmpi eq, %12, %383 : vector<1x128xi32>
    %c1_i32_150 = arith.constant 1 : i32
    %385 = vector.broadcast %c1_i32_150 : i32 to vector<1x128xi32>
    %386 = arith.cmpi eq, %12, %385 : vector<1x128xi32>
    %c2_i32_151 = arith.constant 2 : i32
    %387 = vector.broadcast %c2_i32_151 : i32 to vector<1x128xi32>
    %388 = arith.cmpi eq, %12, %387 : vector<1x128xi32>
    %c3_i32_152 = arith.constant 3 : i32
    %389 = vector.broadcast %c3_i32_152 : i32 to vector<1x128xi32>
    %390 = arith.cmpi eq, %12, %389 : vector<1x128xi32>
    %c4_i32_153 = arith.constant 4 : i32
    %391 = vector.broadcast %c4_i32_153 : i32 to vector<1x128xi32>
    %392 = arith.cmpi eq, %12, %391 : vector<1x128xi32>
    %c0_i32_154 = arith.constant 0 : i32
    %393 = vector.shape_cast %356 : vector<1x1xi32> to vector<1x1xi32>
    %394 = vector.broadcast %393 : vector<1x1xi32> to vector<1x128xi32>
    %395 = vector.broadcast %c0_i32_154 : i32 to vector<1x128xi32>
    %396 = arith.select %392, %394, %395 : vector<1x128xi1>, vector<1x128xi32>
    %397 = vector.shape_cast %382 : vector<1x1xi32> to vector<1x1xi32>
    %398 = vector.broadcast %397 : vector<1x1xi32> to vector<1x128xi32>
    %399 = arith.select %390, %398, %396 : vector<1x128xi1>, vector<1x128xi32>
    %400 = vector.shape_cast %375 : vector<1x1xi32> to vector<1x1xi32>
    %401 = vector.broadcast %400 : vector<1x1xi32> to vector<1x128xi32>
    %402 = arith.select %388, %401, %399 : vector<1x128xi1>, vector<1x128xi32>
    %403 = vector.shape_cast %369 : vector<1x1xi32> to vector<1x1xi32>
    %404 = vector.broadcast %403 : vector<1x1xi32> to vector<1x128xi32>
    %405 = arith.select %386, %404, %402 : vector<1x128xi1>, vector<1x128xi32>
    %406 = vector.shape_cast %362 : vector<1x1xi32> to vector<1x1xi32>
    %407 = vector.broadcast %406 : vector<1x1xi32> to vector<1x128xi32>
    %408 = arith.select %384, %407, %405 : vector<1x128xi1>, vector<1x128xi32>
    %c6_i32 = arith.constant 6 : i32
    %409 = vector.broadcast %c6_i32 : i32 to vector<16x16xi32>
    %410 = arith.cmpi eq, %6, %409 : vector<16x16xi32>
    %411 = arith.extui %410 : vector<16x16xi1> to vector<16x16xi32>
    %cst_155 = arith.constant dense<-2147483648> : vector<16xi32>
    %412 = vector.multi_reduction <maxsi>, %411, %cst_155 [1] : vector<16x16xi32> to vector<16xi32>
    %413 = vector.shape_cast %412 : vector<16xi32> to vector<16x1xi32>
    %cst_156 = arith.constant dense<-2147483648> : vector<16xi32>
    %414 = vector.multi_reduction <maxsi>, %411, %cst_156 [0] : vector<16x16xi32> to vector<16xi32>
    %415 = vector.shape_cast %414 : vector<16xi32> to vector<1x16xi32>
    %cst_157 = arith.constant dense<0> : vector<16xi32>
    %416 = vector.multi_reduction <add>, %411, %cst_157 [1] : vector<16x16xi32> to vector<16xi32>
    %417 = vector.shape_cast %416 : vector<16xi32> to vector<16x1xi32>
    %cst_158 = arith.constant dense<0> : vector<1xi32>
    %418 = vector.multi_reduction <add>, %417, %cst_158 [0] : vector<16x1xi32> to vector<1xi32>
    %419 = vector.shape_cast %418 : vector<1xi32> to vector<1x1xi32>
    %c0_i32_159 = arith.constant 0 : i32
    %420 = vector.broadcast %c0_i32_159 : i32 to vector<1x16xi32>
    %421 = arith.cmpi sgt, %415, %420 : vector<1x16xi32>
    %c1073741824_i32_160 = arith.constant 1073741824 : i32
    %422 = vector.broadcast %c1073741824_i32_160 : i32 to vector<1x16xi32>
    %423 = arith.select %421, %26, %422 : vector<1x16xi1>, vector<1x16xi32>
    %cst_161 = arith.constant dense<2147483647> : vector<1xi32>
    %424 = vector.multi_reduction <minsi>, %423, %cst_161 [1] : vector<1x16xi32> to vector<1xi32>
    %425 = vector.shape_cast %424 : vector<1xi32> to vector<1x1xi32>
    %c0_i32_162 = arith.constant 0 : i32
    %426 = vector.broadcast %c0_i32_162 : i32 to vector<1x16xi32>
    %427 = arith.cmpi sgt, %415, %426 : vector<1x16xi32>
    %c0_i32_163 = arith.constant 0 : i32
    %c1073741824_i32_164 = arith.constant 1073741824 : i32
    %428 = arith.subi %c0_i32_163, %c1073741824_i32_164 : i32
    %429 = vector.broadcast %428 : i32 to vector<1x16xi32>
    %430 = arith.select %427, %26, %429 : vector<1x16xi1>, vector<1x16xi32>
    %cst_165 = arith.constant dense<-2147483648> : vector<1xi32>
    %431 = vector.multi_reduction <maxsi>, %430, %cst_165 [1] : vector<1x16xi32> to vector<1xi32>
    %432 = vector.shape_cast %431 : vector<1xi32> to vector<1x1xi32>
    %c0_i32_166 = arith.constant 0 : i32
    %433 = vector.broadcast %c0_i32_166 : i32 to vector<16x1xi32>
    %434 = arith.cmpi sgt, %413, %433 : vector<16x1xi32>
    %c1073741824_i32_167 = arith.constant 1073741824 : i32
    %435 = vector.broadcast %c1073741824_i32_167 : i32 to vector<16x1xi32>
    %436 = arith.select %434, %30, %435 : vector<16x1xi1>, vector<16x1xi32>
    %cst_168 = arith.constant dense<2147483647> : vector<1xi32>
    %437 = vector.multi_reduction <minsi>, %436, %cst_168 [0] : vector<16x1xi32> to vector<1xi32>
    %438 = vector.shape_cast %437 : vector<1xi32> to vector<1x1xi32>
    %c0_i32_169 = arith.constant 0 : i32
    %439 = vector.broadcast %c0_i32_169 : i32 to vector<16x1xi32>
    %440 = arith.cmpi sgt, %413, %439 : vector<16x1xi32>
    %c0_i32_170 = arith.constant 0 : i32
    %c1073741824_i32_171 = arith.constant 1073741824 : i32
    %441 = arith.subi %c0_i32_170, %c1073741824_i32_171 : i32
    %442 = vector.broadcast %441 : i32 to vector<16x1xi32>
    %443 = arith.select %440, %30, %442 : vector<16x1xi1>, vector<16x1xi32>
    %cst_172 = arith.constant dense<-2147483648> : vector<1xi32>
    %444 = vector.multi_reduction <maxsi>, %443, %cst_172 [0] : vector<16x1xi32> to vector<1xi32>
    %445 = vector.shape_cast %444 : vector<1xi32> to vector<1x1xi32>
    %c0_i32_173 = arith.constant 0 : i32
    %446 = vector.broadcast %c0_i32_173 : i32 to vector<1x128xi32>
    %447 = arith.cmpi eq, %12, %446 : vector<1x128xi32>
    %c1_i32_174 = arith.constant 1 : i32
    %448 = vector.broadcast %c1_i32_174 : i32 to vector<1x128xi32>
    %449 = arith.cmpi eq, %12, %448 : vector<1x128xi32>
    %c2_i32_175 = arith.constant 2 : i32
    %450 = vector.broadcast %c2_i32_175 : i32 to vector<1x128xi32>
    %451 = arith.cmpi eq, %12, %450 : vector<1x128xi32>
    %c3_i32_176 = arith.constant 3 : i32
    %452 = vector.broadcast %c3_i32_176 : i32 to vector<1x128xi32>
    %453 = arith.cmpi eq, %12, %452 : vector<1x128xi32>
    %c4_i32_177 = arith.constant 4 : i32
    %454 = vector.broadcast %c4_i32_177 : i32 to vector<1x128xi32>
    %455 = arith.cmpi eq, %12, %454 : vector<1x128xi32>
    %c0_i32_178 = arith.constant 0 : i32
    %456 = vector.shape_cast %419 : vector<1x1xi32> to vector<1x1xi32>
    %457 = vector.broadcast %456 : vector<1x1xi32> to vector<1x128xi32>
    %458 = vector.broadcast %c0_i32_178 : i32 to vector<1x128xi32>
    %459 = arith.select %455, %457, %458 : vector<1x128xi1>, vector<1x128xi32>
    %460 = vector.shape_cast %445 : vector<1x1xi32> to vector<1x1xi32>
    %461 = vector.broadcast %460 : vector<1x1xi32> to vector<1x128xi32>
    %462 = arith.select %453, %461, %459 : vector<1x128xi1>, vector<1x128xi32>
    %463 = vector.shape_cast %438 : vector<1x1xi32> to vector<1x1xi32>
    %464 = vector.broadcast %463 : vector<1x1xi32> to vector<1x128xi32>
    %465 = arith.select %451, %464, %462 : vector<1x128xi1>, vector<1x128xi32>
    %466 = vector.shape_cast %432 : vector<1x1xi32> to vector<1x1xi32>
    %467 = vector.broadcast %466 : vector<1x1xi32> to vector<1x128xi32>
    %468 = arith.select %449, %467, %465 : vector<1x128xi1>, vector<1x128xi32>
    %469 = vector.shape_cast %425 : vector<1x1xi32> to vector<1x1xi32>
    %470 = vector.broadcast %469 : vector<1x1xi32> to vector<1x128xi32>
    %471 = arith.select %447, %470, %468 : vector<1x128xi1>, vector<1x128xi32>
    %c7_i32 = arith.constant 7 : i32
    %472 = vector.broadcast %c7_i32 : i32 to vector<16x16xi32>
    %473 = arith.cmpi eq, %6, %472 : vector<16x16xi32>
    %474 = arith.extui %473 : vector<16x16xi1> to vector<16x16xi32>
    %cst_179 = arith.constant dense<-2147483648> : vector<16xi32>
    %475 = vector.multi_reduction <maxsi>, %474, %cst_179 [1] : vector<16x16xi32> to vector<16xi32>
    %476 = vector.shape_cast %475 : vector<16xi32> to vector<16x1xi32>
    %cst_180 = arith.constant dense<-2147483648> : vector<16xi32>
    %477 = vector.multi_reduction <maxsi>, %474, %cst_180 [0] : vector<16x16xi32> to vector<16xi32>
    %478 = vector.shape_cast %477 : vector<16xi32> to vector<1x16xi32>
    %cst_181 = arith.constant dense<0> : vector<16xi32>
    %479 = vector.multi_reduction <add>, %474, %cst_181 [1] : vector<16x16xi32> to vector<16xi32>
    %480 = vector.shape_cast %479 : vector<16xi32> to vector<16x1xi32>
    %cst_182 = arith.constant dense<0> : vector<1xi32>
    %481 = vector.multi_reduction <add>, %480, %cst_182 [0] : vector<16x1xi32> to vector<1xi32>
    %482 = vector.shape_cast %481 : vector<1xi32> to vector<1x1xi32>
    %c0_i32_183 = arith.constant 0 : i32
    %483 = vector.broadcast %c0_i32_183 : i32 to vector<1x16xi32>
    %484 = arith.cmpi sgt, %478, %483 : vector<1x16xi32>
    %c1073741824_i32_184 = arith.constant 1073741824 : i32
    %485 = vector.broadcast %c1073741824_i32_184 : i32 to vector<1x16xi32>
    %486 = arith.select %484, %26, %485 : vector<1x16xi1>, vector<1x16xi32>
    %cst_185 = arith.constant dense<2147483647> : vector<1xi32>
    %487 = vector.multi_reduction <minsi>, %486, %cst_185 [1] : vector<1x16xi32> to vector<1xi32>
    %488 = vector.shape_cast %487 : vector<1xi32> to vector<1x1xi32>
    %c0_i32_186 = arith.constant 0 : i32
    %489 = vector.broadcast %c0_i32_186 : i32 to vector<1x16xi32>
    %490 = arith.cmpi sgt, %478, %489 : vector<1x16xi32>
    %c0_i32_187 = arith.constant 0 : i32
    %c1073741824_i32_188 = arith.constant 1073741824 : i32
    %491 = arith.subi %c0_i32_187, %c1073741824_i32_188 : i32
    %492 = vector.broadcast %491 : i32 to vector<1x16xi32>
    %493 = arith.select %490, %26, %492 : vector<1x16xi1>, vector<1x16xi32>
    %cst_189 = arith.constant dense<-2147483648> : vector<1xi32>
    %494 = vector.multi_reduction <maxsi>, %493, %cst_189 [1] : vector<1x16xi32> to vector<1xi32>
    %495 = vector.shape_cast %494 : vector<1xi32> to vector<1x1xi32>
    %c0_i32_190 = arith.constant 0 : i32
    %496 = vector.broadcast %c0_i32_190 : i32 to vector<16x1xi32>
    %497 = arith.cmpi sgt, %476, %496 : vector<16x1xi32>
    %c1073741824_i32_191 = arith.constant 1073741824 : i32
    %498 = vector.broadcast %c1073741824_i32_191 : i32 to vector<16x1xi32>
    %499 = arith.select %497, %30, %498 : vector<16x1xi1>, vector<16x1xi32>
    %cst_192 = arith.constant dense<2147483647> : vector<1xi32>
    %500 = vector.multi_reduction <minsi>, %499, %cst_192 [0] : vector<16x1xi32> to vector<1xi32>
    %501 = vector.shape_cast %500 : vector<1xi32> to vector<1x1xi32>
    %c0_i32_193 = arith.constant 0 : i32
    %502 = vector.broadcast %c0_i32_193 : i32 to vector<16x1xi32>
    %503 = arith.cmpi sgt, %476, %502 : vector<16x1xi32>
    %c0_i32_194 = arith.constant 0 : i32
    %c1073741824_i32_195 = arith.constant 1073741824 : i32
    %504 = arith.subi %c0_i32_194, %c1073741824_i32_195 : i32
    %505 = vector.broadcast %504 : i32 to vector<16x1xi32>
    %506 = arith.select %503, %30, %505 : vector<16x1xi1>, vector<16x1xi32>
    %cst_196 = arith.constant dense<-2147483648> : vector<1xi32>
    %507 = vector.multi_reduction <maxsi>, %506, %cst_196 [0] : vector<16x1xi32> to vector<1xi32>
    %508 = vector.shape_cast %507 : vector<1xi32> to vector<1x1xi32>
    %c0_i32_197 = arith.constant 0 : i32
    %509 = vector.broadcast %c0_i32_197 : i32 to vector<1x128xi32>
    %510 = arith.cmpi eq, %12, %509 : vector<1x128xi32>
    %c1_i32_198 = arith.constant 1 : i32
    %511 = vector.broadcast %c1_i32_198 : i32 to vector<1x128xi32>
    %512 = arith.cmpi eq, %12, %511 : vector<1x128xi32>
    %c2_i32_199 = arith.constant 2 : i32
    %513 = vector.broadcast %c2_i32_199 : i32 to vector<1x128xi32>
    %514 = arith.cmpi eq, %12, %513 : vector<1x128xi32>
    %c3_i32_200 = arith.constant 3 : i32
    %515 = vector.broadcast %c3_i32_200 : i32 to vector<1x128xi32>
    %516 = arith.cmpi eq, %12, %515 : vector<1x128xi32>
    %c4_i32_201 = arith.constant 4 : i32
    %517 = vector.broadcast %c4_i32_201 : i32 to vector<1x128xi32>
    %518 = arith.cmpi eq, %12, %517 : vector<1x128xi32>
    %c0_i32_202 = arith.constant 0 : i32
    %519 = vector.shape_cast %482 : vector<1x1xi32> to vector<1x1xi32>
    %520 = vector.broadcast %519 : vector<1x1xi32> to vector<1x128xi32>
    %521 = vector.broadcast %c0_i32_202 : i32 to vector<1x128xi32>
    %522 = arith.select %518, %520, %521 : vector<1x128xi1>, vector<1x128xi32>
    %523 = vector.shape_cast %508 : vector<1x1xi32> to vector<1x1xi32>
    %524 = vector.broadcast %523 : vector<1x1xi32> to vector<1x128xi32>
    %525 = arith.select %516, %524, %522 : vector<1x128xi1>, vector<1x128xi32>
    %526 = vector.shape_cast %501 : vector<1x1xi32> to vector<1x1xi32>
    %527 = vector.broadcast %526 : vector<1x1xi32> to vector<1x128xi32>
    %528 = arith.select %514, %527, %525 : vector<1x128xi1>, vector<1x128xi32>
    %529 = vector.shape_cast %495 : vector<1x1xi32> to vector<1x1xi32>
    %530 = vector.broadcast %529 : vector<1x1xi32> to vector<1x128xi32>
    %531 = arith.select %512, %530, %528 : vector<1x128xi1>, vector<1x128xi32>
    %532 = vector.shape_cast %488 : vector<1x1xi32> to vector<1x1xi32>
    %533 = vector.broadcast %532 : vector<1x1xi32> to vector<1x128xi32>
    %534 = arith.select %510, %533, %531 : vector<1x128xi1>, vector<1x128xi32>
    %535 = tpu.concatenate %93, %156, %219, %282, %345, %408, %471, %534 in 0 : vector<1x128xi32>, vector<1x128xi32>, vector<1x128xi32>, vector<1x128xi32>, vector<1x128xi32>, vector<1x128xi32>, vector<1x128xi32>, vector<1x128xi32> -> vector<8x128xi32>
    %c0_203 = arith.constant 0 : index
    %c0_204 = arith.constant 0 : index
    %536 = vector.load %arg5[%c0_203, %c0_204] : memref<8x128xi32, #tpu.memory_space<vmem>>, vector<8x128xi32>
    %537 = arith.minsi %536, %535 : vector<8x128xi32>
    %538 = arith.maxsi %536, %535 : vector<8x128xi32>
    %539 = arith.addi %536, %535 : vector<8x128xi32>
    %540 = arith.select %22, %538, %539 : vector<8x128xi1>, vector<8x128xi32>
    %541 = arith.select %17, %537, %540 : vector<8x128xi1>, vector<8x128xi32>
    %c0_205 = arith.constant 0 : index
    %c0_206 = arith.constant 0 : index
    %542 = vector.load %arg5[%c0_205, %c0_206] : memref<8x128xi32, #tpu.memory_space<vmem>>, vector<8x128xi32>
    tpu.vector_store %arg5[%c0_205, %c0_206], %541 {strides = array<i32>} : memref<8x128xi32, #tpu.memory_space<vmem>>, vector<8x128xi32>,
    %c0_i32_207 = arith.constant 0 : i32
    %543 = arith.cmpi eq, %arg1, %c0_i32_207 : i32
    %544 = arith.extui %543 : i1 to i32
    %c0_i32_208 = arith.constant 0 : i32
    %545 = arith.cmpi ne, %544, %c0_i32_208 : i32
    scf.if %545 {
      %c0_209 = arith.constant 0 : index
      %c0_210 = arith.constant 0 : index
      %546 = vector.load %arg5[%c0_209, %c0_210] : memref<8x128xi32, #tpu.memory_space<vmem>>, vector<8x128xi32>
      %547 = vector.extract_strided_slice %546 {offsets = [0, 0], sizes = [8, 1], strides = [1, 1]} : vector<8x128xi32> to vector<8x1xi32>
      %548 = vector.extract_strided_slice %546 {offsets = [0, 1], sizes = [8, 1], strides = [1, 1]} : vector<8x128xi32> to vector<8x1xi32>
      %549 = vector.extract_strided_slice %546 {offsets = [0, 2], sizes = [8, 1], strides = [1, 1]} : vector<8x128xi32> to vector<8x1xi32>
      %550 = vector.extract_strided_slice %546 {offsets = [0, 3], sizes = [8, 1], strides = [1, 1]} : vector<8x128xi32> to vector<8x1xi32>
      %551 = vector.extract_strided_slice %546 {offsets = [0, 4], sizes = [8, 1], strides = [1, 1]} : vector<8x128xi32> to vector<8x1xi32>
      %c0_i32_211 = arith.constant 0 : i32
      %552 = vector.broadcast %c0_i32_211 : i32 to vector<8x1xi32>
      %553 = arith.cmpi sgt, %551, %552 : vector<8x1xi32>
      %c0_i32_212 = arith.constant 0 : i32
      %554 = vector.broadcast %c0_i32_212 : i32 to vector<8x1xi32>
      %555 = arith.select %553, %547, %554 : vector<8x1xi1>, vector<8x1xi32>
      %c0_i32_213 = arith.constant 0 : i32
      %556 = vector.broadcast %c0_i32_213 : i32 to vector<8x1xi32>
      %557 = arith.select %553, %549, %556 : vector<8x1xi1>, vector<8x1xi32>
      %558 = arith.subi %548, %547 : vector<8x1xi32>
      %c1_i32_214 = arith.constant 1 : i32
      %559 = vector.broadcast %c1_i32_214 : i32 to vector<8x1xi32>
      %560 = arith.addi %558, %559 : vector<8x1xi32>
      %c0_i32_215 = arith.constant 0 : i32
      %561 = vector.broadcast %c0_i32_215 : i32 to vector<8x1xi32>
      %562 = arith.select %553, %560, %561 : vector<8x1xi1>, vector<8x1xi32>
      %563 = arith.subi %550, %549 : vector<8x1xi32>
      %c1_i32_216 = arith.constant 1 : i32
      %564 = vector.broadcast %c1_i32_216 : i32 to vector<8x1xi32>
      %565 = arith.addi %563, %564 : vector<8x1xi32>
      %c0_i32_217 = arith.constant 0 : i32
      %566 = vector.broadcast %c0_i32_217 : i32 to vector<8x1xi32>
      %567 = arith.select %553, %565, %566 : vector<8x1xi1>, vector<8x1xi32>
      %c0_i32_218 = arith.constant 0 : i32
      %568 = vector.broadcast %c0_i32_218 : i32 to vector<8x128xi32>
      %569 = arith.cmpi eq, %11, %568 : vector<8x128xi32>
      %c1_i32_219 = arith.constant 1 : i32
      %570 = vector.broadcast %c1_i32_219 : i32 to vector<8x128xi32>
      %571 = arith.cmpi eq, %11, %570 : vector<8x128xi32>
      %c2_i32_220 = arith.constant 2 : i32
      %572 = vector.broadcast %c2_i32_220 : i32 to vector<8x128xi32>
      %573 = arith.cmpi eq, %11, %572 : vector<8x128xi32>
      %c3_i32_221 = arith.constant 3 : i32
      %574 = vector.broadcast %c3_i32_221 : i32 to vector<8x128xi32>
      %575 = arith.cmpi eq, %11, %574 : vector<8x128xi32>
      %c0_i32_222 = arith.constant 0 : i32
      %576 = vector.shape_cast %567 : vector<8x1xi32> to vector<8x1xi32>
      %577 = vector.broadcast %576 : vector<8x1xi32> to vector<8x128xi32>
      %578 = vector.broadcast %c0_i32_222 : i32 to vector<8x128xi32>
      %579 = arith.select %575, %577, %578 : vector<8x128xi1>, vector<8x128xi32>
      %580 = vector.shape_cast %562 : vector<8x1xi32> to vector<8x1xi32>
      %581 = vector.broadcast %580 : vector<8x1xi32> to vector<8x128xi32>
      %582 = arith.select %573, %581, %579 : vector<8x128xi1>, vector<8x128xi32>
      %583 = vector.shape_cast %557 : vector<8x1xi32> to vector<8x1xi32>
      %584 = vector.broadcast %583 : vector<8x1xi32> to vector<8x128xi32>
      %585 = arith.select %571, %584, %582 : vector<8x128xi1>, vector<8x128xi32>
      %586 = vector.shape_cast %555 : vector<8x1xi32> to vector<8x1xi32>
      %587 = vector.broadcast %586 : vector<8x1xi32> to vector<8x128xi32>
      %588 = arith.select %569, %587, %585 : vector<8x128xi1>, vector<8x128xi32>
      %c0_223 = arith.constant 0 : index
      %c0_224 = arith.constant 0 : index
      %c0_225 = arith.constant 0 : index
      %589 = vector.load %arg4[%c0_223, %c0_224, %c0_225] : memref<1x8x128xi32, #tpu.memory_space<vmem>>, vector<1x8x128xi32>
      %590 = vector.shape_cast %589 : vector<1x8x128xi32> to vector<8x128xi32>
      %591 = vector.shape_cast %588 : vector<8x128xi32> to vector<1x8x128xi32>
      tpu.vector_store %arg4[%c0_223, %c0_224, %c0_225], %591 {strides = array<i32>} : memref<1x8x128xi32, #tpu.memory_space<vmem>>, vector<1x8x128xi32>,
    } else {
    }
    return
  }
  func.func @transform_0(%arg0: i32, %arg1: i32) -> (i32, i32, i32) {
    %c0_i32 = arith.constant 0 : i32
    %c0_i32_0 = arith.constant 0 : i32
    return %arg0, %arg1, %c0_i32 : i32, i32, i32
  }
  func.func @transform_1(%arg0: i32, %arg1: i32) -> (i32, i32, i32) {
    %c0_i32 = arith.constant 0 : i32
    %c0_i32_0 = arith.constant 0 : i32
    return %arg0, %arg1, %c0_i32 : i32, i32, i32
  }
  func.func @transform_2(%arg0: i32, %arg1: i32) -> (i32, i32, i32) {
    %c0_i32 = arith.constant 0 : i32
    %c0_i32_0 = arith.constant 0 : i32
    %c0_i32_1 = arith.constant 0 : i32
    return %arg0, %c0_i32, %c0_i32_0 : i32, i32, i32
  }
}

</mosaic_0001>

<bundles_post_ra>
// kernel: tpu_custom_call.1
= control target key start
LH: loop header
LB: loop body
LE: loop exit
PB: predicated region body
PF: predicated region fallthrough
CT: control target
= control target key end

     0   :  { %8 = vsyncpa [#allocation4], 0  ;;  %s2964_s0 = inlined_call_operand.hbm [shape: u8[2,16,16], index: 0, kind: input, shape index: {}]   ;;  %s2965_s1 = inlined_call_operand.hbm [shape: s8[2,16,16], index: 1, kind: output, shape index: {0}]   ;;  %s2966_s2 = inlined_call_operand.hbm [shape: s32[2,8,128], index: 2, kind: output, shape index: {1}]  }
   0x1   :  { %10 = vsyncpa [#allocation4 + $0x1], 0 }
   0x2   :  { %11 = vsyncpa [#allocation5], 0 }
   0x3   :  { %13 = vsyncpa [#allocation5 + $0x1], 0 }
   0x4   :  { %14 = vsyncpa [#allocation8], 0 }
   0x5   :  { %16 = vsyncpa [#allocation8 + $0x1], 0  ;;  %s1879_s9 = smov 0   ;;  %s1881_s10 = smov 0  }
   0x6   :  { %s1883_s11 = smov 0   ;;  %s1885_s12 = smov 0  }
   0x7   :  { %s1887_s13 = smov 0   ;;  %s1889_s14 = smov 0  }
   0x8 LB: > { %s1606_s15 = sadd.s32 4294967295, %s1853_s14   ;;  %s1607_s16 = sadd.s32 4294967294, %s1853_s14   ;;  %s1853_s14 = sphi %s1889_s14, %s22_s14   ;;  %s1849_s13 = sphi %s1887_s13, %s3086_s13   ;;  %s1845_s12 = sphi %s1885_s12, %s3085_s12   ;;  %s1841_s11 = sphi %s1883_s11, %s3084_s11   ;;  %s1837_s10 = sphi %s1881_s10, %s3083_s10   ;;  %s1833_s9 = sphi %s1879_s9, %s3082_s9  }
   0x9   : > { %s34_s17 = sadd.s32 1, %s1849_s13  ;;  %s43_s18 = sadd.s32 1, %s1841_s11 }
   0xa   : > { %p36_p0 = scmp.ge.s32.totalorder %s34_s17, 2  ;;  %p50_p1 = scmp.ne.s32.totalorder %s1841_s11, %s1837_s10 }
   0xb   : > { %p51_p2 = scmp.eq.s32.totalorder %s1853_s14, 0  ;;  %p56_p3 = scmp.ne.s32.totalorder %s1837_s10, %s1833_s9 }
   0xc   : > { %s3088_s17 = smov (%p36_p0, %s34_s17), 0  ;;  %p57_p5 = scmp.eq.s32.totalorder %s1606_s15, 0 }
   0xd   : > { %p1920_p4 = por %p51_p2, %p50_p1  ;;  %s38_s20 = ssub.s32 %s1849_s13, %s3088_s17 }
   0xe   : > { %p82_p6 = scmp.eq.s32.totalorder %s1606_s15, 1  ;;  %p41_p7 = scmp.eq.s32.totalorder %s38_s20, 0 }
   0xf   : > { %p1926_p8 = por %p57_p5, %p56_p3  ;;  %p88_p10 = scmp.eq.s32.totalorder %s1607_s16, 1 }
  0x10   : > { %p1930_p9 = por %p82_p6, %p50_p1  ;;  %p1609_p12 = scmp.ge.s32.totalorder %s1853_s14, 2 }
  0x11   : > { %s1935_s23 = scalar_select %p41_p7, %s1841_s11, %s43_s18  }
  0x12   : > { %p1937_p11 = por %p88_p10, %p56_p3  ;;  %p1647_p13 = scmp.lt.s32.totalorder %s1853_s14, 2 }
  0x13   : > { %s134_s25 = sand.u32 1, %s1841_s11   ;;  %s1624_s27 = sshll.u32 %s1849_s13, 2 }
  0x14   : > { %s1610_s26 = sshll.u32 %s134_s25, 2  ;;  %s145_s30 = scalar_lea.hbm %s2964_s0, %s1624_s27 }
  0x15   : > { %s138_s3 = scalar_lea.vmem [#allocation3], %s1610_s26  ;;  %s146_s5 = sshll.u32 %s145_s30, 4  ;;  %s147_s5 = int_to_ptr.hbm [resolvable:$true] %s146_s5 }
  0x16   : > { %s148_s4 = sshll.u32 %s138_s3, 4  ;;  %p1637_p0 = pnand %p1647_p13, %p1920_p4  ;;  %s149_s4 = int_to_ptr.vmem [resolvable:$true] %s148_s4 }
  0x17   : > { %p1613_p1 = scmp.ge.s32.totalorder %s1853_s14, 1  ;;  %s135_s6 = scalar_lea.sflag [#allocation4], %s134_s25 }
  0x18   : > { %s1855_s7 = smov 32   ;;  %s1856_s8 = smov 2  }
  0x19   : > { %1639 = dma.hbm_to_vmem [thread:$0]  (!%p1637_p0), %s147_s5, 64, %s149_s4, %s135_s6, %s1855_s7, %s1855_s7, %s1856_s8  }
  0x1a   : > { %p156_p2 = scmp.lt.s32.totalorder %s1853_s14, 3 }
  0x1c   : > { %p157_p3 = pnand %p1613_p1, %p156_p2 }
  0x1e   : > { %160 = sbr.rel (%p157_p3) target bundleno = 830 (0x33e), region = 24 }
  0x23   : > { %s1953_s15 = sand.u32 1, %s1837_s10  }
  0x24   : > { %s1614_s16 = sshll.u32 %s1953_s15, 2  ;;  %s163_s18 = scalar_lea.sflag [#allocation4], %s1953_s15 }
  0x25   : > { %s166_s19 = scalar_lea.vmem [#allocation3], %s1614_s16 }
  0x26   : > { %1820 = dma.done.wait (%p1926_p8), %s163_s18, 64  }
  0x27   : > { %1822 = vsyncadd (%p1926_p8), %s163_s18, 4294967232  ;;  %v1627_v0 = vld [vmem:[%s166_s19] sm:$0xf]   ;;  %vm238_vm0 = vcmask 130048   ;;  %vm209_vm3 = vcmask 123904   ;;  %v2968_v11 = vmov 0   ;;  %v2967_v50 = vlaneseq }
  0x28   : > { %v1628_v1 = vunpack.c.0.s8 %v1627_v0  ;;  %v1629_v2 = vunpack.c.1.s8 %v1627_v0  ;;  %s1986_s20 = scalar_lea.vmem [#allocation6], %s1614_s16  ;;  %s1858_s21 = smov 1  }
  0x29   : > { %v2028_v58 = vand.u32 127, %v2967_v50  ;;  %s1859_s25 = smov 2   ;;  %s1861_s26 = smov 3  }
  0x2a   : > { %v199_v3 = vand.u32 255, %v1628_v1  ;;  %v200_v4 = vand.u32 255, %v1629_v2  ;;  %s1862_s27 = smov 4   ;;  %s1469_s28 = sshll.u32 %s1986_s20, 4  ;;  %s1470_s28 = int_to_ptr.vmem [resolvable:$true] %s1469_s28 }
  0x2b   : > { %s1625_s29 = sshll.u32 %s1845_s12, 2  ;;  %s1450_s6 = scalar_lea.sflag [#allocation5], %s1953_s15 }
  0x2c   : > { %v201_v5 = vmul.u32 8, %v199_v3  ;;  %v202_v6 = vmul.u32 8, %v200_v4  ;;  %s1468_s4 = scalar_lea.hbm %s2965_s1, %s1625_s29  ;;  %s1759_s19 = scalar_lea.hbm %s2965_s1, 8 }
  0x2d   : > { %s1471_s5 = sshll.u32 %s1468_s4, 4  ;;  %s1472_s5 = int_to_ptr.hbm [resolvable:$true] %s1471_s5 }
  0x2e   : > { %v1963_v7 = vshra.s32 %v201_v5, 8  ;;  %v1965_v8 = vshra.s32 %v202_v6, 8  ;;  %s1753_s7 = sshra.s32 %s1472_s5, 4  ;;  %s1754_s7 = int_to_ptr.hbm [resolvable:$true] %s1753_s7 }
  0x2f   : > { %s1755_s8 = scalar_lea.hbm %s1754_s7, 4  ;;  %p1760_p7 = scmp.lt.s32.totalorder %s1754_s7, %s2965_s1 }
  0x30   : > { %v205_v9 = vpack.c.b16 %v1963_v7, %v1963_v7  ;;  %v207_v10 = vpack.c.b16 %v1965_v8, %v1965_v8  ;;  %vm235_vm1 = vcmp.eq.s32.totalorder %v1965_v8, 0  ;;  %vm234_vm2 = vcmp.eq.s32.totalorder %v1963_v7, 0  ;;  %p1756_p4 = scmp.ne.s32.totalorder %s1754_s7, %s1755_s8  ;;  %p1761_p8 = scmp.lt.s32.totalorder %s1759_s19, %s1755_s8 }
  0x31   : > { %v237_v12 = vsel %vm235_vm1, 1, %v2968_v11  ;;  %v236_v13 = vsel %vm234_vm2, 1, %v2968_v11  ;;  %vm380_vm4 = vcmp.eq.s32.totalorder %v1963_v7, 1  ;;  %vm381_vm6 = vcmp.eq.s32.totalorder %v1965_v8, 1 }
  0x32   : > { %v206_v14 = vpack.c.b8 %v205_v9, %v205_v9  ;;  %v208_v15 = vpack.c.b8 %v207_v10, %v207_v10  ;;  %v1976_v16 = vsel %vm238_vm0, %v237_v12, 2147483648  ;;  %v280_v17 = vsel %vm238_vm0, %v236_v13, 0  ;;  %p1757_p5 = pnand %p1756_p4, %p1930_p9  ;;  %p1762_p10 = por %p1761_p8, %p1760_p7 }
  0x33   : > { %v256_v18 = vshra.s32 %v1976_v16, 16  ;;  %v281_v19 = vand.u32 65535, %v280_v17  ;;  %v1981_v20 = vsel %vm238_vm0, %v236_v13, 2147483648  ;;  %v293_v22 = vsel %vm238_vm0, %v237_v12, 0 }
  0x34   : > { %210 = vst.msk [vmem:[%s1986_s20] sm:$0x3] %vm209_vm3, %v206_v14  ;;  %vm269_vm5 = vcmp.gt.s32.totalorder %v1981_v20, %v1976_v16  ;;  %v241_v21 = vshra.s32 %v1981_v20, 16  ;;  %v295_v28 = vshrl.u32 %v293_v22, 16  ;;  %v282_v29 = vshrl.u32 %v280_v17, 16  ;;  %p1758_p6 = pneg %p1757_p5 }
  0x35   : > { %211 = vst.msk [vmem:[%s1986_s20 + $0x2] sm:$0x3] %vm209_vm3, %v208_v15  ;;  %v1997_v23 = vcvt.s32.f32 %v256_v18  ;;  %v283_v24 = vcvt.s32.f32 %v281_v19  ;;  %v270_v25 = vsel %vm269_vm5, %v1981_v20, %v1976_v16  ;;  %v382_v30 = vsel %vm380_vm4, 1, %v2968_v11 }
  0x36   : > { %v271_v26 = vrot.slane %v270_v25, 4  ;;  %v2001_v27 = vcvt.s32.f32 %v241_v21  ;;  %v383_v31 = vsel %vm381_vm6, 1, %v2968_v11  ;;  %v294_v32 = vand.u32 65535, %v293_v22  ;;  %p1763_p13 = pnand %p1762_p10, %p1758_p6 }
  0x37   : > { %259 = vmax.xlane.f32.xlu1 %v1997_v23  ;;  %285 = vadd.xlane.f32.xlu2 %v283_v24  ;;  %v2010_v33 = vsel %vm238_vm0, %v382_v30, 2147483648  ;;  %v2013_v34 = vsel %vm238_vm0, %v383_v31, 2147483648  ;;  %v297_v37 = vcvt.s32.f32 %v295_v28  ;;  %v284_v38 = vcvt.s32.f32 %v282_v29 }
  0x38   : > { %vm272_vm7 = vcmp.gt.s32.totalorder %v270_v25, %v271_v26  ;;  %244 = vmax.xlane.f32.xlu0 %v2001_v27  ;;  %vm414_vm8 = vcmp.gt.s32.totalorder %v2010_v33, %v2013_v34  ;;  %v296_v40 = vcvt.s32.f32 %v294_v32  ;;  %v425_v41 = vsel %vm238_vm0, %v382_v30, 0 }
  0x39   : > { %v415_v35 = vsel %vm414_vm8, %v2010_v33, %v2013_v34  ;;  %v273_v36 = vsel %vm272_vm7, %v270_v25, %v271_v26  ;;  %v426_v43 = vand.u32 65535, %v425_v41  ;;  %v401_v44 = vshra.s32 %v2013_v34, 16 }
  0x3a   : > { %v416_v39 = vrot.slane %v415_v35, 4  ;;  %v274_v42 = vrot.slane %v273_v36, 2  ;;  %v386_v47 = vshra.s32 %v2010_v33, 16  ;;  %v438_v56 = vsel %vm238_vm0, %v383_v31, 0 }
  0x3b   : > { %v428_v51 = vcvt.s32.f32 %v426_v43  ;;  %v2022_v52 = vcvt.s32.f32 %v401_v44  ;;  %v440_v59 = vshrl.u32 %v438_v56, 16  ;;  %v427_v60 = vshrl.u32 %v425_v41, 16 }
  0x3c   : > { %vm417_vm9 = vcmp.gt.s32.totalorder %v415_v35, %v416_v39  ;;  %vm275_vm10 = vcmp.gt.s32.totalorder %v273_v36, %v274_v42  ;;  %v2024_v55 = vcvt.s32.f32 %v386_v47  ;;  %vm524_vm14 = vcmp.eq.s32.totalorder %v1963_v7, 2 }
  0x3d   : > { %v276_v45 = vsel %vm275_vm10, %v273_v36, %v274_v42  ;;  %v418_v46 = vsel %vm417_vm9, %v415_v35, %v416_v39  ;;  %vm668_vm15 = vcmp.eq.s32.totalorder %v1963_v7, 3  ;;  %v439_v61 = vand.u32 65535, %v438_v56 }
  0x3e   : > { %v277_v48 = vrot.slane %v276_v45, 1  ;;  %v419_v49 = vrot.slane %v418_v46, 2  ;;  %vm669_vm2 = vcmp.eq.s32.totalorder %v1965_v8, 3  ;;  %v526_v0 = vsel %vm524_vm14, 1, %v2968_v11 }
  0x3f   : > { %300 = vadd.xlane.f32.xlu1 %v297_v37  ;;  %287 = vadd.xlane.f32.xlu2 %v284_v38  ;;  %v2039_v1 = vsel %vm668_vm15, 1, %v2968_v11  ;;  %vm525_vm3 = vcmp.eq.s32.totalorder %v1965_v8, 2  ;;  %v442_v2 = vcvt.s32.f32 %v440_v59  ;;  %v429_v3 = vcvt.s32.f32 %v427_v60 }
  0x40   : > { %298 = vadd.xlane.f32.xlu0 %v296_v40  ;;  %vm278_vm11 = vcmp.gt.s32.totalorder %v276_v45, %v277_v48  ;;  %vm420_vm12 = vcmp.gt.s32.totalorder %v418_v46, %v419_v49  ;;  %v441_v5 = vcvt.s32.f32 %v439_v61  ;;  %v2049_v10 = vsel %vm669_vm2, 1, %v2968_v11 }
  0x41   : > { %v279_v53 = vsel %vm278_vm11, %v276_v45, %v277_v48  ;;  %v421_v54 = vsel %vm420_vm12, %v418_v46, %v419_v49  ;;  %v2052_v12 = vsel %vm238_vm0, %v526_v0, 2147483648  ;;  %v2056_v13 = vsel %vm238_vm0, %v2039_v1, 2147483648 }
  0x42   : > { %v422_v57 = vrot.slane %v421_v54, 1  ;;  %vm313_vm13 = vcmp.gt.s32.totalorder %v279_v53, 0  ;;  %v2059_v14 = vsel %vm525_vm3, 1, %v2968_v11  ;;  %v2063_v15 = vsel %vm238_vm0, %v2049_v10, 2147483648 }
  0x43   : > { %v330_v62 = vsel %vm313_vm13, %v2028_v58, 3221225472  ;;  %v314_v63 = vsel %vm313_vm13, %v2028_v58, 1073741824  ;;  %vm702_vm5 = vcmp.gt.s32.totalorder %v2056_v13, %v2063_v15  ;;  %v530_v21 = vshra.s32 %v2052_v12, 16 }
  0x44   : > { %vm423_vm1 = vcmp.gt.s32.totalorder %v421_v54, %v422_v57  ;;  %v2043_v6 = vsel %vm238_vm0, %v330_v62, 2147483648  ;;  %v2046_v9 = vsel %vm238_vm0, %v314_v63, 2147483647  ;;  %v703_v19 = vsel %vm702_vm5, %v2056_v13, %v2063_v15 }
  0x45   : > { %v424_v4 = vsel %vm423_vm1, %v421_v54, %v422_v57  ;;  %v333_v17 = vshra.s32 %v2043_v6, 16  ;;  %v317_v18 = vshra.s32 %v2046_v9, 16  ;;  %v2074_v22 = vsel %vm238_vm0, %v2059_v14, 2147483648 }
  0x46   : > { %vm458_vm4 = vcmp.gt.s32.totalorder %v424_v4, 0  ;;  %vm813_vm6 = vcmp.eq.s32.totalorder %v1965_v8, 4  ;;  %v704_v26 = vrot.slane %v703_v19, 4  ;;  %vm812_vm7 = vcmp.eq.s32.totalorder %v1963_v7, 4 }
  0x47   : > { %430 = vadd.xlane.f32.xlu1 %v428_v51  ;;  %404 = vmax.xlane.f32.xlu2 %v2022_v52  ;;  %v475_v24 = vsel %vm458_vm4, %v2028_v58, 3221225472  ;;  %v459_v25 = vsel %vm458_vm4, %v2028_v58, 1073741824  ;;  %vm558_vm8 = vcmp.gt.s32.totalorder %v2052_v12, %v2074_v22  ;;  %v2082_v28 = vcvt.s32.f32 %v333_v17 }
  0x48   : > { %389 = vmax.xlane.f32.xlu0 %v2024_v55  ;;  %v2084_v29 = vcvt.s32.f32 %v317_v18  ;;  %v2087_v30 = vsel %vm813_vm6, 1, %v2968_v11  ;;  %v2090_v31 = vsel %vm812_vm7, 1, %v2968_v11  ;;  %v2092_v32 = vcvt.s32.f32 %v530_v21 }
  0x49   : > { %v2095_v35 = vsel %vm238_vm0, %v475_v24, 2147483648  ;;  %v2098_v36 = vsel %vm238_vm0, %v459_v25, 2147483647  ;;  %vm1100_vm9 = vcmp.eq.s32.totalorder %v1963_v7, 6  ;;  %v559_v37 = vsel %vm558_vm8, %v2052_v12, %v2074_v22 }
  0x4a   : > { %vm705_vm10 = vcmp.gt.s32.totalorder %v703_v19, %v704_v26  ;;  %v674_v38 = vshra.s32 %v2056_v13, 16  ;;  %v2106_v39 = vsel %vm238_vm0, %v2087_v30, 2147483648  ;;  %v2110_v40 = vsel %vm238_vm0, %v2090_v31, 2147483648 }
  0x4b   : > { %3006 = vst [vmem:[#allocation12_spill] sm:$0xff] %v2106_v39  ;;  %v478_v41 = vshra.s32 %v2095_v35, 16  ;;  %v462_v42 = vshra.s32 %v2098_v36, 16  ;;  %v2117_v43 = vsel %vm1100_vm9, 1, %v2968_v11  ;;  %vm846_vm11 = vcmp.gt.s32.totalorder %v2110_v40, %v2106_v39 }
  0x4c   : > { %v560_v44 = vrot.slane %v559_v37, 4  ;;  %v847_v45 = vsel %vm846_vm11, %v2110_v40, %v2106_v39  ;;  %vm1101_vm12 = vcmp.eq.s32.totalorder %v1965_v8, 6  ;;  %v706_v46 = vsel %vm705_vm10, %v703_v19, %v704_v26 }
  0x4d   : > { %v2126_v47 = vsel %vm1101_vm12, 1, %v2968_v11  ;;  %v569_v48 = vsel %vm238_vm0, %v526_v0, 0  ;;  %v2131_v49 = vsel %vm238_vm0, %v2117_v43, 2147483648  ;;  %v848_v51 = vrot.slane %v847_v45, 4 }
  0x4e   : > { %3007 = vst [vmem:[#allocation13_spill] sm:$0xff] %v2131_v49  ;;  %v2135_v53 = vsel %vm238_vm0, %v2126_v47, 2147483648  ;;  %v2137_v54 = vcvt.s32.f32 %v478_v41  ;;  %v2139_v56 = vcvt.s32.f32 %v462_v42  ;;  %v707_v57 = vrot.slane %v706_v46, 2 }
  0x4f   : > { %445 = vadd.xlane.f32.xlu1 %v442_v2  ;;  %432 = vadd.xlane.f32.xlu2 %v429_v3  ;;  %3008 = vst [vmem:[#allocation14_spill] sm:$0xff] %v2135_v53  ;;  %vm1134_vm13 = vcmp.gt.s32.totalorder %v2131_v49, %v2135_v53  ;;  %v2143_v59 = vcvt.s32.f32 %v674_v38  ;;  %vm956_vm14 = vcmp.eq.s32.totalorder %v1963_v7, 5  ;;  %vm561_vm15 = vcmp.gt.s32.totalorder %v559_v37, %v560_v44 }
  0x50   : > { %443 = vadd.xlane.f32.xlu0 %v441_v5  ;;  %v570_v60 = vand.u32 65535, %v569_v48  ;;  %v1135_v61 = vsel %vm1134_vm13, %v2131_v49, %v2135_v53  ;;  %vm849_vm1 = vcmp.gt.s32.totalorder %v847_v45, %v848_v51  ;;  %v545_v62 = vshra.s32 %v2074_v22, 16 }
  0x51   : > { %v2152_v63 = vsel %vm956_vm14, 1, %v2968_v11  ;;  %vm708_vm2 = vcmp.gt.s32.totalorder %v706_v46, %v707_v57  ;;  %v562_v0 = vsel %vm561_vm15, %v559_v37, %v560_v44  ;;  %v833_v2 = vshra.s32 %v2106_v39, 16 }
  0x52   : > { %v850_v3 = vsel %vm849_vm1, %v847_v45, %v848_v51  ;;  %vm957_vm3 = vcmp.eq.s32.totalorder %v1965_v8, 5  ;;  %v1136_v4 = vrot.slane %v1135_v61, 4  ;;  %v2162_v17 = vsel %vm238_vm0, %v2152_v63, 2147483648 }
  0x53   : > { %v2158_v5 = vsel %vm957_vm3, 1, %v2968_v11  ;;  %v709_v18 = vsel %vm708_vm2, %v706_v46, %v707_v57  ;;  %v563_v19 = vrot.slane %v562_v0, 2  ;;  %v572_v24 = vcvt.s32.f32 %v570_v60 }
  0x54   : > { %v2166_v21 = vsel %vm238_vm0, %v2158_v5, 2147483648  ;;  %v2168_v25 = vcvt.s32.f32 %v545_v62  ;;  %v851_v26 = vrot.slane %v850_v3, 2  ;;  %v2172_v37 = vcvt.s32.f32 %v833_v2 }
  0x55   : > { %vm990_vm4 = vcmp.gt.s32.totalorder %v2162_v17, %v2166_v21  ;;  %vm1245_vm5 = vcmp.eq.s32.totalorder %v1965_v8, 7  ;;  %v710_v38 = vrot.slane %v709_v18, 1  ;;  %vm1137_vm6 = vcmp.gt.s32.totalorder %v1135_v61, %v1136_v4 }
  0x56   : > { %3009 = vst [vmem:[#allocation15_spill] sm:$0xff] %v2172_v37  ;;  %v991_v41 = vsel %vm990_vm4, %v2162_v17, %v2166_v21  ;;  %v571_v42 = vshrl.u32 %v569_v48, 16  ;;  %vm564_vm7 = vcmp.gt.s32.totalorder %v562_v0, %v563_v19  ;;  %vm1244_vm8 = vcmp.eq.s32.totalorder %v1963_v7, 7 }
  0x57   : > { %336 = vmax.xlane.f32.xlu1 %v2082_v28  ;;  %320 = vmin.xlane.f32.xlu2 %v2084_v29  ;;  %v689_v44 = vshra.s32 %v2063_v15, 16  ;;  %v1106_v45 = vshra.s32 %v2131_v49, 16  ;;  %v2182_v46 = vsel %vm1245_vm5, 1, %v2968_v11  ;;  %vm852_vm9 = vcmp.gt.s32.totalorder %v850_v3, %v851_v26 }
  0x58   : > { %533 = vmax.xlane.f32.xlu0 %v2092_v32  ;;  %3010 = vst [vmem:[#allocation16_spill] sm:$0xff] %v2182_v46  ;;  %v992_v8 = vrot.slane %v991_v41, 4  ;;  %v1138_v51 = vsel %vm1137_vm6, %v1135_v61, %v1136_v4  ;;  %v2186_v48 = vsel %vm1244_vm8, 1, %v2968_v11  ;;  %vm711_vm10 = vcmp.gt.s32.totalorder %v709_v18, %v710_v38 }
  0x59   : > { %3011 = vst [vmem:[#allocation17_spill] sm:$0xff] %v2186_v48  ;;  %v565_v7 = vsel %vm564_vm7, %v562_v0, %v563_v19  ;;  %v573_v57 = vcvt.s32.f32 %v571_v42  ;;  %v2190_v60 = vsel %vm238_vm0, %v2182_v46, 2147483648  ;;  %v853_v62 = vsel %vm852_vm9, %v850_v3, %v851_v26 }
  0x5a   : > { %3012 = vst [vmem:[#allocation18_spill] sm:$0xff] %v2190_v60  ;;  %v2194_v2 = vsel %vm238_vm0, %v2186_v48, 2147483648  ;;  %v2198_v50 = vcvt.s32.f32 %v1106_v45  ;;  %v1139_v61 = vrot.slane %v1138_v51, 2  ;;  %v712_v4 = vsel %vm711_vm10, %v709_v18, %v710_v38 }
  0x5b   : > { %vm1278_vm11 = vcmp.gt.s32.totalorder %v2194_v2, %v2190_v60  ;;  %v566_v0 = vrot.slane %v565_v7, 1  ;;  %vm993_vm12 = vcmp.gt.s32.totalorder %v991_v41, %v992_v8  ;;  %v854_v42 = vrot.slane %v853_v62, 1 }
  0x5c   : > { %3013 = vst [vmem:[#allocation19_spill] sm:$0xff] %v2198_v50  ;;  %v1279_v19 = vsel %vm1278_vm11, %v2194_v2, %v2190_v60  ;;  %v962_v26 = vshra.s32 %v2162_v17, 16  ;;  %v818_v11 = vshra.s32 %v2110_v40, 16  ;;  %vm746_vm13 = vcmp.gt.s32.totalorder %v712_v4, 0 }
  0x5d   : > { %v1280_v3 = vrot.slane %v1279_v19, 4  ;;  %vm1140_vm14 = vcmp.gt.s32.totalorder %v1138_v51, %v1139_v61  ;;  %v1265_v18 = vshra.s32 %v2190_v60, 16  ;;  %vm567_vm1 = vcmp.gt.s32.totalorder %v565_v7, %v566_v0 }
  0x5e   : > { %vm855_vm2 = vcmp.gt.s32.totalorder %v853_v62, %v854_v42  ;;  %v763_v45 = vsel %vm746_vm13, %v2028_v58, 3221225472  ;;  %v1141_v46 = vsel %vm1140_vm14, %v1138_v51, %v1139_v61  ;;  %v2211_v48 = vcvt.s32.f32 %v962_v26 }
  0x5f   : > { %481 = vmax.xlane.f32.xlu1 %v2137_v54  ;;  %465 = vmin.xlane.f32.xlu2 %v2139_v56  ;;  %vm1281_vm15 = vcmp.gt.s32.totalorder %v1279_v19, %v1280_v3  ;;  %v1142_v60 = vrot.slane %v1141_v46, 1  ;;  %v1121_v51 = vshra.s32 %v2135_v53, 16 }
  0x60   : > { %677 = vmax.xlane.f32.xlu0 %v2143_v59  ;;  %v1282_v38 = vsel %vm1281_vm15, %v1279_v19, %v1280_v3 }
  0x61   : > { %v1283_v39 = vrot.slane %v1282_v38, 2  ;;  %vm1143_vm7 = vcmp.gt.s32.totalorder %v1141_v46, %v1142_v60 }
  0x63   : > { %vm1284_vm6 = vcmp.gt.s32.totalorder %v1282_v38, %v1283_v39 }
  0x64   : > { %v1285_v19 = vsel %vm1284_vm6, %v1282_v38, %v1283_v39  ;;  %v1250_v39 = vshra.s32 %v2194_v2, 16 }
  0x65   : > { %v1286_v53 = vrot.slane %v1285_v19, 1 }
  0x67   : > { %574 = vadd.xlane.f32.xlu1 %v572_v24  ;;  %548 = vmax.xlane.f32.xlu2 %v2168_v25  ;;  %v2196_v24 = vcvt.s32.f32 %v689_v44  ;;  %v994_v44 = vsel %vm993_vm12, %v991_v41, %v992_v8  ;;  %v2215_v41 = vcvt.s32.f32 %v1265_v18  ;;  %v856_v8 = vsel %vm855_vm2, %v853_v62, %v854_v42 }
  0x68   : > { %836 = vmax.xlane.f32.xlu0 %v2172_v37  ;;  %v995_v49 = vrot.slane %v994_v44, 2  ;;  %v2213_v37 = vcvt.s32.f32 %v818_v11  ;;  %vm890_vm5 = vcmp.gt.s32.totalorder %v856_v8, 0  ;;  %v977_v11 = vshra.s32 %v2166_v21, 16 }
  0x69   : > { %3014 = vst [vmem:[#allocation20_spill] sm:$0xff] %v2215_v41  ;;  %v2230_v42 = vcvt.s32.f32 %v1121_v51  ;;  %vm1287_vm10 = vcmp.gt.s32.totalorder %v1285_v19, %v1286_v53 }
  0x6a   : > { %vm996_vm4 = vcmp.gt.s32.totalorder %v994_v44, %v995_v49  ;;  %v2232_v3 = vcvt.s32.f32 %v977_v11 }
  0x6b   : > { %v997_v61 = vsel %vm996_vm4, %v994_v44, %v995_v49 }
  0x6f   : > { %692 = vmax.xlane.f32.xlu1 %v2196_v24  ;;  %576 = vadd.xlane.f32.xlu2 %v573_v57  ;;  %v568_v57 = vsel %vm567_vm1, %v565_v7, %v566_v0  ;;  %v891_v0 = vsel %vm890_vm5, %v2028_v58, 1073741824 }
  0x70   : > { %1109 = vmax.xlane.f32.xlu0 %v2198_v50  ;;  %v2218_v50 = vsel %vm238_vm0, %v763_v45, 2147483648  ;;  %vm602_vm3 = vcmp.gt.s32.totalorder %v568_v57, 0  ;;  %v1144_v45 = vsel %vm1143_vm7, %v1141_v46, %v1142_v60  ;;  %v747_v46 = vsel %vm746_vm13, %v2028_v58, 1073741824 }
  0x71   : > { %3015 = vst [vmem:[#allocation21_spill] sm:$0xff] %v2218_v50  ;;  %v766_v7 = vshra.s32 %v2218_v50, 16  ;;  %v619_v62 = vsel %vm602_vm3, %v2028_v58, 3221225472  ;;  %v2240_v50 = vsel %vm238_vm0, %v891_v0, 2147483647  ;;  %vm1178_vm8 = vcmp.gt.s32.totalorder %v1144_v45, 0 }
  0x72   : > { %v2237_v18 = vsel %vm238_vm0, %v619_v62, 2147483648  ;;  %3018 = vst [vmem:[#allocation24_spill] sm:$0xff] %v2240_v50  ;;  %v894_v44 = vshra.s32 %v2240_v50, 16  ;;  %v603_v60 = vsel %vm602_vm3, %v2028_v58, 1073741824  ;;  %v1195_v38 = vsel %vm1178_vm8, %v2028_v58, 3221225472 }
  0x73   : > { %v2234_v26 = vcvt.s32.f32 %v766_v7  ;;  %3017 = vst [vmem:[#allocation23_spill] sm:$0xff] %v2237_v18  ;;  %v622_v49 = vshra.s32 %v2237_v18, 16  ;;  %v2256_v7 = vcvt.s32.f32 %v1250_v39  ;;  %v2261_v0 = vsel %vm238_vm0, %v747_v46, 2147483647 }
  0x74   : > { %v2258_v62 = vcvt.s32.f32 %v894_v44  ;;  %3021 = vst [vmem:[#allocation27_spill] sm:$0xff] %v2261_v0  ;;  %v1288_v18 = vsel %vm1287_vm10, %v1285_v19, %v1286_v53  ;;  %v2264_v4 = vsel %vm238_vm0, %v603_v60, 2147483647  ;;  %v2267_v57 = vsel %vm238_vm0, %v1195_v38, 2147483648 }
  0x75   : > { %3016 = vst [vmem:[#allocation22_spill] sm:$0xff] %v2234_v26  ;;  %v2254_v51 = vcvt.s32.f32 %v622_v49  ;;  %v750_v49 = vshra.s32 %v2261_v0, 16  ;;  %vm1322_vm12 = vcmp.gt.s32.totalorder %v1288_v18, 0  ;;  %v1198_v53 = vshra.s32 %v2267_v57, 16 }
  0x76   : > { %3020 = vst [vmem:[#allocation26_spill] sm:$0xff] %v2258_v62  ;;  %v907_v19 = vsel %vm890_vm5, %v2028_v58, 3221225472  ;;  %v1323_v39 = vsel %vm1322_vm12, %v2028_v58, 1073741824 }
  0x77   : > { %965 = vmax.xlane.f32.xlu1 %v2211_v48  ;;  %821 = vmax.xlane.f32.xlu2 %v2213_v37  ;;  %3019 = vst [vmem:[#allocation25_spill] sm:$0xff] %v2254_v51  ;;  %v2281_v44 = vcvt.s32.f32 %v750_v49  ;;  %v2285_v60 = vcvt.s32.f32 %v1198_v53  ;;  %v2291_v0 = vsel %vm238_vm0, %v907_v19, 2147483648  ;;  %v1179_v53 = vsel %vm1178_vm8, %v2028_v58, 1073741824 }
  0x78   : > { %1268 = vmax.xlane.f32.xlu0 %v2215_v41  ;;  %v998_v41 = vrot.slane %v997_v61, 1  ;;  %3022 = vst [vmem:[#allocation28_spill] sm:$0xff] %v2267_v57  ;;  %v910_v49 = vshra.s32 %v2291_v0, 16 }
  0x79   : > { %3023 = vst [vmem:[#allocation29_spill] sm:$0xff] %v2281_v44 }
  0x7a   : > { %vm999_vm9 = vcmp.gt.s32.totalorder %v997_v61, %v998_v41  ;;  %3024 = vst [vmem:[#allocation30_spill] sm:$0xff] %v2285_v60 }
  0x7b   : > { %v1000_v11 = vsel %vm999_vm9, %v997_v61, %v998_v41  ;;  %v606_v41 = vshra.s32 %v2264_v4, 16 }
  0x7c   : > { %vm1034_vm11 = vcmp.gt.s32.totalorder %v1000_v11, 0 }
  0x7d   : > { %v1051_v61 = vsel %vm1034_vm11, %v2028_v58, 3221225472  ;;  %v2283_v46 = vcvt.s32.f32 %v606_v41 }
  0x7e   : > { %v2288_v38 = vsel %vm238_vm0, %v1051_v61, 2147483648  ;;  %v1035_v61 = vsel %vm1034_vm11, %v2028_v58, 1073741824 }
  0x7f   : > { %1124 = vmax.xlane.f32.xlu1 %v2230_v42  ;;  %980 = vmax.xlane.f32.xlu2 %v2232_v3  ;;  %3025 = vst [vmem:[#allocation31_spill] sm:$0xff] %v2288_v38  ;;  %v1054_v8 = vshra.s32 %v2288_v38, 16  ;;  %v2313_v38 = vsel %vm238_vm0, %v1179_v53, 2147483647  ;;  %v2316_v57 = vsel %vm238_vm0, %v1035_v61, 2147483647 }
  0x80   : > { %769 = vmax.xlane.f32.xlu0 %v2234_v26  ;;  %3030 = vst [vmem:[#allocation36_spill] sm:$0xff] %v2313_v38  ;;  %v1182_v45 = vshra.s32 %v2313_v38, 16  ;;  %v1038_v11 = vshra.s32 %v2316_v57, 16  ;;  %v2336_v61 = vsel %vm238_vm0, %v2059_v14, 0  ;;  %v240_v14 = vand.u32 65535, %v1981_v20 }
  0x81   : > { %v2306_v19 = vcvt.s32.f32 %v1054_v8  ;;  %3031 = vst [vmem:[#allocation37_spill] sm:$0xff] %v2316_v57 }
  0x82   : > { %v2332_v53 = vcvt.s32.f32 %v1038_v11 }
  0x83   : > { %3027 = vst [vmem:[#allocation33_spill] sm:$0xff] %v2306_v19 }
  0x84   : > { %3033 = vst [vmem:[#allocation39_spill] sm:$0xff] %v2332_v53 }
  0x87   : > { %625 = vmax.xlane.f32.xlu1 %v2254_v51  ;;  %1253 = vmax.xlane.f32.xlu2 %v2256_v7  ;;  %v2294_v51 = vsel %vm238_vm0, %v1323_v39, 2147483647  ;;  %v2308_v39 = vcvt.s32.f32 %v910_v49  ;;  %v1339_v49 = vsel %vm1322_vm12, %v2028_v58, 3221225472 }
  0x88   : > { %897 = vmin.xlane.f32.xlu0 %v2258_v62  ;;  %3026 = vst [vmem:[#allocation32_spill] sm:$0xff] %v2294_v51  ;;  %v1326_v41 = vshra.s32 %v2294_v51, 16  ;;  %v2320_v51 = vsel %vm238_vm0, %v2049_v10, 0  ;;  %v2339_v38 = vsel %vm238_vm0, %v1339_v49, 2147483648  ;;  %v255_v49 = vand.u32 65535, %v1976_v16 }
  0x89   : > { %3028 = vst [vmem:[#allocation34_spill] sm:$0xff] %v2308_v39  ;;  %v728_v8 = vshrl.u32 %v2320_v51, 16  ;;  %v1342_v18 = vshra.s32 %v2339_v38, 16  ;;  %v2365_v16 = vsel %vm238_vm0, %v2087_v30, 0 }
  0x8a   : > { %3034 = vst [vmem:[#allocation40_spill] sm:$0xff] %v2339_v38 }
  0x8b   : > { %v730_v10 = vcvt.s32.f32 %v728_v8  ;;  %v2345_v11 = vcvt.s32.f32 %v1342_v18  ;;  %v2349_v8 = vsel %vm238_vm0, %v2039_v1, 0 }
  0x8d   : > { %3035 = vst [vmem:[#allocation41_spill] sm:$0xff] %v2345_v11 }
  0x8f   : > { %753 = vmin.xlane.f32.xlu1 %v2281_v44  ;;  %609 = vmin.xlane.f32.xlu2 %v2283_v46  ;;  %v2310_v44 = vcvt.s32.f32 %v1326_v41  ;;  %v2330_v41 = vcvt.s32.f32 %v1182_v45 }
  0x90   : > { %1201 = vmax.xlane.f32.xlu0 %v2285_v60 }
  0x91   : > { %3029 = vst [vmem:[#allocation35_spill] sm:$0xff] %v2310_v44 }
  0x92   : > { %3032 = vst [vmem:[#allocation38_spill] sm:$0xff] %v2330_v41 }
  0x97   : > { %1057 = vmax.xlane.f32.xlu1 %v2306_v19  ;;  %913 = vmax.xlane.f32.xlu2 %v2308_v39  ;;  %v584_v19 = vshrl.u32 %v2336_v61, 16 }
  0x98   : > { %1329 = vmin.xlane.f32.xlu0 %v2310_v44  ;;  %v242_v44 = vcvt.s32.f32 %v240_v14  ;;  %v872_v14 = vshrl.u32 %v2365_v16, 16 }
  0x99   : > { %v586_v45 = vcvt.s32.f32 %v584_v19  ;;  %v257_v19 = vcvt.s32.f32 %v255_v49 }
  0x9f   : > { %1185 = vmin.xlane.f32.xlu1 %v2330_v41  ;;  %1041 = vmin.xlane.f32.xlu2 %v2332_v53  ;;  %v715_v41 = vshrl.u32 %v2349_v8, 16 }
  0xa0   : > { %733 = vadd.xlane.f32.xlu0 %v730_v10 }
  0xa1   : > { %v717_v1 = vcvt.s32.f32 %v715_v41  ;;  %v874_v41 = vcvt.s32.f32 %v872_v14 }
  0xa7   : > { %589 = vadd.xlane.f32.xlu1 %v586_v45  ;;  %1345 = vmax.xlane.f32.xlu2 %v2345_v11 }
  0xaa   : > { %v2355_v60 = vpop.xlane.xlu1 %259  ;;  %v286_v10 = vpop.xlane.xlu2 %285 }
  0xab   : > { %v2357_v18 = vpop.xlane.xlu0 %244  ;;  %vm261_vm13 = vcmp.eq.f32.partialorder %v1997_v23, %v2355_v60  ;;  %v289_v57 = vcvt.f32.s32 %v286_v10 }
  0xac   : > { %vm246_vm14 = vcmp.eq.f32.partialorder %v2001_v27, %v2357_v18  ;;  %v262_v45 = vsel %vm261_vm13, %v257_v19, -inf  ;;  %v400_v27 = vand.u32 65535, %v2013_v34 }
  0xad   : > { %v247_v20 = vsel %vm246_vm14, %v242_v44, -inf  ;;  %v385_v44 = vand.u32 65535, %v2010_v33 }
  0xae   : > { %248 = vmax.xlane.f32.xlu0 %v247_v20 }
  0xaf   : > { %263 = vmax.xlane.f32.xlu1 %v262_v45  ;;  %720 = vadd.xlane.f32.xlu2 %v717_v1  ;;  %v402_v1 = vcvt.s32.f32 %v400_v27  ;;  %v387_v50 = vcvt.s32.f32 %v385_v44  ;;  %v529_v27 = vand.u32 65535, %v2052_v12  ;;  %v583_v12 = vand.u32 65535, %v2336_v61 }
  0xb0   : > { %v332_v61 = vand.u32 65535, %v2043_v6  ;;  %v688_v6 = vand.u32 65535, %v2063_v15 }
  0xb2   : > { %v301_v49 = vpop.xlane.xlu1 %300  ;;  %v288_v11 = vpop.xlane.xlu2 %287 }
  0xb3   : > { %v303_v38 = vcvt.f32.s32 %v301_v49  ;;  %v290_v53 = vcvt.f32.s32 %v288_v11  ;;  %v299_v23 = vpop.xlane.xlu0 %298 }
  0xb4   : > { %v302_v62 = vcvt.f32.s32 %v299_v23 }
  0xb5   : > { %v304_v26 = vshll.u32 %v303_v38, 16  ;;  %v291_v30 = vshll.u32 %v290_v53, 16 }
  0xb7   : > { %v292_v20 = vadd.s32 %v291_v30, %v289_v57  ;;  %v305_v19 = vadd.s32 %v304_v26, %v302_v62  ;;  %877 = vadd.xlane.f32.xlu2 %v874_v41 }
  0xb9   : > { %v2370_v45 = vadd.s32 %v305_v19, %v292_v20 }
  0xba   : > { %v431_v39 = vpop.xlane.xlu1 %430  ;;  %v2372_v49 = vpop.xlane.xlu2 %404 }
  0xbb   : > { %v2374_v11 = vpop.xlane.xlu0 %389  ;;  %vm406_vm15 = vcmp.eq.f32.partialorder %v2022_v52, %v2372_v49  ;;  %v434_v14 = vcvt.f32.s32 %v431_v39  ;;  %v673_v39 = vand.u32 65535, %v2056_v13  ;;  %v544_v13 = vand.u32 65535, %v2074_v22 }
  0xbc   : > { %vm391_vm1 = vcmp.eq.f32.partialorder %v2024_v55, %v2374_v11  ;;  %v407_v34 = vsel %vm406_vm15, %v402_v1, -inf  ;;  %v531_v55 = vcvt.s32.f32 %v529_v27 }
  0xbd   : > { %v392_v33 = vsel %vm391_vm1, %v387_v50, -inf  ;;  %408 = vmax.xlane.f32.xlu0 %v407_v34  ;;  %v675_v34 = vcvt.s32.f32 %v673_v39 }
  0xbe   : > { %393 = vmax.xlane.f32.xlu1 %v392_v33 }
  0xc2   : > { %v446_v26 = vpop.xlane.xlu1 %445  ;;  %v433_v62 = vpop.xlane.xlu2 %432 }
  0xc3   : > { %v448_v57 = vcvt.f32.s32 %v446_v26  ;;  %v435_v38 = vcvt.f32.s32 %v433_v62  ;;  %v444_v53 = vpop.xlane.xlu0 %443  ;;  %v585_v62 = vcvt.s32.f32 %v583_v12 }
  0xc4   : > { %v447_v10 = vcvt.f32.s32 %v444_v53 }
  0xc5   : > { %v449_v23 = vshll.u32 %v448_v57, 16  ;;  %v436_v41 = vshll.u32 %v435_v38, 16  ;;  %v2401_v38 = vsel %vm238_vm0, %v2090_v31, 0 }
  0xc6   : > { %v859_v53 = vshrl.u32 %v2401_v38, 16 }
  0xc7   : > { %v437_v30 = vadd.s32 %v436_v41, %v434_v14  ;;  %v450_v52 = vadd.s32 %v449_v23, %v447_v10  ;;  %v546_v10 = vcvt.s32.f32 %v544_v13  ;;  %v334_v14 = vcvt.s32.f32 %v332_v61 }
  0xc8   : > { %v861_v27 = vcvt.s32.f32 %v859_v53 }
  0xc9   : > { %v2381_v44 = vadd.s32 %v450_v52, %v437_v30  ;;  %v477_v30 = vand.u32 65535, %v2095_v35  ;;  %v727_v52 = vand.u32 65535, %v2320_v51  ;;  %v2429_v35 = vsel %vm238_vm0, %v2152_v63, 0 }
  0xca   : > { %v2383_v20 = vpop.xlane.xlu1 %336  ;;  %v2385_v50 = vpop.xlane.xlu2 %320 }
  0xcb   : > { %v2387_v19 = vpop.xlane.xlu0 %533  ;;  %vm338_vm4 = vcmp.eq.f32.partialorder %v2082_v28, %v2383_v20  ;;  %v729_v12 = vcvt.s32.f32 %v727_v52  ;;  %vm322_vm8 = vcmp.eq.f32.partialorder %v2084_v29, %v2385_v50  ;;  %v871_v29 = vand.u32 65535, %v2365_v16 }
  0xcc   : > { %vm535_vm2 = vcmp.eq.f32.partialorder %v2092_v32, %v2387_v19  ;;  %v714_v16 = vand.u32 65535, %v2349_v8  ;;  %v1158_v8 = vsel %vm238_vm0, %v2126_v47, 0 }
  0xcd   : > { %v536_v1 = vsel %vm535_vm2, %v531_v55, -inf  ;;  %v690_v55 = vcvt.s32.f32 %v688_v6  ;;  %v461_v6 = vand.u32 65535, %v2098_v36  ;;  %v873_v52 = vcvt.s32.f32 %v871_v29 }
  0xce   : > { %537 = vmax.xlane.f32.xlu1 %v536_v1  ;;  %v479_v1 = vcvt.s32.f32 %v477_v30  ;;  %v961_v36 = vand.u32 65535, %v2162_v17  ;;  %vm374_vm2 = vcmp.eq.s32.totalorder %v2028_v58, 4 }
  0xcf   : > { %v463_v30 = vcvt.s32.f32 %v461_v6  ;;  %v3038_v6 = vld [vmem:[#allocation17_spill] sm:$0xff] }
  0xd0   : > { %v1289_v47 = vsel %vm238_vm0, %v3038_v6, 0  ;;  %v1249_v6 = vand.u32 65535, %v2194_v2 }
  0xd2   : > { %v2393_v33 = vpop.xlane.xlu1 %481  ;;  %v2395_v26 = vpop.xlane.xlu2 %465 }
  0xd3   : > { %v2397_v57 = vpop.xlane.xlu0 %677  ;;  %vm483_vm6 = vcmp.eq.f32.partialorder %v2137_v54, %v2393_v33  ;;  %v1003_v54 = vshrl.u32 %v2429_v35, 16  ;;  %vm467_vm10 = vcmp.eq.f32.partialorder %v2139_v56, %v2395_v26 }
  0xd4   : > { %vm679_vm3 = vcmp.eq.f32.partialorder %v2143_v59, %v2397_v57  ;;  %v339_v59 = vsel %vm338_vm4, %v334_v14, -inf  ;;  %v484_v61 = vsel %vm483_vm6, %v479_v1, -inf }
  0xd5   : > { %v680_v32 = vsel %vm679_vm3, %v675_v34, -inf  ;;  %v817_v34 = vand.u32 65535, %v2110_v40 }
  0xd6   : > { %587 = vadd.xlane.f32.xlu1 %v585_v62  ;;  %681 = vmax.xlane.f32.xlu2 %v680_v32  ;;  %v316_v62 = vand.u32 65535, %v2046_v9  ;;  %v1005_v9 = vcvt.s32.f32 %v1003_v54  ;;  %v1160_v54 = vshrl.u32 %v1158_v8, 16 }
  0xd7   : > { %v819_v53 = vcvt.s32.f32 %v817_v34 }
  0xda   : > { %v575_v23 = vpop.xlane.xlu1 %574  ;;  %v2408_v41 = vpop.xlane.xlu2 %548 }
  0xdb   : > { %vm550_vm5 = vcmp.eq.f32.partialorder %v2168_v25, %v2408_v41  ;;  %v2414_v22 = vpop.xlane.xlu0 %836  ;;  %v578_v13 = vcvt.f32.s32 %v575_v23  ;;  %v1014_v23 = vsel %vm238_vm0, %v2158_v5, 0  ;;  %v2458_v5 = vsel %vm238_vm0, %v2117_v43, 0 }
  0xdc   : > { %v551_v31 = vsel %vm550_vm5, %v546_v10, -inf  ;;  %v318_v10 = vcvt.s32.f32 %v316_v62  ;;  %v1147_v56 = vshrl.u32 %v2458_v5, 16 }
  0xdd   : > { %552 = vmax.xlane.f32.xlu0 %v551_v31 }
  0xde   : > { %864 = vadd.xlane.f32.xlu1 %v861_v27  ;;  %340 = vmax.xlane.f32.xlu2 %v339_v59  ;;  %v323_v31 = vsel %vm322_vm8, %v318_v10, inf  ;;  %v1016_v59 = vshrl.u32 %v1014_v23, 16  ;;  %v1149_v43 = vcvt.s32.f32 %v1147_v56 }
  0xe2   : > { %v2419_v39 = vpop.xlane.xlu1 %692  ;;  %v577_v28 = vpop.xlane.xlu2 %576 }
  0xe3   : > { %v579_v25 = vcvt.f32.s32 %v577_v28  ;;  %vm694_vm7 = vcmp.eq.f32.partialorder %v2196_v24, %v2419_v39  ;;  %v2425_v15 = vpop.xlane.xlu0 %1109  ;;  %v468_v28 = vsel %vm467_vm10, %v463_v30, inf  ;;  %v3039_v30 = vld [vmem:[#allocation13_spill] sm:$0xff] }
  0xe4   : > { %v695_v51 = vsel %vm694_vm7, %v690_v55, -inf  ;;  %v1018_v55 = vcvt.s32.f32 %v1016_v59 }
  0xe5   : > { %v580_v32 = vshll.u32 %v579_v25, 16  ;;  %696 = vmax.xlane.f32.xlu0 %v695_v51  ;;  %v716_v25 = vcvt.s32.f32 %v714_v16 }
  0xe6   : > { %731 = vadd.xlane.f32.xlu1 %v729_v12  ;;  %485 = vmax.xlane.f32.xlu2 %v484_v61  ;;  %v963_v12 = vcvt.s32.f32 %v961_v36  ;;  %v1015_v61 = vand.u32 65535, %v1014_v23  ;;  %v1105_v23 = vand.u32 65535, %v3039_v30  ;;  %v307_v30 = vrot.slane %v2370_v45, 4 }
  0xe7   : > { %v2434_v24 = vadd.s32 %v580_v32, %v578_v13  ;;  %v3036_v13 = vld [vmem:[#allocation12_spill] sm:$0xff] }
  0xe8   : > { %v832_v32 = vand.u32 65535, %v3036_v13  ;;  %v1107_v36 = vcvt.s32.f32 %v1105_v23 }
  0xea   : > { %v2438_v63 = vpop.xlane.xlu1 %965  ;;  %v2440_v40 = vpop.xlane.xlu2 %821 }
  0xeb   : > { %vm823_vm9 = vcmp.eq.f32.partialorder %v2213_v37, %v2440_v40  ;;  %v2444_v14 = vpop.xlane.xlu0 %1268  ;;  %vm967_vm11 = vcmp.eq.f32.partialorder %v2211_v48, %v2438_v63  ;;  %v834_v48 = vcvt.s32.f32 %v832_v32 }
  0xec   : > { %v824_v27 = vsel %vm823_vm9, %v819_v53, -inf  ;;  %v968_v62 = vsel %vm967_vm11, %v963_v12, -inf  ;;  %v3037_v53 = vld [vmem:[#allocation15_spill] sm:$0xff] }
  0xed   : > { %324 = vmin.xlane.f32.xlu0 %v323_v31  ;;  %vm838_vm12 = vcmp.eq.f32.partialorder %v3037_v53, %v2414_v22  ;;  %v3040_v12 = vld [vmem:[#allocation19_spill] sm:$0xff] }
  0xee   : > { %1008 = vadd.xlane.f32.xlu1 %v1005_v9  ;;  %825 = vmax.xlane.f32.xlu2 %v824_v27  ;;  %v1017_v9 = vcvt.s32.f32 %v1015_v61  ;;  %v1162_v27 = vcvt.s32.f32 %v1160_v54  ;;  %v839_v59 = vsel %vm838_vm12, %v834_v48, -inf  ;;  %vm1111_vm13 = vcmp.eq.f32.partialorder %v3040_v12, %v2425_v15  ;;  %v3042_v12 = vld [vmem:[#allocation14_spill] sm:$0xff] }
  0xef   : > { %v1112_v13 = vsel %vm1111_vm13, %v1107_v36, -inf  ;;  %v1159_v61 = vand.u32 65535, %v1158_v8  ;;  %v1290_v8 = vand.u32 65535, %v1289_v47  ;;  %v308_v36 = vadd.s32 %v307_v30, %v2370_v45 }
  0xf2   : > { %v2452_v37 = vpop.xlane.xlu1 %1124  ;;  %v2465_v51 = vpop.xlane.xlu2 %980 }
  0xf3   : > { %v2454_v1 = vpop.xlane.xlu0 %769  ;;  %vm982_vm14 = vcmp.eq.f32.partialorder %v2232_v3, %v2465_v51  ;;  %vm1126_vm1 = vcmp.eq.f32.partialorder %v2230_v42, %v2452_v37 }
  0xf5   : > { %469 = vmin.xlane.f32.xlu0 %v468_v28 }
  0xf6   : > { %875 = vadd.xlane.f32.xlu1 %v873_v52  ;;  %1021 = vadd.xlane.f32.xlu2 %v1018_v55  ;;  %v858_v52 = vand.u32 65535, %v2401_v38  ;;  %v1291_v55 = vshrl.u32 %v1289_v47, 16  ;;  %v266_v47 = vcvt.f32.s32 %v2355_v60 }
  0xf8   : > { %v860_v28 = vcvt.s32.f32 %v858_v52  ;;  %v1293_v56 = vcvt.s32.f32 %v1291_v55  ;;  %v1251_v52 = vcvt.s32.f32 %v1249_v6 }
  0xfa   : > { %v2467_v34 = vpop.xlane.xlu1 %625  ;;  %v2482_v29 = vpop.xlane.xlu2 %1253 }
  0xfb   : > { %v2469_v17 = vpop.xlane.xlu0 %897 }
  0xfd   : > { %718 = vadd.xlane.f32.xlu0 %v716_v25  ;;  %v976_v25 = vand.u32 65535, %v2166_v21  ;;  %v1161_v21 = vcvt.s32.f32 %v1159_v61 }
  0xfe   : > { %1152 = vadd.xlane.f32.xlu1 %v1149_v43  ;;  %969 = vmax.xlane.f32.xlu2 %v968_v62  ;;  %v3041_v43 = vld [vmem:[#allocation16_spill] sm:$0xff] }
  0xff   : > { %v1302_v62 = vsel %vm238_vm0, %v3041_v43, 0  ;;  %v978_v48 = vcvt.s32.f32 %v976_v25  ;;  %vm1255_vm0 = vcmp.eq.f32.partialorder %v2256_v7, %v2482_v29  ;;  %v1120_v25 = vand.u32 65535, %v3042_v12 }
 0x100   : > { %v1304_v54 = vshrl.u32 %v1302_v62, 16  ;;  %v251_v43 = vcvt.f32.s32 %v2357_v18  ;;  %v1303_v7 = vand.u32 65535, %v1302_v62  ;;  %v452_v62 = vrot.slane %v2381_v44, 4 }
 0x102   : > { %v2476_v10 = vpop.xlane.xlu1 %753  ;;  %v2495_v38 = vpop.xlane.xlu2 %609  ;;  %v1305_v30 = vcvt.s32.f32 %v1303_v7 }
 0x103   : > { %v2478_v31 = vpop.xlane.xlu0 %1201  ;;  %vm611_vm15 = vcmp.eq.f32.partialorder %v2283_v46, %v2495_v38  ;;  %v909_v46 = vand.u32 65535, %v2291_v0  ;;  %v453_v0 = vadd.s32 %v452_v62, %v2381_v44 }
 0x105   : > { %840 = vmax.xlane.f32.xlu0 %v839_v59  ;;  %v1002_v59 = vand.u32 65535, %v2429_v35  ;;  %v1256_v35 = vsel %vm1255_vm0, %v1251_v52, -inf  ;;  %v911_v7 = vcvt.s32.f32 %v909_v46 }
 0x106   : > { %1019 = vadd.xlane.f32.xlu1 %v1017_v9  ;;  %1165 = vadd.xlane.f32.xlu2 %v1162_v27  ;;  %v1306_v9 = vcvt.s32.f32 %v1304_v54  ;;  %v983_v27 = vsel %vm982_vm14, %v978_v48, -inf  ;;  %v3043_v54 = vlaneseq  ;;  %v1122_v48 = vcvt.s32.f32 %v1120_v25 }
 0x107   : > { %v1004_v3 = vcvt.s32.f32 %v1002_v59  ;;  %v1146_v25 = vand.u32 65535, %v2458_v5 }
 0x108   : > { %v2518_v45 = vshrl.u32 %v3043_v54, 7 }
 0x109   : > { %v1148_v44 = vcvt.s32.f32 %v1146_v25  ;;  %v3051_v25 = vld [vmem:[#allocation23_spill] sm:$0xff] }
 0x10a   : > { %v2486_v16 = vpop.xlane.xlu1 %1057  ;;  %v2506_v55 = vpop.xlane.xlu2 %913 }
 0x10b   : > { %v2493_v32 = vpop.xlane.xlu0 %1329 }
 0x10d   : > { %862 = vadd.xlane.f32.xlu0 %v860_v28  ;;  %v1292_v28 = vcvt.s32.f32 %v1290_v8 }
 0x10e   : > { %1296 = vadd.xlane.f32.xlu1 %v1293_v56  ;;  %1113 = vmax.xlane.f32.xlu2 %v1112_v13  ;;  %v605_v56 = vand.u32 65535, %v2264_v4  ;;  %v309_v13 = vrot.slane %v308_v36, 2  ;;  %v267_v4 = vshll.u32 %v266_v47, 16 }
 0x110   : > { %v607_v61 = vcvt.s32.f32 %v605_v56  ;;  %v1127_v56 = vsel %vm1126_vm1, %v1122_v48, -inf  ;;  %vm218_vm1 = vcmp.eq.s32.totalorder %v2028_v58, 3 }
 0x112   : > { %v2499_v53 = vpop.xlane.xlu1 %1185  ;;  %v2525_v18 = vpop.xlane.xlu2 %1041  ;;  %v612_v52 = vsel %vm611_vm15, %v607_v61, inf  ;;  %v3046_v61 = vld [vmem:[#allocation34_spill] sm:$0xff] }
 0x113   : > { %v2504_v23 = vpop.xlane.xlu0 %733  ;;  %vm915_vm5 = vcmp.eq.f32.partialorder %v3046_v61, %v2506_v55 }
 0x115   : > { %984 = vmax.xlane.f32.xlu0 %v983_v27  ;;  %v310_v27 = vadd.s32 %v309_v13, %v308_v36  ;;  %v396_v36 = vcvt.f32.s32 %v2374_v11 }
 0x116   : > { %1163 = vadd.xlane.f32.xlu1 %v1161_v21  ;;  %1309 = vadd.xlane.f32.xlu2 %v1306_v9  ;;  %v252_v21 = vshll.u32 %v251_v43, 16  ;;  %v411_v9 = vcvt.f32.s32 %v2372_v49  ;;  %v2531_v49 = vadd.s32 8, %v2518_v45  ;;  %v3045_v43 = vld [vmem:[#allocation18_spill] sm:$0xff] }
 0x117   : > { %v311_v47 = vrot.slane %v310_v27, 1  ;;  %v1264_v13 = vand.u32 65535, %v3045_v43  ;;  %v621_v43 = vand.u32 65535, %v3051_v25 }
 0x118   : > { %v2534_v42 = vshll.u32 %v411_v9, 16 }
 0x11a   : > { %v2511_v2 = vpop.xlane.xlu1 %589 }
 0x11d   : > { %1006 = vadd.xlane.f32.xlu0 %v1004_v3  ;;  %v3044_v3 = vld [vmem:[#allocation21_spill] sm:$0xff] }
 0x11e   : > { %1294 = vadd.xlane.f32.xlu1 %v1292_v28  ;;  %1257 = vmax.xlane.f32.xlu2 %v1256_v35  ;;  %v765_v28 = vand.u32 65535, %v3044_v3  ;;  %v916_v3 = vsel %vm915_vm5, %v911_v7, -inf  ;;  %v3052_v7 = vld [vmem:[#allocation26_spill] sm:$0xff] }
 0x11f   : > { %vm899_vm12 = vcmp.eq.f32.partialorder %v3052_v7, %v2469_v17 }
 0x120   : > { %v767_v54 = vcvt.s32.f32 %v765_v28  ;;  %v2553_v28 = vpop.xlane.xlu2 %1345 }
 0x121   : > { %v249_v60 = vpop.xlane.xlu0 %248 }
 0x122   : > { %v250_v6 = vcvt.f32.s32 %v249_v60  ;;  %v264_v59 = vpop.xlane.xlu1 %263 }
 0x123   : > { %v265_v8 = vcvt.f32.s32 %v264_v59  ;;  %v3049_v59 = vld [vmem:[#allocation37_spill] sm:$0xff] }
 0x124   : > { %v253_v35 = vadd.s32 %v252_v21, %v250_v6  ;;  %v3047_v21 = vld [vmem:[#allocation24_spill] sm:$0xff]  ;;  %v3048_v6 = vld [vmem:[#allocation22_spill] sm:$0xff] }
 0x125   : > { %v268_v12 = vadd.s32 %v267_v4, %v265_v8  ;;  %1128 = vmax.xlane.f32.xlu0 %v1127_v56  ;;  %v893_v9 = vand.u32 65535, %v3047_v21  ;;  %vm771_vm8 = vcmp.eq.f32.partialorder %v3048_v6, %v2454_v1  ;;  %v312_v8 = vadd.s32 %v311_v47, %v310_v27  ;;  %v3053_v21 = vld [vmem:[#allocation39_spill] sm:$0xff] }
 0x126   : > { %vm346_vm3 = vcmp.gt.s32.totalorder %v253_v35, 0  ;;  %613 = vmin.xlane.f32.xlu1 %v612_v52  ;;  %1307 = vadd.xlane.f32.xlu2 %v1305_v30  ;;  %v1037_v30 = vand.u32 65535, %v3049_v59  ;;  %v454_v35 = vrot.slane %v453_v0, 2  ;;  %v1266_v56 = vcvt.s32.f32 %v1264_v13 }
 0x127   : > { %vm347_vm4 = vcmp.gt.s32.totalorder %v268_v12, 0  ;;  %v348_v11 = vsel %vm346_vm3, %v2518_v45, 1073741824  ;;  %v361_v48 = vsel %vm346_vm3, %v2518_v45, 3221225472  ;;  %v3050_v12 = vld [vmem:[#allocation20_spill] sm:$0xff]  ;;  %v895_v27 = vcvt.s32.f32 %v893_v9 }
 0x128   : > { %v349_v5 = vsel %vm347_vm4, %v2531_v49, 1073741824  ;;  %v362_v4 = vsel %vm347_vm4, %v2531_v49, 3221225472  ;;  %vm1270_vm9 = vcmp.eq.f32.partialorder %v3050_v12, %v2444_v14  ;;  %v1039_v61 = vcvt.s32.f32 %v1037_v30 }
 0x129   : > { %vm350_vm6 = vcmp.lt.s32.totalorder %v348_v11, %v349_v5  ;;  %vm363_vm7 = vcmp.gt.s32.totalorder %v361_v48, %v362_v4  ;;  %vm1043_vm13 = vcmp.eq.f32.partialorder %v3053_v21, %v2525_v18  ;;  %v375_v6 = vsel %vm374_vm2, %v312_v8, 0  ;;  %v3054_v8 = vld [vmem:[#allocation40_spill] sm:$0xff] }
 0x12a   : > { %v351_v60 = vsel %vm350_vm6, %v348_v11, %v349_v5  ;;  %v364_v62 = vsel %vm363_vm7, %v361_v48, %v362_v4  ;;  %v772_v11 = vsel %vm771_vm8, %v767_v54, -inf  ;;  %v397_v5 = vshll.u32 %v396_v36, 16  ;;  %v3055_v21 = vld [vmem:[#allocation28_spill] sm:$0xff] }
 0x12b   : > { %v352_v52 = vrot.slane %v351_v60, 4  ;;  %v365_v46 = vrot.slane %v364_v62, 4  ;;  %v2564_v54 = vadd.s32 %v454_v35, %v453_v0  ;;  %v1271_v9 = vsel %vm1270_vm9, %v1266_v56, -inf  ;;  %v3056_v56 = vld [vmem:[#allocation25_spill] sm:$0xff] }
 0x12c   : > { %v900_v59 = vsel %vm899_vm12, %v895_v27, inf  ;;  %v1341_v35 = vand.u32 65535, %v3054_v8  ;;  %v1197_v12 = vand.u32 65535, %v3055_v21  ;;  %vm627_vm15 = vcmp.eq.f32.partialorder %v3056_v56, %v2467_v34 }
 0x12d   : > { %vm353_vm10 = vcmp.lt.s32.totalorder %v351_v60, %v352_v52  ;;  %vm366_vm11 = vcmp.gt.s32.totalorder %v364_v62, %v365_v46  ;;  %1150 = vadd.xlane.f32.xlu0 %v1148_v44  ;;  %vm215_vm6 = vcmp.eq.s32.totalorder %v2028_v58, 2  ;;  %v456_v8 = vrot.slane %v2564_v54, 1 }
 0x12e   : > { %v354_v47 = vsel %vm353_vm10, %v351_v60, %v352_v52  ;;  %v367_v48 = vsel %vm366_vm11, %v364_v62, %v365_v46  ;;  %917 = vmax.xlane.f32.xlu1 %v916_v3  ;;  %773 = vmax.xlane.f32.xlu2 %v772_v11  ;;  %v623_v60 = vcvt.s32.f32 %v621_v43  ;;  %v1044_v3 = vsel %vm1043_vm13, %v1039_v61, inf  ;;  %v2575_v43 = vpop.xlane.xlu2 %720 }
 0x12f   : > { %v355_v13 = vrot.slane %v354_v47, 2  ;;  %v368_v4 = vrot.slane %v367_v48, 2 }
 0x130   : > { %v409_v44 = vpop.xlane.xlu0 %408 }
 0x131   : > { %vm356_vm14 = vcmp.lt.s32.totalorder %v354_v47, %v355_v13  ;;  %vm369_vm0 = vcmp.gt.s32.totalorder %v367_v48, %v368_v4  ;;  %v394_v62 = vpop.xlane.xlu1 %393  ;;  %v410_v36 = vcvt.f32.s32 %v409_v44 }
 0x132   : > { %v357_v30 = vsel %vm356_vm14, %v354_v47, %v355_v13  ;;  %v370_v52 = vsel %vm369_vm0, %v367_v48, %v368_v4  ;;  %v395_v46 = vcvt.f32.s32 %v394_v62  ;;  %v3057_v4 = vld [vmem:[#allocation41_spill] sm:$0xff] }
 0x133   : > { %v358_v25 = vrot.slane %v357_v30, 1  ;;  %v371_v11 = vrot.slane %v370_v52, 1  ;;  %v413_v0 = vadd.s32 %v2534_v42, %v410_v36  ;;  %vm1347_vm10 = vcmp.eq.f32.partialorder %v3057_v4, %v2553_v28 }
 0x134   : > { %v398_v7 = vadd.s32 %v397_v5, %v395_v46  ;;  %v1343_v5 = vcvt.s32.f32 %v1341_v35  ;;  %v1199_v36 = vcvt.s32.f32 %v1197_v12  ;;  %v3060_v12 = vld [vmem:[#allocation32_spill] sm:$0xff] }
 0x135   : > { %vm359_vm3 = vcmp.lt.s32.totalorder %v357_v30, %v358_v25  ;;  %vm372_vm4 = vcmp.gt.s32.totalorder %v370_v52, %v371_v11  ;;  %vm492_vm5 = vcmp.gt.s32.totalorder %v413_v0, 0  ;;  %1272 = vmax.xlane.f32.xlu0 %v1271_v9 }
 0x136   : > { %v373_v27 = vsel %vm372_vm4, %v370_v52, %v371_v11  ;;  %vm491_vm7 = vcmp.gt.s32.totalorder %v398_v7, 0  ;;  %v494_v42 = vsel %vm492_vm5, %v2531_v49, 1073741824  ;;  %v507_v47 = vsel %vm492_vm5, %v2531_v49, 3221225472  ;;  %1045 = vmin.xlane.f32.xlu1 %v1044_v3  ;;  %901 = vmin.xlane.f32.xlu2 %v900_v59  ;;  %v3058_v3 = vld [vmem:[#allocation30_spill] sm:$0xff]  ;;  %v3059_v11 = vld [vmem:[#allocation27_spill] sm:$0xff] }
 0x137   : > { %v493_v48 = vsel %vm491_vm7, %v2518_v45, 1073741824  ;;  %v506_v61 = vsel %vm491_vm7, %v2518_v45, 3221225472  ;;  %v360_v13 = vsel %vm359_vm3, %v357_v30, %v358_v25  ;;  %v376_v44 = vsel %vm218_vm1, %v373_v27, %v375_v6 }
 0x138   : > { %vm495_vm8 = vcmp.lt.s32.totalorder %v493_v48, %v494_v42  ;;  %vm508_vm9 = vcmp.gt.s32.totalorder %v506_v61, %v507_v47  ;;  %v2588_v59 = vsel %vm215_vm6, %v360_v13, %v376_v44  ;;  %vm1203_vm11 = vcmp.eq.f32.partialorder %v3058_v3, %v2478_v31 }
 0x139   : > { %v496_v9 = vsel %vm495_vm8, %v493_v48, %v494_v42  ;;  %v509_v62 = vsel %vm508_vm9, %v506_v61, %v507_v47  ;;  %v540_v30 = vcvt.f32.s32 %v2387_v19  ;;  %v1348_v25 = vsel %vm1347_vm10, %v1343_v5, -inf  ;;  %v2599_v19 = vpop.xlane.xlu2 %877  ;;  %v3061_v5 = vld [vmem:[#allocation29_spill] sm:$0xff] }
 0x13a   : > { %v497_v52 = vrot.slane %v496_v9, 4  ;;  %v510_v46 = vrot.slane %v509_v62, 4  ;;  %v749_v0 = vand.u32 65535, %v3059_v11  ;;  %v628_v6 = vsel %vm627_vm15, %v623_v60, -inf }
 0x13b   : > { %v1204_v21 = vsel %vm1203_vm11, %v1199_v36, -inf  ;;  %v1325_v27 = vand.u32 65535, %v3060_v12  ;;  %v541_v61 = vshll.u32 %v540_v30, 16  ;;  %vm755_vm3 = vcmp.eq.f32.partialorder %v3061_v5, %v2476_v10  ;;  %v3063_v30 = vld [vmem:[#allocation31_spill] sm:$0xff] }
 0x13c   : > { %vm498_vm12 = vcmp.lt.s32.totalorder %v496_v9, %v497_v52  ;;  %vm511_vm13 = vcmp.gt.s32.totalorder %v509_v62, %v510_v46  ;;  %v751_v48 = vcvt.s32.f32 %v749_v0  ;;  %v457_v60 = vadd.s32 %v456_v8, %v2564_v54 }
 0x13d   : > { %v499_v35 = vsel %vm498_vm12, %v496_v9, %v497_v52  ;;  %v512_v7 = vsel %vm511_vm13, %v509_v62, %v510_v46  ;;  %629 = vmax.xlane.f32.xlu0 %v628_v6  ;;  %v1327_v44 = vcvt.s32.f32 %v1325_v27  ;;  %v3062_v52 = vld [vmem:[#allocation35_spill] sm:$0xff]  ;;  %v684_v6 = vcvt.f32.s32 %v2397_v57 }
 0x13e   : > { %v500_v42 = vrot.slane %v499_v35, 2  ;;  %v513_v47 = vrot.slane %v512_v7, 2  ;;  %1349 = vmax.xlane.f32.xlu1 %v1348_v25  ;;  %1205 = vmax.xlane.f32.xlu2 %v1204_v21  ;;  %vm1331_vm15 = vcmp.eq.f32.partialorder %v3062_v52, %v2493_v32  ;;  %v756_v46 = vsel %vm755_vm3, %v751_v48, inf }
 0x13f   : > { %v1053_v25 = vand.u32 65535, %v3063_v30  ;;  %v519_v11 = vsel %vm374_vm2, %v457_v60, 0  ;;  %v1332_v0 = vsel %vm1331_vm15, %v1327_v44, inf  ;;  %v685_v48 = vshll.u32 %v684_v6, 16 }
 0x140   : > { %vm501_vm14 = vcmp.lt.s32.totalorder %v499_v35, %v500_v42  ;;  %vm514_vm0 = vcmp.gt.s32.totalorder %v512_v7, %v513_v47  ;;  %v555_v44 = vcvt.f32.s32 %v2408_v41  ;;  %vm217_vm10 = vcmp.eq.s32.totalorder %v2028_v58, 1 }
 0x141   : > { %v502_v56 = vsel %vm501_vm14, %v499_v35, %v500_v42  ;;  %v515_v13 = vsel %vm514_vm0, %v512_v7, %v513_v47  ;;  %v538_v4 = vpop.xlane.xlu1 %537  ;;  %v592_v35 = vcvt.f32.s32 %v2511_v2  ;;  %v1055_v12 = vcvt.s32.f32 %v1053_v25  ;;  %v3064_v47 = vld [vmem:[#allocation33_spill] sm:$0xff] }
 0x142   : > { %v503_v9 = vrot.slane %v502_v56, 1  ;;  %v516_v62 = vrot.slane %v515_v13, 1  ;;  %v539_v36 = vcvt.f32.s32 %v538_v4  ;;  %vm1059_vm7 = vcmp.eq.f32.partialorder %v3064_v47, %v2486_v16 }
 0x143   : > { %v556_v30 = vshll.u32 %v555_v44, 16 }
 0x144   : > { %vm504_vm4 = vcmp.lt.s32.totalorder %v502_v56, %v503_v9  ;;  %vm517_vm5 = vcmp.gt.s32.totalorder %v515_v13, %v516_v62  ;;  %v542_v3 = vadd.s32 %v541_v61, %v539_v36  ;;  %v593_v61 = vshll.u32 %v592_v35, 16 }
 0x145   : > { %v518_v54 = vsel %vm517_vm5, %v515_v13, %v516_v62  ;;  %757 = vmin.xlane.f32.xlu0 %v756_v46  ;;  %v505_v8 = vsel %vm504_vm4, %v502_v56, %v503_v9  ;;  %v1060_v56 = vsel %vm1059_vm7, %v1055_v12, -inf  ;;  %v3065_v13 = vld [vmem:[#allocation36_spill] sm:$0xff]  ;;  %v343_v9 = vcvt.f32.s32 %v2383_v20 }
 0x146   : > { %1333 = vmin.xlane.f32.xlu2 %v1332_v0  ;;  %v520_v7 = vsel %vm218_vm1, %v518_v54, %v519_v11  ;;  %v1181_v4 = vand.u32 65535, %v3065_v13  ;;  %v3066_v0 = vld [vmem:[#allocation38_spill] sm:$0xff]  ;;  %vm635_vm9 = vcmp.gt.s32.totalorder %v542_v3, 0 }
 0x147   : > { %v2615_v21 = vsel %vm215_vm6, %v505_v8, %v520_v7  ;;  %vm1187_vm8 = vcmp.eq.f32.partialorder %v3066_v0, %v2499_v53  ;;  %v344_v8 = vshll.u32 %v343_v9, 16  ;;  %v637_v47 = vsel %vm635_vm9, %v2518_v45, 1073741824 }
 0x148   : > { %v1183_v46 = vcvt.s32.f32 %v1181_v4  ;;  %v650_v3 = vsel %vm635_vm9, %v2518_v45, 3221225472 }
 0x149   : > { %v588_v27 = vpop.xlane.xlu1 %587  ;;  %v682_v42 = vpop.xlane.xlu2 %681 }
 0x14a   : > { %v591_v5 = vcvt.f32.s32 %v588_v27  ;;  %v683_v57 = vcvt.f32.s32 %v682_v42  ;;  %v1188_v12 = vsel %vm1187_vm8, %v1183_v46, inf  ;;  %v699_v27 = vcvt.f32.s32 %v2419_v39 }
 0x14b   : > { %v736_v42 = vcvt.f32.s32 %v2504_v23 }
 0x14c   : > { %v594_v60 = vadd.s32 %v593_v61, %v591_v5  ;;  %v2619_v2 = vadd.s32 %v685_v48, %v683_v57  ;;  %v327_v5 = vcvt.f32.s32 %v2385_v50  ;;  %v700_v13 = vshll.u32 %v699_v27, 16 }
 0x14d   : > { %1061 = vmax.xlane.f32.xlu0 %v1060_v56 }
 0x14e   : > { %v595_v62 = vadd.s32 %v594_v60, %v2434_v24  ;;  %v488_v24 = vcvt.f32.s32 %v2393_v33  ;;  %vm779_vm14 = vcmp.gt.s32.totalorder %v2619_v2, 0 }
 0x150   : > { %v596_v36 = vrot.slane %v595_v62, 4  ;;  %v553_v52 = vpop.xlane.xlu0 %552  ;;  %v489_v39 = vshll.u32 %v488_v24, 16  ;;  %v781_v24 = vsel %vm779_vm14, %v2518_v45, 1073741824 }
 0x151   : > { %v2625_v25 = vpop.xlane.xlu1 %864  ;;  %v341_v11 = vpop.xlane.xlu2 %340  ;;  %v554_v54 = vcvt.f32.s32 %v553_v52  ;;  %v737_v52 = vshll.u32 %v736_v42, 16 }
 0x152   : > { %v597_v6 = vadd.s32 %v596_v36, %v595_v62  ;;  %v342_v41 = vcvt.f32.s32 %v341_v11  ;;  %v828_v36 = vcvt.f32.s32 %v2440_v40  ;;  %v794_v40 = vsel %vm779_vm14, %v2518_v45, 3221225472 }
 0x153   : > { %v557_v20 = vadd.s32 %v556_v30, %v554_v54 }
 0x154   : > { %v598_v35 = vrot.slane %v597_v6, 2  ;;  %v345_v7 = vadd.s32 %v344_v8, %v342_v41 }
 0x155   : > { %vm636_vm11 = vcmp.gt.s32.totalorder %v557_v20, 0  ;;  %1189 = vmin.xlane.f32.xlu0 %v1188_v12 }
 0x156   : > { %v2638_v48 = vsel %vm217_vm10, %v345_v7, %v2588_v59  ;;  %v638_v33 = vsel %vm636_vm11, %v2531_v49, 1073741824  ;;  %v651_v61 = vsel %vm636_vm11, %v2531_v49, 3221225472  ;;  %v599_v23 = vadd.s32 %v598_v35, %v597_v6 }
 0x157   : > { %vm639_vm12 = vcmp.lt.s32.totalorder %v637_v47, %v638_v33  ;;  %vm652_vm13 = vcmp.gt.s32.totalorder %v650_v3, %v651_v61 }
 0x158   : > { %v640_v57 = vsel %vm639_vm12, %v637_v47, %v638_v33  ;;  %v653_v60 = vsel %vm652_vm13, %v650_v3, %v651_v61  ;;  %v697_v56 = vpop.xlane.xlu0 %696  ;;  %v600_v11 = vrot.slane %v599_v23, 1  ;;  %vm214_vm12 = vcmp.eq.s32.totalorder %v2028_v58, 0 }
 0x159   : > { %v641_v4 = vrot.slane %v640_v57, 4  ;;  %v654_v44 = vrot.slane %v653_v60, 4  ;;  %v732_v9 = vpop.xlane.xlu1 %731  ;;  %v486_v62 = vpop.xlane.xlu2 %485  ;;  %v698_v59 = vcvt.f32.s32 %v697_v56  ;;  %vm1388_vm13 = vcmask 1040384  }
 0x15a   : > { %v735_v46 = vcvt.f32.s32 %v732_v9  ;;  %v487_v30 = vcvt.f32.s32 %v486_v62  ;;  %v601_v3 = vadd.s32 %v600_v11, %v599_v23  ;;  %v472_v9 = vcvt.f32.s32 %v2395_v26 }
 0x15b   : > { %vm642_vm0 = vcmp.lt.s32.totalorder %v640_v57, %v641_v4  ;;  %vm655_vm3 = vcmp.gt.s32.totalorder %v653_v60, %v654_v44  ;;  %v701_v50 = vadd.s32 %v700_v13, %v698_v59 }
 0x15c   : > { %v643_v54 = vsel %vm642_vm0, %v640_v57, %v641_v4  ;;  %v656_v0 = vsel %vm655_vm3, %v653_v60, %v654_v44  ;;  %v2645_v8 = vadd.s32 %v737_v52, %v735_v46  ;;  %v490_v20 = vadd.s32 %v489_v39, %v487_v30 }
 0x15d   : > { %v644_v6 = vrot.slane %v643_v54, 2  ;;  %v657_v41 = vrot.slane %v656_v0, 2  ;;  %vm780_vm15 = vcmp.gt.s32.totalorder %v701_v50, 0  ;;  %v328_v4 = vshll.u32 %v327_v5, 16 }
 0x15e   : > { %v782_v35 = vsel %vm780_vm15, %v2531_v49, 1073741824  ;;  %v795_v2 = vsel %vm780_vm15, %v2531_v49, 3221225472  ;;  %v522_v7 = vsel %vm217_vm10, %v490_v20, %v2615_v21  ;;  %v829_v44 = vshll.u32 %v828_v36, 16 }
 0x15f   : > { %vm645_vm4 = vcmp.lt.s32.totalorder %v643_v54, %v644_v6  ;;  %vm658_vm5 = vcmp.gt.s32.totalorder %v656_v0, %v657_v41  ;;  %vm783_vm7 = vcmp.lt.s32.totalorder %v781_v24, %v782_v35  ;;  %vm796_vm8 = vcmp.gt.s32.totalorder %v794_v40, %v795_v2 }
 0x160   : > { %v646_v12 = vsel %vm645_vm4, %v643_v54, %v644_v6  ;;  %v659_v27 = vsel %vm658_vm5, %v656_v0, %v657_v41  ;;  %v784_v42 = vsel %vm783_vm7, %v781_v24, %v782_v35  ;;  %v325_v47 = vpop.xlane.xlu0 %324  ;;  %v797_v39 = vsel %vm796_vm8, %v794_v40, %v795_v2 }
 0x161   : > { %v647_v33 = vrot.slane %v646_v12, 1  ;;  %v660_v61 = vrot.slane %v659_v27, 1  ;;  %v2654_v57 = vpop.xlane.xlu1 %1008  ;;  %v826_v60 = vpop.xlane.xlu2 %825  ;;  %v326_v13 = vcvt.f32.s32 %v325_v47  ;;  %v663_v23 = vsel %vm374_vm2, %v601_v3, 0 }
 0x162   : > { %v827_v56 = vcvt.f32.s32 %v826_v60  ;;  %v785_v30 = vrot.slane %v784_v42, 4  ;;  %v798_v50 = vrot.slane %v797_v39, 4  ;;  %v473_v11 = vshll.u32 %v472_v9, 16 }
 0x163   : > { %vm648_vm9 = vcmp.lt.s32.totalorder %v646_v12, %v647_v33  ;;  %vm661_vm11 = vcmp.gt.s32.totalorder %v659_v27, %v660_v61  ;;  %v329_v59 = vadd.s32 %v328_v4, %v326_v13  ;;  %v723_v20 = vcvt.f32.s32 %v2575_v43 }
 0x164   : > { %v662_v21 = vsel %vm661_vm11, %v659_v27, %v660_v61  ;;  %v830_v62 = vadd.s32 %v829_v44, %v827_v56  ;;  %v649_v52 = vsel %vm648_vm9, %v646_v12, %v647_v33  ;;  %vm786_vm14 = vcmp.lt.s32.totalorder %v784_v42, %v785_v30 }
 0x165   : > { %v664_v46 = vsel %vm218_vm1, %v662_v21, %v663_v23  ;;  %v379_v5 = vsel %vm214_vm12, %v329_v59, %v2638_v48  ;;  %vm799_vm0 = vcmp.gt.s32.totalorder %v797_v39, %v798_v50  ;;  %v787_v40 = vsel %vm786_vm14, %v784_v42, %v785_v30 }
 0x166   : > { %v2667_v36 = vsel %vm215_vm6, %v649_v52, %v664_v46  ;;  %v800_v35 = vsel %vm799_vm0, %v797_v39, %v798_v50  ;;  %v724_v12 = vshll.u32 %v723_v20, 16  ;;  %v788_v33 = vrot.slane %v787_v40, 2 }
 0x167   : > { %v801_v61 = vrot.slane %v800_v35, 2  ;;  %v843_v56 = vcvt.f32.s32 %v2414_v22  ;;  %v972_v42 = vcvt.f32.s32 %v2438_v63  ;;  %v880_v39 = vcvt.f32.s32 %v2599_v19 }
 0x168   : > { %v470_v26 = vpop.xlane.xlu0 %469  ;;  %vm789_vm3 = vcmp.lt.s32.totalorder %v787_v40, %v788_v33  ;;  %vm923_vm4 = vcmp.gt.s32.totalorder %v830_v62, 0  ;;  %v1116_v22 = vcvt.f32.s32 %v2425_v15  ;;  %v1275_v63 = vcvt.f32.s32 %v2444_v14 }
 0x169   : > { %v2669_v54 = vpop.xlane.xlu1 %875  ;;  %v2671_v0 = vpop.xlane.xlu2 %1021  ;;  %v471_v6 = vcvt.f32.s32 %v470_v26  ;;  %vm802_vm15 = vcmp.gt.s32.totalorder %v800_v35, %v801_v61  ;;  %v844_v13 = vshll.u32 %v843_v56, 16  ;;  %v790_v44 = vsel %vm789_vm3, %v787_v40, %v788_v33 }
 0x16a   : > { %v803_v21 = vsel %vm802_vm15, %v800_v35, %v801_v61  ;;  %v973_v30 = vshll.u32 %v972_v42, 16  ;;  %v791_v19 = vrot.slane %v790_v44, 1  ;;  %v881_v26 = vshll.u32 %v880_v39, 16 }
 0x16b   : > { %v474_v41 = vadd.s32 %v473_v11, %v471_v6  ;;  %v804_v50 = vrot.slane %v803_v21, 1  ;;  %v925_v11 = vsel %vm923_vm4, %v2518_v45, 1073741824  ;;  %v879_v62 = vcvt.f32.s32 %v2669_v54 }
 0x16c   : > { %vm2698_vm9 = vcmp.lt.s32.totalorder %v790_v44, %v791_v19  ;;  %v920_v14 = vcvt.f32.s32 %v2506_v55 }
 0x16d   : > { %v523_v48 = vsel %vm214_vm12, %v474_v41, %v522_v7  ;;  %v938_v41 = vsel %vm923_vm4, %v2518_v45, 3221225472  ;;  %vm2702_vm11 = vcmp.gt.s32.totalorder %v803_v21, %v804_v50 }
 0x16e   : > { %v2676_v24 = vsel %vm1388_vm13, %v379_v5, %v523_v48 }
 0x170   : > { %v719_v2 = vpop.xlane.xlu0 %718 }
 0x171   : > { %v2678_v27 = vpop.xlane.xlu1 %1152  ;;  %v2680_v47 = vpop.xlane.xlu2 %969  ;;  %v722_v3 = vcvt.f32.s32 %v719_v2 }
 0x172   : > { %v971_v42 = vcvt.f32.s32 %v2680_v47 }
 0x173   : > { %v725_v60 = vadd.s32 %v724_v12, %v722_v3 }
 0x175   : > { %v739_v43 = vadd.s32 %v2645_v8, %v725_v60  ;;  %v867_v8 = vcvt.f32.s32 %v2625_v25 }
 0x177   : > { %v740_v7 = vrot.slane %v739_v43, 4  ;;  %v868_v20 = vshll.u32 %v867_v8, 16 }
 0x178   : > { %v841_v4 = vpop.xlane.xlu0 %840 }
 0x179   : > { %v741_v9 = vadd.s32 %v740_v7, %v739_v43  ;;  %v2686_v23 = vpop.xlane.xlu1 %1019  ;;  %v2688_v59 = vpop.xlane.xlu2 %1165  ;;  %v842_v52 = vcvt.f32.s32 %v841_v4  ;;  %v1131_v43 = vcvt.f32.s32 %v2452_v37  ;;  %v987_v7 = vcvt.f32.s32 %v2465_v51 }
 0x17a   : > { %v793_v37 = vsel %vm2698_vm9, %v790_v44, %v791_v19  ;;  %v1024_v44 = vcvt.f32.s32 %v2671_v0 }
 0x17b   : > { %v742_v46 = vrot.slane %v741_v9, 2  ;;  %v845_v5 = vadd.s32 %v844_v13, %v842_v52  ;;  %v882_v13 = vadd.s32 %v881_v26, %v879_v62  ;;  %v806_v52 = vsel %vm2702_vm11, %v803_v21, %v804_v50 }
 0x17c   : > { %v974_v26 = vadd.s32 %v973_v30, %v971_v42  ;;  %v1260_v21 = vcvt.f32.s32 %v2482_v29  ;;  %v1011_v50 = vcvt.f32.s32 %v2654_v57  ;;  %v632_v29 = vcvt.f32.s32 %v2467_v34 }
 0x17d   : > { %v743_v6 = vadd.s32 %v742_v46, %v741_v9  ;;  %vm924_vm5 = vcmp.gt.s32.totalorder %v845_v5, 0  ;;  %v776_v9 = vcvt.f32.s32 %v2454_v1  ;;  %v2728_v1 = vshll.u32 %v1275_v63, 16 }
 0x17e   : > { %v926_v15 = vsel %vm924_vm5, %v2531_v49, 1073741824  ;;  %v939_v25 = vsel %vm924_vm5, %v2531_v49, 3221225472  ;;  %v904_v57 = vcvt.f32.s32 %v2469_v17  ;;  %vm1067_vm3 = vcmp.gt.s32.totalorder %v974_v26, 0 }
 0x17f   : > { %v744_v48 = vrot.slane %v743_v6, 1  ;;  %vm927_vm7 = vcmp.lt.s32.totalorder %v925_v11, %v926_v15  ;;  %vm940_vm8 = vcmp.gt.s32.totalorder %v938_v41, %v939_v25  ;;  %v2735_v30 = vshll.u32 %v776_v9, 16 }
 0x180   : > { %v928_v35 = vsel %vm927_vm7, %v925_v11, %v926_v15  ;;  %v941_v2 = vsel %vm940_vm8, %v938_v41, %v939_v25  ;;  %v863_v12 = vpop.xlane.xlu0 %862  ;;  %v2733_v15 = vshll.u32 %v1131_v43, 16  ;;  %v988_v25 = vshll.u32 %v987_v7, 16 }
 0x181   : > { %v745_v54 = vadd.s32 %v744_v48, %v743_v6  ;;  %v929_v3 = vrot.slane %v928_v35, 4  ;;  %v942_v33 = vrot.slane %v941_v2, 4  ;;  %v2706_v61 = vpop.xlane.xlu1 %1296  ;;  %v2708_v60 = vpop.xlane.xlu2 %1113  ;;  %v866_v56 = vcvt.f32.s32 %v863_v12 }
 0x182   : > { %v2726_v6 = vshll.u32 %v1116_v22, 16  ;;  %v2743_v48 = vshll.u32 %v1260_v21, 16  ;;  %v1025_v12 = vshll.u32 %v1024_v44, 16 }
 0x183   : > { %v807_v39 = vsel %vm374_vm2, %v745_v54, 0  ;;  %vm930_vm13 = vcmp.lt.s32.totalorder %v928_v35, %v929_v3  ;;  %vm943_vm14 = vcmp.gt.s32.totalorder %v941_v2, %v942_v33  ;;  %v869_v4 = vadd.s32 %v868_v20, %v866_v56 }
 0x184   : > { %v944_v8 = vsel %vm943_vm14, %v941_v2, %v942_v33  ;;  %v931_v46 = vsel %vm930_vm13, %v928_v35, %v929_v3  ;;  %v808_v47 = vsel %vm218_vm1, %v806_v52, %v807_v39  ;;  %v1012_v2 = vshll.u32 %v1011_v50, 16 }
 0x185   : > { %v945_v51 = vrot.slane %v944_v8, 2  ;;  %v883_v5 = vadd.s32 %v882_v13, %v869_v4  ;;  %v2724_v11 = vsel %vm215_vm6, %v793_v37, %v808_v47  ;;  %v932_v19 = vrot.slane %v931_v46, 2 }
 0x186   : > { %v1069_v3 = vsel %vm1067_vm3, %v2518_v45, 1073741824  ;;  %v1082_v33 = vsel %vm1067_vm3, %v2518_v45, 3221225472  ;;  %v1023_v56 = vcvt.f32.s32 %v2686_v23  ;;  %v1299_v39 = vcvt.f32.s32 %v2706_v61 }
 0x187   : > { %vm946_vm0 = vcmp.gt.s32.totalorder %v944_v8, %v945_v51  ;;  %v884_v41 = vrot.slane %v883_v5, 4  ;;  %vm933_vm15 = vcmp.lt.s32.totalorder %v931_v46, %v932_v19  ;;  %v1168_v4 = vcvt.f32.s32 %v2688_v59 }
 0x188   : > { %v985_v62 = vpop.xlane.xlu0 %984  ;;  %v947_v40 = vsel %vm946_vm0, %v944_v8, %v945_v51  ;;  %v934_v55 = vsel %vm933_vm15, %v931_v46, %v932_v19  ;;  %v1026_v51 = vadd.s32 %v1025_v12, %v1023_v56  ;;  %v1115_v46 = vcvt.f32.s32 %v2708_v60 }
 0x189   : > { %v2737_v20 = vpop.xlane.xlu1 %1163  ;;  %v2739_v22 = vpop.xlane.xlu2 %1309  ;;  %v986_v63 = vcvt.f32.s32 %v985_v62  ;;  %v885_v0 = vadd.s32 %v884_v41, %v883_v5  ;;  %v948_v43 = vrot.slane %v947_v40, 1  ;;  %v935_v50 = vrot.slane %v934_v55, 1 }
 0x18a   : > { %v1300_v44 = vshll.u32 %v1299_v39, 16  ;;  %v1312_v41 = vcvt.f32.s32 %v2739_v22  ;;  %v1118_v60 = vadd.s32 %v2726_v6, %v1115_v46  ;;  %v921_v56 = vshll.u32 %v920_v14, 16 }
 0x18b   : > { %v989_v35 = vadd.s32 %v988_v25, %v986_v63  ;;  %v886_v54 = vrot.slane %v885_v0, 2  ;;  %vm949_vm8 = vcmp.gt.s32.totalorder %v947_v40, %v948_v43  ;;  %vm2759_vm13 = vcmp.lt.s32.totalorder %v934_v55, %v935_v50 }
 0x18c   : > { %v950_v63 = vsel %vm949_vm8, %v947_v40, %v948_v43  ;;  %v1155_v40 = vcvt.f32.s32 %v2678_v27  ;;  %v1169_v43 = vshll.u32 %v1168_v4, 16  ;;  %vm1211_vm3 = vcmp.gt.s32.totalorder %v1118_v60, 0 }
 0x18d   : > { %vm1068_vm4 = vcmp.gt.s32.totalorder %v989_v35, 0  ;;  %v887_v7 = vadd.s32 %v886_v54, %v885_v0  ;;  %v1167_v27 = vcvt.f32.s32 %v2737_v20 }
 0x18e   : > { %v1070_v13 = vsel %vm1068_vm4, %v2531_v49, 1073741824  ;;  %v1083_v42 = vsel %vm1068_vm4, %v2531_v49, 3221225472 }
 0x18f   : > { %vm1071_vm5 = vcmp.lt.s32.totalorder %v1069_v3, %v1070_v13  ;;  %vm1084_vm7 = vcmp.gt.s32.totalorder %v1082_v33, %v1083_v42  ;;  %v888_v9 = vrot.slane %v887_v7, 1 }
 0x190   : > { %v1072_v52 = vsel %vm1071_vm5, %v1069_v3, %v1070_v13  ;;  %v1085_v8 = vsel %vm1084_vm7, %v1082_v33, %v1083_v42  ;;  %v1007_v37 = vpop.xlane.xlu0 %1006  ;;  %v616_v33 = vcvt.f32.s32 %v2495_v38 }
 0x191   : > { %v1073_v23 = vrot.slane %v1072_v52, 4  ;;  %v1086_v5 = vrot.slane %v1085_v8, 4  ;;  %v1295_v47 = vpop.xlane.xlu1 %1294  ;;  %v2753_v26 = vpop.xlane.xlu2 %1257  ;;  %v1010_v21 = vcvt.f32.s32 %v1007_v37  ;;  %v889_v61 = vadd.s32 %v888_v9, %v887_v7 }
 0x192   : > { %v1298_v3 = vcvt.f32.s32 %v1295_v47  ;;  %v1313_v7 = vshll.u32 %v1312_v41, 16  ;;  %v1156_v47 = vshll.u32 %v1155_v40, 16  ;;  %v1259_v46 = vcvt.f32.s32 %v2753_v26 }
 0x193   : > { %vm1074_vm9 = vcmp.lt.s32.totalorder %v1072_v52, %v1073_v23  ;;  %vm1087_vm11 = vcmp.gt.s32.totalorder %v1085_v8, %v1086_v5  ;;  %v1013_v59 = vadd.s32 %v1012_v2, %v1010_v21  ;;  %v951_v19 = vsel %vm374_vm2, %v889_v61, 0 }
 0x194   : > { %v1075_v62 = vsel %vm1074_vm9, %v1072_v52, %v1073_v23  ;;  %v1088_v25 = vsel %vm1087_vm11, %v1085_v8, %v1086_v5  ;;  %v952_v2 = vsel %vm218_vm1, %v950_v63, %v951_v19  ;;  %v937_v8 = vsel %vm2759_vm13, %v934_v55, %v935_v50 }
 0x195   : > { %v1076_v0 = vrot.slane %v1075_v62, 2  ;;  %v1089_v35 = vrot.slane %v1088_v25, 2  ;;  %v1027_v12 = vadd.s32 %v1026_v51, %v1013_v59  ;;  %v1301_v37 = vadd.s32 %v1300_v44, %v1298_v3 }
 0x196   : > { %v953_v51 = vsel %vm215_vm6, %v937_v8, %v952_v2  ;;  %v1213_v59 = vsel %vm1211_vm3, %v2518_v45, 1073741824  ;;  %v1226_v55 = vsel %vm1211_vm3, %v2518_v45, 3221225472  ;;  %v1262_v26 = vadd.s32 %v2743_v48, %v1259_v46 }
 0x197   : > { %vm1090_vm14 = vcmp.gt.s32.totalorder %v1088_v25, %v1089_v35  ;;  %v1028_v22 = vrot.slane %v1027_v12, 4  ;;  %vm1077_vm0 = vcmp.lt.s32.totalorder %v1075_v62, %v1076_v0 }
 0x198   : > { %v1129_v13 = vpop.xlane.xlu0 %1128  ;;  %v1091_v42 = vsel %vm1090_vm14, %v1088_v25, %v1089_v35  ;;  %v1078_v4 = vsel %vm1077_vm0, %v1075_v62, %v1076_v0  ;;  %v1170_v62 = vadd.s32 %v1169_v43, %v1167_v27  ;;  %vm1355_vm0 = vcmp.gt.s32.totalorder %v1262_v26, 0 }
 0x199   : > { %v1029_v39 = vadd.s32 %v1028_v22, %v1027_v12  ;;  %v2768_v9 = vpop.xlane.xlu1 %613  ;;  %v1308_v6 = vpop.xlane.xlu2 %1307  ;;  %v1130_v52 = vcvt.f32.s32 %v1129_v13  ;;  %v1092_v21 = vrot.slane %v1091_v42, 1  ;;  %v1079_v44 = vrot.slane %v1078_v4, 1 }
 0x19a   : > { %v1311_v14 = vcvt.f32.s32 %v1308_v6  ;;  %v615_v17 = vcvt.f32.s32 %v2768_v9 }
 0x19b   : > { %v1030_v23 = vrot.slane %v1029_v39, 2  ;;  %v1133_v5 = vadd.s32 %v2733_v15, %v1130_v52  ;;  %vm2781_vm7 = vcmp.gt.s32.totalorder %v1091_v42, %v1092_v21  ;;  %vm2786_vm8 = vcmp.lt.s32.totalorder %v1078_v4, %v1079_v44 }
 0x19c   : > { %v1314_v61 = vadd.s32 %v1313_v7, %v1311_v14  ;;  %v1094_v6 = vsel %vm2781_vm7, %v1091_v42, %v1092_v21  ;;  %v1208_v21 = vcvt.f32.s32 %v2478_v31  ;;  %v617_v31 = vshll.u32 %v616_v33, 16 }
 0x19d   : > { %v1031_v50 = vadd.s32 %v1030_v23, %v1029_v39  ;;  %vm1212_vm15 = vcmp.gt.s32.totalorder %v1133_v5, 0 }
 0x19e   : > { %v1315_v19 = vadd.s32 %v1314_v61, %v1301_v37  ;;  %v1214_v41 = vsel %vm1212_vm15, %v2531_v49, 1073741824  ;;  %v1227_v20 = vsel %vm1212_vm15, %v2531_v49, 3221225472 }
 0x19f   : > { %v1032_v25 = vrot.slane %v1031_v50, 1  ;;  %vm1215_vm4 = vcmp.lt.s32.totalorder %v1213_v59, %v1214_v41  ;;  %vm1228_vm5 = vcmp.gt.s32.totalorder %v1226_v55, %v1227_v20 }
 0x1a0   : > { %v1216_v63 = vsel %vm1215_vm4, %v1213_v59, %v1214_v41  ;;  %v1229_v0 = vsel %vm1228_vm5, %v1226_v55, %v1227_v20  ;;  %v1151_v35 = vpop.xlane.xlu0 %1150  ;;  %v1316_v43 = vrot.slane %v1315_v19, 4  ;;  %v1081_v59 = vsel %vm2786_vm8, %v1078_v4, %v1079_v44 }
 0x1a1   : > { %v1033_v12 = vadd.s32 %v1032_v25, %v1031_v50  ;;  %v1217_v54 = vrot.slane %v1216_v63, 4  ;;  %v1230_v60 = vrot.slane %v1229_v0, 4  ;;  %v918_v3 = vpop.xlane.xlu1 %917  ;;  %v774_v2 = vpop.xlane.xlu2 %773  ;;  %v1154_v22 = vcvt.f32.s32 %v1151_v35 }
 0x1a2   : > { %v919_v7 = vcvt.f32.s32 %v918_v3  ;;  %v775_v13 = vcvt.f32.s32 %v774_v2  ;;  %v1317_v46 = vadd.s32 %v1316_v43, %v1315_v19  ;;  %v905_v50 = vshll.u32 %v904_v57, 16 }
 0x1a3   : > { %v1095_v39 = vsel %vm374_vm2, %v1033_v12, 0  ;;  %vm1218_vm9 = vcmp.lt.s32.totalorder %v1216_v63, %v1217_v54  ;;  %vm1231_vm11 = vcmp.gt.s32.totalorder %v1229_v0, %v1230_v60  ;;  %v1157_v48 = vadd.s32 %v1156_v47, %v1154_v22 }
 0x1a4   : > { %v1219_v52 = vsel %vm1218_vm9, %v1216_v63, %v1217_v54  ;;  %v1232_v8 = vsel %vm1231_vm11, %v1229_v0, %v1230_v60  ;;  %v922_v37 = vadd.s32 %v921_v56, %v919_v7  ;;  %v778_v23 = vadd.s32 %v2735_v30, %v775_v13 }
 0x1a5   : > { %v1220_v14 = vrot.slane %v1219_v52, 2  ;;  %v1233_v27 = vrot.slane %v1232_v8, 2  ;;  %v1171_v5 = vadd.s32 %v1170_v62, %v1157_v48  ;;  %v1096_v47 = vsel %vm218_vm1, %v1094_v6, %v1095_v39 }
 0x1a6   : > { %v954_v61 = vsel %vm217_vm10, %v922_v37, %v953_v51  ;;  %v2804_v56 = vsel %vm217_vm10, %v778_v23, %v2724_v11  ;;  %v633_v30 = vshll.u32 %v632_v29, 16  ;;  %v2811_v4 = vsel %vm215_vm6, %v1081_v59, %v1096_v47 }
 0x1a7   : > { %vm1221_vm13 = vcmp.lt.s32.totalorder %v1219_v52, %v1220_v14  ;;  %vm1234_vm14 = vcmp.gt.s32.totalorder %v1232_v8, %v1233_v27  ;;  %v1172_v42 = vrot.slane %v1171_v5, 4  ;;  %v760_v20 = vcvt.f32.s32 %v2476_v10 }
 0x1a8   : > { %v1235_v51 = vsel %vm1234_vm14, %v1232_v8, %v1233_v27  ;;  %v1273_v55 = vpop.xlane.xlu0 %1272  ;;  %v1222_v44 = vsel %vm1221_vm13, %v1219_v52, %v1220_v14  ;;  %v1318_v34 = vrot.slane %v1317_v46, 2  ;;  %v1209_v63 = vshll.u32 %v1208_v21, 16 }
 0x1a9   : > { %v1173_v19 = vadd.s32 %v1172_v42, %v1171_v5  ;;  %v902_v41 = vpop.xlane.xlu2 %901  ;;  %v1274_v11 = vcvt.f32.s32 %v1273_v55  ;;  %v1236_v62 = vrot.slane %v1235_v51, 1  ;;  %v1223_v57 = vrot.slane %v1222_v44, 1  ;;  %v2820_v0 = vpop.xlane.xlu1 %1045 }
 0x1aa   : > { %v903_v29 = vcvt.f32.s32 %v902_v41  ;;  %v1357_v12 = vsel %vm1355_vm0, %v2518_v45, 1073741824  ;;  %v1370_v10 = vsel %vm1355_vm0, %v2518_v45, 3221225472  ;;  %v1319_v54 = vadd.s32 %v1318_v34, %v1317_v46 }
 0x1ab   : > { %v1174_v25 = vrot.slane %v1173_v19, 2  ;;  %v1277_v15 = vadd.s32 %v2728_v1, %v1274_v11  ;;  %vm1237_vm15 = vcmp.gt.s32.totalorder %v1235_v51, %v1236_v62  ;;  %v618_v60 = vadd.s32 %v617_v31, %v615_v17 }
 0x1ac   : > { %v906_v35 = vadd.s32 %v905_v50, %v903_v29  ;;  %vm2830_vm7 = vcmp.lt.s32.totalorder %v1222_v44, %v1223_v57  ;;  %v1320_v48 = vrot.slane %v1319_v54, 1  ;;  %v1238_v6 = vsel %vm1237_vm15, %v1235_v51, %v1236_v62 }
 0x1ad   : > { %v1175_v26 = vadd.s32 %v1174_v25, %v1173_v19  ;;  %vm1356_vm3 = vcmp.gt.s32.totalorder %v1277_v15, 0  ;;  %vm1390_vm8 = vcmask 1041408   ;;  %v1225_v23 = vsel %vm2830_vm7, %v1222_v44, %v1223_v57  ;;  %vm216_vm7 = vmor %vm214_vm12, %vm215_vm6 }
 0x1ae   : > { %v2826_v38 = vsel %vm214_vm12, %v906_v35, %v954_v61  ;;  %v1358_v1 = vsel %vm1356_vm3, %v2531_v49, 1073741824  ;;  %v1371_v33 = vsel %vm1356_vm3, %v2531_v49, 3221225472  ;;  %v1336_v47 = vcvt.f32.s32 %v2493_v32 }
 0x1af   : > { %v1176_v9 = vrot.slane %v1175_v26, 1  ;;  %vm1359_vm4 = vcmp.lt.s32.totalorder %v1357_v12, %v1358_v1  ;;  %vm1372_vm5 = vcmp.gt.s32.totalorder %v1370_v10, %v1371_v33  ;;  %v1352_v42 = vcvt.f32.s32 %v2553_v28 }
 0x1b0   : > { %v1360_v45 = vsel %vm1359_vm4, %v1357_v12, %v1358_v1  ;;  %v1373_v2 = vsel %vm1372_vm5, %v1370_v10, %v1371_v33  ;;  %v630_v22 = vpop.xlane.xlu0 %629  ;;  %v1321_v44 = vadd.s32 %v1320_v48, %v1319_v54  ;;  %v1337_v62 = vshll.u32 %v1336_v47, 16  ;;  %vm2880_vm5 = vmor %vm217_vm10, %vm218_vm1 }
 0x1b1   : > { %v1177_v40 = vadd.s32 %v1176_v9, %v1175_v26  ;;  %v1361_v43 = vrot.slane %v1360_v45, 4  ;;  %v1374_v7 = vrot.slane %v1373_v2, 4  ;;  %v1206_v13 = vpop.xlane.xlu2 %1205  ;;  %v631_v39 = vcvt.f32.s32 %v630_v22 }
 0x1b2   : > { %v1207_v49 = vcvt.f32.s32 %v1206_v13  ;;  %v1353_v25 = vshll.u32 %v1352_v42, 16  ;;  %vm1392_vm15 = vcmask 1042432   ;;  %vm1394_vm4 = vcmask 1043456  }
 0x1b3   : > { %v1239_v52 = vsel %vm374_vm2, %v1177_v40, 0  ;;  %vm1362_vm9 = vcmp.lt.s32.totalorder %v1360_v45, %v1361_v43  ;;  %vm1375_vm11 = vcmp.gt.s32.totalorder %v1373_v2, %v1374_v7  ;;  %v634_v8 = vadd.s32 %v633_v30, %v631_v39  ;;  %v1350_v30 = vpop.xlane.xlu1 %1349 }
 0x1b4   : > { %v1363_v37 = vsel %vm1362_vm9, %v1360_v45, %v1361_v43  ;;  %v1376_v14 = vsel %vm1375_vm11, %v1373_v2, %v1374_v7  ;;  %v1210_v27 = vadd.s32 %v1209_v63, %v1207_v49  ;;  %v1240_v61 = vsel %vm218_vm1, %v1238_v6, %v1239_v52 }
 0x1b5   : > { %v1364_v5 = vrot.slane %v1363_v37, 2  ;;  %v1377_v46 = vrot.slane %v1376_v14, 2  ;;  %v666_v59 = vsel %vm217_vm10, %v634_v8, %v2667_v36  ;;  %v1241_v21 = vsel %vm215_vm6, %v1225_v23, %v1240_v61 }
 0x1b6   : > { %v667_v51 = vsel %vm214_vm12, %v618_v60, %v666_v59  ;;  %v1242_v55 = vsel %vm217_vm10, %v1210_v27, %v1241_v21  ;;  %v761_v36 = vshll.u32 %v760_v20, 16  ;;  %v1351_v34 = vcvt.f32.s32 %v1350_v30 }
 0x1b7   : > { %vm1365_vm13 = vcmp.lt.s32.totalorder %v1363_v37, %v1364_v5  ;;  %vm1378_vm14 = vcmp.gt.s32.totalorder %v1376_v14, %v1377_v46  ;;  %v1391_v50 = vsel %vm1390_vm8, %v2676_v24, %v667_v51  ;;  %v1383_v24 = vsel %vm374_vm2, %v1321_v44, 0 }
 0x1b8   : > { %v1366_v32 = vsel %vm1365_vm13, %v1363_v37, %v1364_v5  ;;  %v1379_v19 = vsel %vm1378_vm14, %v1376_v14, %v1377_v46  ;;  %v758_v28 = vpop.xlane.xlu0 %757  ;;  %v1064_v57 = vcvt.f32.s32 %v2486_v16  ;;  %v1354_v35 = vadd.s32 %v1353_v25, %v1351_v34 }
 0x1b9   : > { %v1367_v41 = vrot.slane %v1366_v32, 1  ;;  %v1380_v11 = vrot.slane %v1379_v19, 1  ;;  %v1334_v29 = vpop.xlane.xlu2 %1333  ;;  %v759_v31 = vcvt.f32.s32 %v758_v28  ;;  %v1048_v26 = vcvt.f32.s32 %v2525_v18 }
 0x1ba   : > { %v1335_v15 = vcvt.f32.s32 %v1334_v29  ;;  %v1047_v60 = vcvt.f32.s32 %v2820_v0  ;;  %v1065_v2 = vshll.u32 %v1064_v57, 16  ;;  %vm1396_vm2 = vcmask 1044480  }
 0x1bb   : > { %vm1368_vm0 = vcmp.lt.s32.totalorder %v1366_v32, %v1367_v41  ;;  %vm1381_vm3 = vcmp.gt.s32.totalorder %v1379_v19, %v1380_v11  ;;  %v762_v63 = vadd.s32 %v761_v36, %v759_v31  ;;  %v1049_v22 = vshll.u32 %v1048_v26, 16 }
 0x1bc   : > { %v1382_v20 = vsel %vm1381_vm3, %v1379_v19, %v1380_v11  ;;  %v1369_v17 = vsel %vm1368_vm0, %v1366_v32, %v1367_v41  ;;  %v1338_v1 = vadd.s32 %v1337_v62, %v1335_v15  ;;  %v1192_v43 = vcvt.f32.s32 %v2499_v53 }
 0x1bd   : > { %v1384_v12 = vsel %vm218_vm1, %v1382_v20, %v1383_v24  ;;  %v811_v10 = vsel %vm214_vm12, %v762_v63, %v2804_v56  ;;  %v1050_v40 = vadd.s32 %v1049_v22, %v1047_v60  ;;  %v3081_v53 = vmov 0  }
 0x1be   : > { %v1385_v54 = vsel %vm215_vm6, %v1369_v17, %v1384_v12  ;;  %v1393_v33 = vsel %vm1392_vm15, %v1391_v50, %v811_v10  ;;  %v1193_v48 = vshll.u32 %v1192_v43, 16  ;;  %vm1398_vm8 = vcmask 1045504  }
 0x1bf   : > { %v1386_v9 = vsel %vm217_vm10, %v1354_v35, %v1385_v54  ;;  %v1395_v16 = vsel %vm1394_vm4, %v1393_v33, %v2826_v38  ;;  %vm1400_vm9 = vcmask 1046528   ;;  %v1860_v59 = vmov 4  }
 0x1c0   : > { %v1387_v3 = vsel %vm214_vm12, %v1338_v1, %v1386_v9  ;;  %v1062_v45 = vpop.xlane.xlu0 %1061  ;;  %1708 = vset.pattern.permute.xlu2 %v1860_v59  ;;  %1707 = vset.pattern.permute.xlu0 %v1860_v59 }
 0x1c1   : > { %v1063_v56 = vcvt.f32.s32 %v1062_v45  ;;  %1706 = vset.pattern.permute.xlu1 %v1860_v59 }
 0x1c3   : > { %v1066_v18 = vadd.s32 %v1065_v2, %v1063_v56 }
 0x1c5   : > { %v1098_v7 = vsel %vm217_vm10, %v1066_v18, %v2811_v4  ;;  %v224_v4 = vsel %vm2880_vm5, 3221225472, %v3081_v53 }
 0x1c6   : > { %v1099_v38 = vsel %vm214_vm12, %v1050_v40, %v1098_v7  ;;  %v225_v8 = vsel %vm216_vm7, 1073741824, %v224_v4 }
 0x1c7   : > { %v1397_v0 = vsel %vm1396_vm2, %v1395_v16, %v1099_v38 }
 0x1c8   : > { %v1190_v39 = vpop.xlane.xlu0 %1189 }
 0x1c9   : > { %v1191_v6 = vcvt.f32.s32 %v1190_v39 }
 0x1cb   : > { %v1194_v49 = vadd.s32 %v1193_v48, %v1191_v6 }
 0x1cd   : > { %v1243_v52 = vsel %vm214_vm12, %v1194_v49, %v1242_v55 }
 0x1ce   : > { %v1399_v37 = vsel %vm1398_vm8, %v1397_v0, %v1243_v52 }
 0x1cf   : > { %v1401_v14 = vsel %vm1400_vm9, %v1399_v37, %v1387_v3 }
 0x1d0   : > { %vm1403_vm11 = vcmp.lt.s32.totalorder %v225_v8, %v1401_v14  ;;  %vm1405_vm13 = vcmp.gt.s32.totalorder %v225_v8, %v1401_v14  ;;  %v1407_v27 = vadd.s32 %v1401_v14, %v225_v8 }
 0x1d1   : > { %v1404_v23 = vsel %vm1403_vm11, %v225_v8, %v1401_v14  ;;  %v1406_v5 = vsel %vm1405_vm13, %v225_v8, %v1401_v14 }
 0x1d2   : > { %v1408_v46 = vsel %vm2880_vm5, %v1406_v5, %v1407_v27 }
 0x1d3   : > { %v1409_v61 = vsel %vm216_vm7, %v1404_v23, %v1408_v46 }
 0x1d4   : > { %1422 = vrot.lane.b32.xlu0 %v1409_v61, %s1858_s21  ;;  %vm1415_vm14 = vcmp.gt.s32.totalorder %v1409_v61, 0 }
 0x1dc   : > { %1419 = vrot.lane.b32.xlu0 %v1409_v61, %s1859_s25 }
 0x246   : > { %v1423_v47 = vpop.permute.xlu0 %1422 }
 0x247   : > { %v1424_v42 = vsub.s32 %v1409_v61, %v1423_v47 }
 0x249   : > { %v1425_v30 = vadd.s32 1, %v1424_v42 }
 0x24b   : > { %1426 = vrot.lane.b32.xlu2 %v1425_v30, %s1861_s26  ;;  %1429 = vrot.lane.b32.xlu1 %v1425_v30, %s1858_s21 }
 0x24e   : > { %v1420_v21 = vpop.permute.xlu0 %1419 }
 0x24f   : > { %v1421_v51 = vsel %vm1415_vm14, %v1420_v21, 0 }
 0x253   : > { %1416 = vrot.lane.b32.xlu2 %v1409_v61, %s1862_s27 }
 0x25b   : > { %1441 = vperm.xlu2 %1708, %v1421_v51  }
 0x2a5   : > { %v1427_v55 = vpop.permute.xlu2 %1426 }
 0x2a6   : > { %v1428_v50 = vsel %vm1415_vm14, %v1427_v55, 0 }
 0x2a7   : > { %1437 = vperm.xlu0 %1707, %v1428_v50  }
 0x2bd   : > { %v1430_v36 = vpop.permute.xlu1 %1429 }
 0x2be   : > { %v1431_v44 = vsel %vm1415_vm14, %v1430_v36, 0 }
 0x2bf   : > { %1433 = vperm.xlu1 %1706, %v1431_v44  }
 0x2c0   : > { %1766 = shalt.err (!%p1763_p13)
}
 0x2c1   : > { %s1863_s26 = smov 32   ;;  %v1417_v32 = vpop.permute.xlu2 %1416  ;;  %s1616_s27 = sshll.u32 %s1953_s15, 3 }
 0x2c2   : > { %1632 = dma.vmem_to_hbm [thread:$0]  (%p1930_p9), %s1470_s28, 64, %s1472_s5, %s1450_s6, %s1863_s26, %s1863_s26, %s1859_s25   ;;  %v1418_v19 = vsel %vm1415_vm14, %v1417_v32, 0 }
 0x2c3   : > { %s1621_s29 = sshll.u32 %s1845_s12, 3  ;;  %s192_s25 = scalar_lea.vmem [#allocation7], %s1616_s27 }
 0x2c4   : > { %s1484_s4 = scalar_lea.hbm %s2966_s2, %s1621_s29  ;;  %s1486_s28 = sshll.u32 %s192_s25, 4  ;;  %s1487_s28 = int_to_ptr.vmem [resolvable:$true] %s1486_s28 }
 0x2c5   : > { %s1488_s5 = sshll.u32 %s1484_s4, 4  ;;  %s1455_s12 = scalar_lea.sflag [#allocation8], %s1953_s15  ;;  %s1489_s5 = int_to_ptr.hbm [resolvable:$true] %s1488_s5 }
 0x2c6   : > { %s1781_s6 = sshra.s32 %s1489_s5, 4  ;;  %s1787_s18 = scalar_lea.hbm %s2966_s2, 16  ;;  %s1782_s6 = int_to_ptr.hbm [resolvable:$true] %s1781_s6 }
 0x2c7   : > { %1445 = vperm.xlu1 %1706, %v1418_v19   ;;  %s1783_s7 = scalar_lea.hbm %s1782_s6, 8  ;;  %p1788_p3 = scmp.lt.s32.totalorder %s1782_s6, %s2966_s2 }
 0x2c8   : > { %p1784_p0 = scmp.ne.s32.totalorder %s1782_s6, %s1783_s7  ;;  %p1789_p4 = scmp.lt.s32.totalorder %s1787_s18, %s1783_s7 }
 0x2c9   : > { %v1442_v29 = vpop.permute.xlu2 %1441 }
 0x2ca   : > { %p1785_p1 = pnand %p1784_p0, %p1930_p9  ;;  %p1790_p5 = por %p1789_p4, %p1788_p3 }
 0x2cc   : > { %p1786_p2 = pneg %p1785_p1 }
 0x2ce   : > { %p1791_p6 = pnand %p1790_p5, %p1786_p2 }
 0x319   : > { %v1438_v11 = vpop.permute.xlu0 %1437 }
 0x331   : > { %v1434_v28 = vpop.permute.xlu1 %1433 }
 0x332   : > { %v1435_v41 = vsel %vm218_vm1, %v1434_v28, 0 }
 0x333   : > { %v1439_v34 = vsel %vm215_vm6, %v1438_v11, %v1435_v41 }
 0x334   : > { %v1443_v31 = vsel %vm217_vm10, %v1442_v29, %v1439_v34 }
 0x339   : > { %v1446_v62 = vpop.permute.xlu1 %1445 }
 0x33a   : > { %v1447_v25 = vsel %vm214_vm12, %v1446_v62, %v1443_v31 }
 0x33b   : > { %1448 = vst [vmem:[%s192_s25] sm:$0xff] %v1447_v25 }
 0x33c   : > { %1794 = shalt.err (!%p1791_p6)
}
 0x33d   : > { %1633 = dma.vmem_to_hbm [thread:$0]  (%p1930_p9), %s1487_s28, 128, %s1489_s5, %s1455_s12  }
 0x33e PF: > { %s1500_s15 = sand.u32 1, %s1833_s9   ;;  %p1641_p7 = pnand %p1609_p12, %p1937_p11 }
 0x33f   : > { %s1501_s21 = scalar_lea.sflag [#allocation5], %s1500_s15 }
 0x340   : > { %p1642_p8 = pneg %p1641_p7 }
 0x342   : > { %1824 = dma.done.wait (%p1642_p8), %s1501_s21, 64  }
 0x343   : > { %1826 = vsyncadd (%p1642_p8), %s1501_s21, 4294967232  ;;  %s1511_s26 = scalar_lea.sflag [#allocation8], %s1500_s15 }
 0x344   : > { %1828 = dma.done.wait (%p1642_p8), %s1511_s26, 128  }
 0x345   : > { %1830 = vsyncadd (%p1642_p8), %s1511_s26, 4294967168  ;;  %s22_s14 = sadd.s32 1, %s1853_s14   ;;  %s3082_s9 = smov %s1837_s10 }
 0x346   : > { %p19_p10 = scmp.ge.s32.totalorder %s22_s14, 4   ;;  %s3083_s10 = smov %s1841_s11 }
 0x347   : > { %s3084_s11 = smov %s1935_s23  ;;  %s3085_s12 = smov %s1849_s13 }
 0x348   : > { %s3086_s13 = smov %s3088_s17  ;;  %21 = sbr.rel (!%p19_p10) target bundleno = 8 (0x8), region = 94 }
 0x34d   :  { %1517 = vsyncpa [#allocation4], 1 }
 0x34e   :  { %1519 = vsyncpa [#allocation4 + $0x1], 1 }
 0x34f   :  { %1520 = vsyncpa [#allocation5], 1 }
 0x350   :  { %1522 = vsyncpa [#allocation5 + $0x1], 1 }
 0x351   :  { %1523 = vsyncpa [#allocation8], 1 }
 0x352   :  { %1525 = vsyncpa [#allocation8 + $0x1], 1 }

</bundles_post_ra>
